<compile_context>
chip_gen: v7x
topology: tpu7x:2x2x1
jax: 0.10.0
libtpu: 0.0.40
codegen_flags: <defaults>
</compile_context>

<pallas_src>
import functools

import jax
import jax.numpy as jnp
from jax import lax
from jax.experimental import pallas as pl
from jax.experimental.pallas import tpu as pltpu


def _round_up(x, m):
    return ((x + m - 1) // m) * m


def _split_rows(w, sizes):
    out, off = [], 0
    for s in sizes:
        out.append(w[off:off + s])
        off += s
    return out


# ----------------------------------------------------------------------------
# Kernel 1: K-tiled matmul with bias  (lead-field projection)
#   grid = (M/tm "parallel", K/tk "arbitrary"), f32 VMEM accumulator.
# ----------------------------------------------------------------------------
def _matmul_bias_kernel(x_ref, w_ref, b_ref, o_ref, acc_ref, *, apply_tanh):
    k = pl.program_id(1)

    @pl.when(k == 0)
    def _init():
        acc_ref[...] = jnp.zeros_like(acc_ref)

    acc_ref[...] += jnp.dot(x_ref[...], w_ref[...],
                            preferred_element_type=jnp.float32)

    @pl.when(k == pl.num_programs(1) - 1)
    def _finalize():
        out = acc_ref[...] + b_ref[...]
        if apply_tanh:
            out = jnp.tanh(out)
        o_ref[...] = out.astype(o_ref.dtype)


def pallas_matmul_bias(x, w, b, *, apply_tanh=False, compute_dtype=None,
                       tm=512, tk=512):
    """x: (M, K), w: (K, N), b: (N,) -> (M, N) f32. Tiled over M and K."""
    M, K = x.shape
    _, N = w.shape
    tm = min(tm, _round_up(M, 8))
    tk = min(tk, _round_up(K, 128))
    Mp = _round_up(M, tm)
    Kp = _round_up(K, tk)
    Np = _round_up(N, 128)          # lane-dense output stores

    if compute_dtype is not None:
        x = x.astype(compute_dtype)
        w = w.astype(compute_dtype)
    xp = jnp.pad(x, ((0, Mp - M), (0, Kp - K))) if (Mp > M or Kp > K) else x
    wp = jnp.pad(w, ((0, Kp - K), (0, Np - N))) if (Kp > K or Np > N) else w
    bp = (jnp.pad(b, (0, Np - N)) if Np > N else b).astype(jnp.float32)
    bp = bp.reshape(1, Np)

    out = pl.pallas_call(
        functools.partial(_matmul_bias_kernel, apply_tanh=apply_tanh),
        out_shape=jax.ShapeDtypeStruct((Mp, Np), jnp.float32),
        grid=(Mp // tm, Kp // tk),
        in_specs=[
            pl.BlockSpec((tm, tk), lambda i, k: (i, k)),
            pl.BlockSpec((tk, Np), lambda i, k: (k, 0)),
            pl.BlockSpec((1, Np), lambda i, k: (0, 0)),
        ],
        out_specs=pl.BlockSpec((tm, Np), lambda i, k: (i, 0)),
        scratch_shapes=[pltpu.VMEM((tm, Np), jnp.float32)],
        compiler_params=pltpu.CompilerParams(
            dimension_semantics=("parallel", "arbitrary")),
    )(xp, wp, bp)
    return out[:M, :N]


# ----------------------------------------------------------------------------
# Kernel 2: fused multi-input linear  out = sum_i x_i @ w_i + b (+ tanh)
#   Used for: gate precompute  concat(h_f, h_b) @ W_ih + b  (concat never built),
#             layer-0 input    concat(sensor, y) @ W_ih + b,
#             output projection concat(h_f, h_b) @ W_out + b -> tanh.
#   Grid over M only ("parallel"); K dims are small (<= a few hundred).
# ----------------------------------------------------------------------------
def _fused_linear_kernel(*refs, n_in, apply_tanh):
    x_refs = refs[:n_in]
    w_refs = refs[n_in:2 * n_in]
    b_ref = refs[2 * n_in]
    o_ref = refs[2 * n_in + 1]

    acc = jnp.dot(x_refs[0][...], w_refs[0][...],
                  preferred_element_type=jnp.float32)
    for xr, wr in zip(x_refs[1:], w_refs[1:]):
        acc = acc + jnp.dot(xr[...], wr[...], preferred_element_type=jnp.float32)
    acc = acc + b_ref[...]
    if apply_tanh:
        acc = jnp.tanh(acc)
    o_ref[...] = acc.astype(o_ref.dtype)


def pallas_fused_linear(xs, ws, b, *, apply_tanh=False, tm=512):
    """xs[i]: (M, K_i), ws[i]: (K_i, N), b: (N,) -> (M, N) f32."""
    M = xs[0].shape[0]
    N = ws[0].shape[1]
    n_in = len(xs)
    tm = min(tm, _round_up(M, 8))
    Mp = _round_up(M, tm)
    Np = _round_up(N, 128)          # lane-dense output stores

    xs_p = [jnp.pad(x, ((0, Mp - M), (0, 0))) if Mp > M else x for x in xs]
    ws_p = [jnp.pad(w, ((0, 0), (0, Np - N))) if Np > N else w for w in ws]
    bp = (jnp.pad(b, (0, Np - N)) if Np > N else b).astype(jnp.float32)
    bp = bp.reshape(1, Np)

    in_specs = ([pl.BlockSpec((tm, x.shape[1]), lambda i: (i, 0)) for x in xs_p]
                + [pl.BlockSpec((w.shape[0], Np), lambda i: (0, 0)) for w in ws_p]
                + [pl.BlockSpec((1, Np), lambda i: (0, 0))])

    out = pl.pallas_call(
        functools.partial(_fused_linear_kernel, n_in=n_in, apply_tanh=apply_tanh),
        out_shape=jax.ShapeDtypeStruct((Mp, Np), jnp.float32),
        grid=(Mp // tm,),
        in_specs=in_specs,
        out_specs=pl.BlockSpec((tm, Np), lambda i: (i, 0)),
        compiler_params=pltpu.CompilerParams(dimension_semantics=("parallel",)),
    )(*xs_p, *ws_p, bp)
    return out[:M, :N]


# ----------------------------------------------------------------------------
# Kernel 3: fused bidirectional LSTM recurrence, time-chunked grid.
#   Inputs are precomputed gate pre-activations gx = x @ W_ih + b  (T, B, 4d).
#   Per grid step a chunk of T_chunk time steps is processed with an in-kernel
#   fori_loop; h/c for both directions live in VMEM scratch across the grid.
#   PyTorch gate order (i, f, g, o);  b = b_ih + b_hh folded upstream.
# ----------------------------------------------------------------------------
def _lstm_chunk_kernel(*refs, d, t_chunk, bidirectional, unroll):
    if bidirectional:
        (gxf_ref, gxb_ref, whhf_ref, whhb_ref,
         of_ref, ob_ref, hf_ref, cf_ref, hb_ref, cb_ref) = refs
    else:
        gxf_ref, whhf_ref, of_ref, hf_ref, cf_ref = refs
        gxb_ref = whhb_ref = ob_ref = hb_ref = cb_ref = None

    @pl.when(pl.program_id(0) == 0)
    def _init():
        hf_ref[...] = jnp.zeros_like(hf_ref)
        cf_ref[...] = jnp.zeros_like(cf_ref)
        if bidirectional:
            hb_ref[...] = jnp.zeros_like(hb_ref)
            cb_ref[...] = jnp.zeros_like(cb_ref)

    # Hoisted out of the time loop: weight loads happen once per chunk.
    whh_f = whhf_ref[...]
    whh_b = whhb_ref[...] if bidirectional else None

    # TODO(synk): d=32 gate slices are sub-128-lane; a lane-masked full-vreg
    #             evaluation could remove the per-step cross-lane extracts.
    def cell(gx, h, c, whh):
        gates = gx + jnp.dot(h, whh, preferred_element_type=jnp.float32)
        i_g = jax.nn.sigmoid(gates[:, 0 * d:1 * d])
        f_g = jax.nn.sigmoid(gates[:, 1 * d:2 * d])
        g_g = jnp.tanh(gates[:, 2 * d:3 * d])
        o_g = jax.nn.sigmoid(gates[:, 3 * d:4 * d])
        c_new = f_g * c + i_g * g_g
        h_new = o_g * jnp.tanh(c_new)
        return h_new, c_new

    def step(t, carry):
        # forward direction: local step t (time increasing)
        h_new, c_new = cell(gxf_ref[t], hf_ref[...], cf_ref[...], whh_f)
        hf_ref[...] = h_new
        cf_ref[...] = c_new
        of_ref[t] = h_new
        if bidirectional:
            # backward direction: local step t_chunk-1-t (time decreasing)
            tr = t_chunk - 1 - t
            hb_new, cb_new = cell(gxb_ref[tr], hb_ref[...], cb_ref[...], whh_b)
            hb_ref[...] = hb_new
            cb_ref[...] = cb_new
            ob_ref[tr] = hb_new
        return carry

    lax.fori_loop(0, t_chunk, step, 0, unroll=unroll)


def pallas_lstm_layer(gxf, gxb, whh_f, whh_b, d, *, t_chunk=128):
    """gxf/gxb: (T, B, 4d) time-major gate pre-activations. gxb may be None.

    Returns (out_f, out_b), each (T, B, d); out_b is None when unidirectional.
    """
    T, B, G = gxf.shape
    bidirectional = gxb is not None
    t_chunk = min(t_chunk, T)
    Tp = _round_up(T, t_chunk)
    num_chunks = Tp // t_chunk
    unroll = True if t_chunk <= 16 else 4

    # Pad time with very negative gate pre-activations: i-gate ~ 0 keeps c == 0
    # and h == 0 through padding, so the backward direction (which sees the
    # padded tail first) enters the real sequence with a clean (0, 0) state.
    NEG = -1e9

    def pad_t(a):
        if Tp > T:
            return jnp.pad(a, ((0, Tp - T), (0, 0), (0, 0)), constant_values=NEG)
        return a

    gxf_p = pad_t(gxf)
    gx_spec_f = pl.BlockSpec((t_chunk, B, G), lambda c: (c, 0, 0))
    out_spec_f = pl.BlockSpec((t_chunk, B, d), lambda c: (c, 0, 0))
    kernel = functools.partial(_lstm_chunk_kernel, d=d, t_chunk=t_chunk,
                               bidirectional=bidirectional, unroll=unroll)

    if bidirectional:
        gxb_p = pad_t(gxb)
        rev = lambda c: (num_chunks - 1 - c, 0, 0)
        in_specs = [gx_spec_f,
                    pl.BlockSpec((t_chunk, B, G), rev),
                    pl.BlockSpec((d, G), lambda c: (0, 0)),
                    pl.BlockSpec((d, G), lambda c: (0, 0))]
        out_specs = [out_spec_f, pl.BlockSpec((t_chunk, B, d), rev)]
        out_shape = [jax.ShapeDtypeStruct((Tp, B, d), jnp.float32),
                     jax.ShapeDtypeStruct((Tp, B, d), jnp.float32)]
        scratch = [pltpu.VMEM((B, d), jnp.float32) for _ in range(4)]
        args = (gxf_p, gxb_p, whh_f, whh_b)
    else:
        in_specs = [gx_spec_f, pl.BlockSpec((d, G), lambda c: (0, 0))]
        out_specs = out_spec_f
        out_shape = jax.ShapeDtypeStruct((Tp, B, d), jnp.float32)
        scratch = [pltpu.VMEM((B, d), jnp.float32) for _ in range(2)]
        args = (gxf_p, whh_f)

    outs = pl.pallas_call(
        kernel,
        out_shape=out_shape,
        grid=(num_chunks,),
        in_specs=in_specs,
        out_specs=out_specs,
        scratch_shapes=scratch,
        compiler_params=pltpu.CompilerParams(dimension_semantics=("arbitrary",)),
    )(*args)

    if bidirectional:
        out_f, out_b = outs
        return out_f[:T], out_b[:T]
    return outs[:T], None


# ----------------------------------------------------------------------------
# Parameter construction (deterministic, synthetic)
# ----------------------------------------------------------------------------
def init_params(key, num_nodes, d, y_input_size, num_dipoles, num_layers,
                bidirectional):
    keys = iter(jax.random.split(key, 64))
    scale = 0.1
    p = {}
    # ForwardModelEnabledG: lead-field projection num_dipoles -> num_nodes
    p["lead_w"] = scale * jax.random.normal(next(keys), (num_dipoles, num_nodes),
                                            jnp.float32)
    p["lead_b"] = scale * jax.random.normal(next(keys), (num_nodes,), jnp.float32)

    # ConditionalGenerator: stacked (bi)LSTM + output projection
    num_dir = 2 if bidirectional else 1
    lstm_layers = []
    in_dim = num_nodes + y_input_size
    for _ in range(num_layers):
        layer = []
        for _dir in range(num_dir):
            w_ih = scale * jax.random.normal(next(keys), (in_dim, 4 * d), jnp.float32)
            w_hh = scale * jax.random.normal(next(keys), (d, 4 * d), jnp.float32)
            bias = scale * jax.random.normal(next(keys), (4 * d,), jnp.float32)
            layer.append((w_ih, w_hh, bias))
        if not bidirectional:
            layer.append(layer[0])  # placeholder (unused)
        lstm_layers.append(tuple(layer))
        in_dim = num_dir * d
    p["lstm_layers"] = lstm_layers
    p["out_w"] = scale * jax.random.normal(next(keys), (num_dir * d, num_nodes),
                                           jnp.float32)
    p["out_b"] = scale * jax.random.normal(next(keys), (num_nodes,), jnp.float32)
    return p


# ----------------------------------------------------------------------------
# Forward pass of cGForwardModel
# ----------------------------------------------------------------------------
def cg_forward_model(params, x, y, *, bidirectional=True, t_chunk=128):
    """x: (B, T, num_dipoles), y: (B, T, y_input_size) -> (B, T, num_nodes)."""
    B, T, P = x.shape
    num_nodes = params["lead_w"].shape[1]
    d = params["lstm_layers"][0][0][1].shape[0]
    y_in = y.shape[-1]

    # --- ForwardModelEnabledG: lead-field projection (tiled, bf16 ops, f32 acc) ---
    sensor = pallas_matmul_bias(x.reshape(B * T, P), params["lead_w"],
                                params["lead_b"], compute_dtype=jnp.bfloat16)
    sensor = sensor.reshape(B, T, num_nodes)

    # --- ConditionalGenerator ---
    # Go time-major once; only the narrow (num_nodes / y_in wide) tensors move.
    sensor_tm = jnp.transpose(sensor, (1, 0, 2)).reshape(T * B, num_nodes)
    y_tm = jnp.transpose(y, (1, 0, 2)).reshape(T * B, y_in)

    feats = [sensor_tm, y_tm]          # implicit concat(sensor, y)
    splits = [num_nodes, y_in]

    for layer in params["lstm_layers"]:
        wih_f, whh_f, b_f = layer[0]
        # Hoisted input-side matmul: gate pre-activations for the whole sequence.
        gxf = pallas_fused_linear(feats, _split_rows(wih_f, splits), b_f)
        gxf = gxf.reshape(T, B, 4 * d)
        if bidirectional:
            wih_b, whh_b, b_b = layer[1]
            gxb = pallas_fused_linear(feats, _split_rows(wih_b, splits), b_b)
            gxb = gxb.reshape(T, B, 4 * d)
        else:
            gxb = whh_b = None

        out_f, out_b = pallas_lstm_layer(gxf, gxb, whh_f, whh_b, d,
                                         t_chunk=t_chunk)
        if bidirectional:
            feats = [out_f.reshape(T * B, d), out_b.reshape(T * B, d)]
            splits = [d, d]
        else:
            feats = [out_f.reshape(T * B, d)]
            splits = [d]

    # Output projection (lane-dense, fused fwd/bwd halves) + tanh squash.
    out = pallas_fused_linear(feats, _split_rows(params["out_w"], splits),
                              params["out_b"], apply_tanh=True)
    out = out.reshape(T, B, num_nodes)
    return jnp.transpose(out, (1, 0, 2))                   # (B, T, num_nodes)


def generate_noise(key, batch_size, num_signals, y_input_size, num_dipoles):
    k1, k2 = jax.random.split(key)
    return [
        jax.random.normal(k1, (batch_size, num_signals, num_dipoles), jnp.float32),
        jax.random.normal(k2, (batch_size, num_signals, y_input_size), jnp.float32),
    ]


# ----------------------------------------------------------------------------
if __name__ == "__main__":
    # Small, kernel-friendly shapes consistent with the module's interface.
    batch = 2
    seq_len = 8          # num_signals / time steps
    num_dipoles = 128    # (7498 in the paper; shrunk for the synthetic test)
    num_nodes = 16       # sensor channels
    d = 32               # LSTM hidden size
    y_input_size = 8
    num_layers = 3
    bidirectional = True

    key = jax.random.PRNGKey(0)
    k_noise, k_params = jax.random.split(key)

    x, y = generate_noise(k_noise, batch, seq_len, y_input_size, num_dipoles)
    params = init_params(k_params, num_nodes, d, y_input_size,
                         num_dipoles, num_layers, bidirectional)

    fwd = jax.jit(functools.partial(cg_forward_model,
                                    bidirectional=bidirectional, t_chunk=128))
    out = fwd(params, x, y)
    out = jax.block_until_ready(out)

    assert out.shape == (batch, seq_len, num_nodes), out.shape
    assert out.dtype == jnp.float32
    assert bool(jnp.all(jnp.isfinite(out)))
    print("KERNEL_OK")
</pallas_src>

<mosaic_0001>
module attributes {stable_mosaic.version = 11 : i64} {
  func.func @_matmul_bias_kernel(%arg0: i32, %arg1: i32, %arg2: memref<16x128xbf16, #tpu.memory_space<vmem>>, %arg3: memref<128x128xbf16, #tpu.memory_space<vmem>>, %arg4: memref<1x128xf32, #tpu.memory_space<vmem>>, %arg5: memref<16x128xf32, #tpu.memory_space<vmem>>, %arg6: memref<16x128xf32, #tpu.memory_space<vmem>>) attributes {dimension_semantics = [#tpu.dimension_semantics<parallel>, #tpu.dimension_semantics<arbitrary>], iteration_bounds = array<i64: 1, 1>, scalar_prefetch = 0 : i64, scratch_operands = 1 : i64, tpu.core_type = #tpu.core_type<tc>, window_params = [{transform_indices = @transform_0, window_bounds = array<i64: 16, 128>}, {transform_indices = @transform_1, window_bounds = array<i64: 128, 128>}, {pipeline_mode = #tpu.pipeline_mode<synchronous>, transform_indices = @transform_2, window_bounds = array<i64: 1, 128>}, {transform_indices = @transform_3, window_bounds = array<i64: 16, 128>}]} {
    %c0_i32 = arith.constant 0 : i32
    %0 = arith.cmpi eq, %arg1, %c0_i32 : i32
    %1 = arith.extui %0 : i1 to i32
    %c0_i32_0 = arith.constant 0 : i32
    %2 = arith.cmpi ne, %1, %c0_i32_0 : i32
    scf.if %2 {
      %cst_10 = arith.constant 0.000000e+00 : f32
      %12 = vector.broadcast %cst_10 : f32 to vector<16x128xf32>
      %c0_11 = arith.constant 0 : index
      %c0_12 = arith.constant 0 : index
      %13 = vector.load %arg6[%c0_11, %c0_12] : memref<16x128xf32, #tpu.memory_space<vmem>>, vector<16x128xf32>
      tpu.vector_store %arg6[%c0_11, %c0_12], %12 {strides = array<i32>} : memref<16x128xf32, #tpu.memory_space<vmem>>, vector<16x128xf32>,
    } else {
    }
    %c0 = arith.constant 0 : index
    %c0_1 = arith.constant 0 : index
    %3 = vector.load %arg6[%c0, %c0_1] : memref<16x128xf32, #tpu.memory_space<vmem>>, vector<16x128xf32>
    %c0_2 = arith.constant 0 : index
    %c0_3 = arith.constant 0 : index
    %4 = vector.load %arg2[%c0_2, %c0_3] : memref<16x128xbf16, #tpu.memory_space<vmem>>, vector<16x128xbf16>
    %c0_4 = arith.constant 0 : index
    %c0_5 = arith.constant 0 : index
    %5 = vector.load %arg3[%c0_4, %c0_5] : memref<128x128xbf16, #tpu.memory_space<vmem>>, vector<128x128xbf16>
    %cst = arith.constant dense<0.000000e+00> : vector<16x128xf32>
    %6 = tpu.matmul %4, %5, %cst {dimension_numbers = #tpu.dot_dimension_numbers<[1], [0], [0], [1], [0, 0, 1, 1], [], []>} : vector<16x128xbf16>, vector<128x128xbf16>, vector<16x128xf32> -> vector<16x128xf32>
    %7 = arith.addf %3, %6 : vector<16x128xf32>
    %c0_6 = arith.constant 0 : index
    %c0_7 = arith.constant 0 : index
    %8 = vector.load %arg6[%c0_6, %c0_7] : memref<16x128xf32, #tpu.memory_space<vmem>>, vector<16x128xf32>
    tpu.vector_store %arg6[%c0_6, %c0_7], %7 {strides = array<i32>} : memref<16x128xf32, #tpu.memory_space<vmem>>, vector<16x128xf32>,
    %c0_i32_8 = arith.constant 0 : i32
    %9 = arith.cmpi eq, %arg1, %c0_i32_8 : i32
    %10 = arith.extui %9 : i1 to i32
    %c0_i32_9 = arith.constant 0 : i32
    %11 = arith.cmpi ne, %10, %c0_i32_9 : i32
    scf.if %11 {
      %c0_10 = arith.constant 0 : index
      %c0_11 = arith.constant 0 : index
      %12 = vector.load %arg6[%c0_10, %c0_11] : memref<16x128xf32, #tpu.memory_space<vmem>>, vector<16x128xf32>
      %c0_12 = arith.constant 0 : index
      %c0_13 = arith.constant 0 : index
      %13 = vector.load %arg4[%c0_12, %c0_13] : memref<1x128xf32, #tpu.memory_space<vmem>>, vector<1x128xf32>
      %14 = vector.broadcast %13 : vector<1x128xf32> to vector<16x128xf32>
      %15 = arith.addf %12, %14 : vector<16x128xf32>
      %c0_14 = arith.constant 0 : index
      %c0_15 = arith.constant 0 : index
      %16 = vector.load %arg5[%c0_14, %c0_15] : memref<16x128xf32, #tpu.memory_space<vmem>>, vector<16x128xf32>
      tpu.vector_store %arg5[%c0_14, %c0_15], %15 {strides = array<i32>} : memref<16x128xf32, #tpu.memory_space<vmem>>, vector<16x128xf32>,
    } else {
    }
    return
  }
  func.func @transform_0(%arg0: i32, %arg1: i32) -> (i32, i32) {
    %c0_i32 = arith.constant 0 : i32
    return %arg0, %arg1 : i32, i32
  }
  func.func @transform_1(%arg0: i32, %arg1: i32) -> (i32, i32) {
    %c0_i32 = arith.constant 0 : i32
    %c0_i32_0 = arith.constant 0 : i32
    return %arg1, %c0_i32 : i32, i32
  }
  func.func @transform_2(%arg0: i32, %arg1: i32) -> (i32, i32) {
    %c0_i32 = arith.constant 0 : i32
    %c0_i32_0 = arith.constant 0 : i32
    %c0_i32_1 = arith.constant 0 : i32
    return %c0_i32, %c0_i32_0 : i32, i32
  }
  func.func @transform_3(%arg0: i32, %arg1: i32) -> (i32, i32) {
    %c0_i32 = arith.constant 0 : i32
    %c0_i32_0 = arith.constant 0 : i32
    return %arg0, %c0_i32 : i32, i32
  }
}

module attributes {stable_mosaic.version = 11 : i64} {
  func.func @_fused_linear_kernel(%arg0: i32, %arg1: memref<16x16xf32, #tpu.memory_space<vmem>>, %arg2: memref<16x8xf32, #tpu.memory_space<vmem>>, %arg3: memref<16x128xf32, #tpu.memory_space<vmem>>, %arg4: memref<8x128xf32, #tpu.memory_space<vmem>>, %arg5: memref<1x128xf32, #tpu.memory_space<vmem>>, %arg6: memref<16x128xf32, #tpu.memory_space<vmem>>) attributes {dimension_semantics = [#tpu.dimension_semantics<parallel>], iteration_bounds = array<i64: 1>, scalar_prefetch = 0 : i64, scratch_operands = 0 : i64, tpu.core_type = #tpu.core_type<tc>, window_params = [{transform_indices = @transform_0, window_bounds = array<i64: 16, 16>}, {transform_indices = @transform_1, window_bounds = array<i64: 16, 8>}, {pipeline_mode = #tpu.pipeline_mode<synchronous>, transform_indices = @transform_2, window_bounds = array<i64: 16, 128>}, {pipeline_mode = #tpu.pipeline_mode<synchronous>, transform_indices = @transform_3, window_bounds = array<i64: 8, 128>}, {pipeline_mode = #tpu.pipeline_mode<synchronous>, transform_indices = @transform_4, window_bounds = array<i64: 1, 128>}, {transform_indices = @transform_5, window_bounds = array<i64: 16, 128>}]} {
    %c0 = arith.constant 0 : index
    %c0_0 = arith.constant 0 : index
    %0 = vector.load %arg1[%c0, %c0_0] : memref<16x16xf32, #tpu.memory_space<vmem>>, vector<16x16xf32>
    %c0_1 = arith.constant 0 : index
    %c0_2 = arith.constant 0 : index
    %1 = vector.load %arg3[%c0_1, %c0_2] : memref<16x128xf32, #tpu.memory_space<vmem>>, vector<16x128xf32>
    %cst = arith.constant dense<0.000000e+00> : vector<16x128xf32>
    %2 = tpu.matmul %0, %1, %cst {dimension_numbers = #tpu.dot_dimension_numbers<[1], [0], [0], [1], [0, 0, 1, 1], [], []>} : vector<16x16xf32>, vector<16x128xf32>, vector<16x128xf32> -> vector<16x128xf32>
    %c0_3 = arith.constant 0 : index
    %c0_4 = arith.constant 0 : index
    %3 = vector.load %arg2[%c0_3, %c0_4] : memref<16x8xf32, #tpu.memory_space<vmem>>, vector<16x8xf32>
    %c0_5 = arith.constant 0 : index
    %c0_6 = arith.constant 0 : index
    %4 = vector.load %arg4[%c0_5, %c0_6] : memref<8x128xf32, #tpu.memory_space<vmem>>, vector<8x128xf32>
    %cst_7 = arith.constant dense<0.000000e+00> : vector<16x128xf32>
    %5 = tpu.matmul %3, %4, %cst_7 {dimension_numbers = #tpu.dot_dimension_numbers<[1], [0], [0], [1], [0, 0, 1, 1], [], []>} : vector<16x8xf32>, vector<8x128xf32>, vector<16x128xf32> -> vector<16x128xf32>
    %6 = arith.addf %2, %5 : vector<16x128xf32>
    %c0_8 = arith.constant 0 : index
    %c0_9 = arith.constant 0 : index
    %7 = vector.load %arg5[%c0_8, %c0_9] : memref<1x128xf32, #tpu.memory_space<vmem>>, vector<1x128xf32>
    %8 = vector.broadcast %7 : vector<1x128xf32> to vector<16x128xf32>
    %9 = arith.addf %6, %8 : vector<16x128xf32>
    %c0_10 = arith.constant 0 : index
    %c0_11 = arith.constant 0 : index
    %10 = vector.load %arg6[%c0_10, %c0_11] : memref<16x128xf32, #tpu.memory_space<vmem>>, vector<16x128xf32>
    tpu.vector_store %arg6[%c0_10, %c0_11], %9 {strides = array<i32>} : memref<16x128xf32, #tpu.memory_space<vmem>>, vector<16x128xf32>,
    return
  }
  func.func @transform_0(%arg0: i32) -> (i32, i32) {
    %c0_i32 = arith.constant 0 : i32
    %c0_i32_0 = arith.constant 0 : i32
    return %arg0, %c0_i32 : i32, i32
  }
  func.func @transform_1(%arg0: i32) -> (i32, i32) {
    %c0_i32 = arith.constant 0 : i32
    %c0_i32_0 = arith.constant 0 : i32
    return %arg0, %c0_i32 : i32, i32
  }
  func.func @transform_2(%arg0: i32) -> (i32, i32) {
    %c0_i32 = arith.constant 0 : i32
    %c0_i32_0 = arith.constant 0 : i32
    %c0_i32_1 = arith.constant 0 : i32
    return %c0_i32, %c0_i32_0 : i32, i32
  }
  func.func @transform_3(%arg0: i32) -> (i32, i32) {
    %c0_i32 = arith.constant 0 : i32
    %c0_i32_0 = arith.constant 0 : i32
    %c0_i32_1 = arith.constant 0 : i32
    return %c0_i32, %c0_i32_0 : i32, i32
  }
  func.func @transform_4(%arg0: i32) -> (i32, i32) {
    %c0_i32 = arith.constant 0 : i32
    %c0_i32_0 = arith.constant 0 : i32
    %c0_i32_1 = arith.constant 0 : i32
    return %c0_i32, %c0_i32_0 : i32, i32
  }
  func.func @transform_5(%arg0: i32) -> (i32, i32) {
    %c0_i32 = arith.constant 0 : i32
    %c0_i32_0 = arith.constant 0 : i32
    return %arg0, %c0_i32 : i32, i32
  }
}

module attributes {stable_mosaic.version = 11 : i64} {
  func.func @_fused_linear_kernel(%arg0: i32, %arg1: memref<16x32xf32, #tpu.memory_space<vmem>>, %arg2: memref<16x32xf32, #tpu.memory_space<vmem>>, %arg3: memref<32x128xf32, #tpu.memory_space<vmem>>, %arg4: memref<32x128xf32, #tpu.memory_space<vmem>>, %arg5: memref<1x128xf32, #tpu.memory_space<vmem>>, %arg6: memref<16x128xf32, #tpu.memory_space<vmem>>) attributes {dimension_semantics = [#tpu.dimension_semantics<parallel>], iteration_bounds = array<i64: 1>, scalar_prefetch = 0 : i64, scratch_operands = 0 : i64, tpu.core_type = #tpu.core_type<tc>, window_params = [{transform_indices = @transform_0, window_bounds = array<i64: 16, 32>}, {transform_indices = @transform_1, window_bounds = array<i64: 16, 32>}, {pipeline_mode = #tpu.pipeline_mode<synchronous>, transform_indices = @transform_2, window_bounds = array<i64: 32, 128>}, {pipeline_mode = #tpu.pipeline_mode<synchronous>, transform_indices = @transform_3, window_bounds = array<i64: 32, 128>}, {pipeline_mode = #tpu.pipeline_mode<synchronous>, transform_indices = @transform_4, window_bounds = array<i64: 1, 128>}, {transform_indices = @transform_5, window_bounds = array<i64: 16, 128>}]} {
    %c0 = arith.constant 0 : index
    %c0_0 = arith.constant 0 : index
    %0 = vector.load %arg1[%c0, %c0_0] : memref<16x32xf32, #tpu.memory_space<vmem>>, vector<16x32xf32>
    %c0_1 = arith.constant 0 : index
    %c0_2 = arith.constant 0 : index
    %1 = vector.load %arg3[%c0_1, %c0_2] : memref<32x128xf32, #tpu.memory_space<vmem>>, vector<32x128xf32>
    %cst = arith.constant dense<0.000000e+00> : vector<16x128xf32>
    %2 = tpu.matmul %0, %1, %cst {dimension_numbers = #tpu.dot_dimension_numbers<[1], [0], [0], [1], [0, 0, 1, 1], [], []>} : vector<16x32xf32>, vector<32x128xf32>, vector<16x128xf32> -> vector<16x128xf32>
    %c0_3 = arith.constant 0 : index
    %c0_4 = arith.constant 0 : index
    %3 = vector.load %arg2[%c0_3, %c0_4] : memref<16x32xf32, #tpu.memory_space<vmem>>, vector<16x32xf32>
    %c0_5 = arith.constant 0 : index
    %c0_6 = arith.constant 0 : index
    %4 = vector.load %arg4[%c0_5, %c0_6] : memref<32x128xf32, #tpu.memory_space<vmem>>, vector<32x128xf32>
    %cst_7 = arith.constant dense<0.000000e+00> : vector<16x128xf32>
    %5 = tpu.matmul %3, %4, %cst_7 {dimension_numbers = #tpu.dot_dimension_numbers<[1], [0], [0], [1], [0, 0, 1, 1], [], []>} : vector<16x32xf32>, vector<32x128xf32>, vector<16x128xf32> -> vector<16x128xf32>
    %6 = arith.addf %2, %5 : vector<16x128xf32>
    %c0_8 = arith.constant 0 : index
    %c0_9 = arith.constant 0 : index
    %7 = vector.load %arg5[%c0_8, %c0_9] : memref<1x128xf32, #tpu.memory_space<vmem>>, vector<1x128xf32>
    %8 = vector.broadcast %7 : vector<1x128xf32> to vector<16x128xf32>
    %9 = arith.addf %6, %8 : vector<16x128xf32>
    %c0_10 = arith.constant 0 : index
    %c0_11 = arith.constant 0 : index
    %10 = vector.load %arg6[%c0_10, %c0_11] : memref<16x128xf32, #tpu.memory_space<vmem>>, vector<16x128xf32>
    tpu.vector_store %arg6[%c0_10, %c0_11], %9 {strides = array<i32>} : memref<16x128xf32, #tpu.memory_space<vmem>>, vector<16x128xf32>,
    return
  }
  func.func @transform_0(%arg0: i32) -> (i32, i32) {
    %c0_i32 = arith.constant 0 : i32
    %c0_i32_0 = arith.constant 0 : i32
    return %arg0, %c0_i32 : i32, i32
  }
  func.func @transform_1(%arg0: i32) -> (i32, i32) {
    %c0_i32 = arith.constant 0 : i32
    %c0_i32_0 = arith.constant 0 : i32
    return %arg0, %c0_i32 : i32, i32
  }
  func.func @transform_2(%arg0: i32) -> (i32, i32) {
    %c0_i32 = arith.constant 0 : i32
    %c0_i32_0 = arith.constant 0 : i32
    %c0_i32_1 = arith.constant 0 : i32
    return %c0_i32, %c0_i32_0 : i32, i32
  }
  func.func @transform_3(%arg0: i32) -> (i32, i32) {
    %c0_i32 = arith.constant 0 : i32
    %c0_i32_0 = arith.constant 0 : i32
    %c0_i32_1 = arith.constant 0 : i32
    return %c0_i32, %c0_i32_0 : i32, i32
  }
  func.func @transform_4(%arg0: i32) -> (i32, i32) {
    %c0_i32 = arith.constant 0 : i32
    %c0_i32_0 = arith.constant 0 : i32
    %c0_i32_1 = arith.constant 0 : i32
    return %c0_i32, %c0_i32_0 : i32, i32
  }
  func.func @transform_5(%arg0: i32) -> (i32, i32) {
    %c0_i32 = arith.constant 0 : i32
    %c0_i32_0 = arith.constant 0 : i32
    return %arg0, %c0_i32 : i32, i32
  }
}

module attributes {stable_mosaic.version = 11 : i64} {
  func.func @_lstm_chunk_kernel(%arg0: i32, %arg1: memref<8x2x128xf32, #tpu.memory_space<vmem>>, %arg2: memref<8x2x128xf32, #tpu.memory_space<vmem>>, %arg3: memref<32x128xf32, #tpu.memory_space<vmem>>, %arg4: memref<32x128xf32, #tpu.memory_space<vmem>>, %arg5: memref<8x2x32xf32, #tpu.memory_space<vmem>>, %arg6: memref<8x2x32xf32, #tpu.memory_space<vmem>>, %arg7: memref<2x32xf32, #tpu.memory_space<vmem>>, %arg8: memref<2x32xf32, #tpu.memory_space<vmem>>, %arg9: memref<2x32xf32, #tpu.memory_space<vmem>>, %arg10: memref<2x32xf32, #tpu.memory_space<vmem>>) attributes {dimension_semantics = [#tpu.dimension_semantics<arbitrary>], iteration_bounds = array<i64: 1>, scalar_prefetch = 0 : i64, scratch_operands = 4 : i64, tpu.core_type = #tpu.core_type<tc>, window_params = [{transform_indices = @transform_0, window_bounds = array<i64: 8, 2, 128>}, {transform_indices = @transform_1, window_bounds = array<i64: 8, 2, 128>}, {pipeline_mode = #tpu.pipeline_mode<synchronous>, transform_indices = @transform_2, window_bounds = array<i64: 32, 128>}, {pipeline_mode = #tpu.pipeline_mode<synchronous>, transform_indices = @transform_3, window_bounds = array<i64: 32, 128>}, {transform_indices = @transform_4, window_bounds = array<i64: 8, 2, 32>}, {transform_indices = @transform_5, window_bounds = array<i64: 8, 2, 32>}]} {
    %c0_i32 = arith.constant 0 : i32
    %0 = arith.cmpi eq, %arg0, %c0_i32 : i32
    %1 = arith.extui %0 : i1 to i32
    %c0_i32_0 = arith.constant 0 : i32
    %2 = arith.cmpi ne, %1, %c0_i32_0 : i32
    scf.if %2 {
      %cst_268 = arith.constant 0.000000e+00 : f32
      %621 = vector.broadcast %cst_268 : f32 to vector<2x32xf32>
      %c0_269 = arith.constant 0 : index
      %c0_270 = arith.constant 0 : index
      %622 = vector.load %arg7[%c0_269, %c0_270] : memref<2x32xf32, #tpu.memory_space<vmem>>, vector<2x32xf32>
      tpu.vector_store %arg7[%c0_269, %c0_270], %621 {strides = array<i32>} : memref<2x32xf32, #tpu.memory_space<vmem>>, vector<2x32xf32>,
      %cst_271 = arith.constant 0.000000e+00 : f32
      %623 = vector.broadcast %cst_271 : f32 to vector<2x32xf32>
      %c0_272 = arith.constant 0 : index
      %c0_273 = arith.constant 0 : index
      %624 = vector.load %arg8[%c0_272, %c0_273] : memref<2x32xf32, #tpu.memory_space<vmem>>, vector<2x32xf32>
      tpu.vector_store %arg8[%c0_272, %c0_273], %623 {strides = array<i32>} : memref<2x32xf32, #tpu.memory_space<vmem>>, vector<2x32xf32>,
      %cst_274 = arith.constant 0.000000e+00 : f32
      %625 = vector.broadcast %cst_274 : f32 to vector<2x32xf32>
      %c0_275 = arith.constant 0 : index
      %c0_276 = arith.constant 0 : index
      %626 = vector.load %arg9[%c0_275, %c0_276] : memref<2x32xf32, #tpu.memory_space<vmem>>, vector<2x32xf32>
      tpu.vector_store %arg9[%c0_275, %c0_276], %625 {strides = array<i32>} : memref<2x32xf32, #tpu.memory_space<vmem>>, vector<2x32xf32>,
      %cst_277 = arith.constant 0.000000e+00 : f32
      %627 = vector.broadcast %cst_277 : f32 to vector<2x32xf32>
      %c0_278 = arith.constant 0 : index
      %c0_279 = arith.constant 0 : index
      %628 = vector.load %arg10[%c0_278, %c0_279] : memref<2x32xf32, #tpu.memory_space<vmem>>, vector<2x32xf32>
      tpu.vector_store %arg10[%c0_278, %c0_279], %627 {strides = array<i32>} : memref<2x32xf32, #tpu.memory_space<vmem>>, vector<2x32xf32>,
    } else {
    }
    %c0 = arith.constant 0 : index
    %c0_1 = arith.constant 0 : index
    %3 = vector.load %arg3[%c0, %c0_1] : memref<32x128xf32, #tpu.memory_space<vmem>>, vector<32x128xf32>
    %c0_2 = arith.constant 0 : index
    %c0_3 = arith.constant 0 : index
    %4 = vector.load %arg4[%c0_2, %c0_3] : memref<32x128xf32, #tpu.memory_space<vmem>>, vector<32x128xf32>
    %c0_i32_4 = arith.constant 0 : i32
    %5 = arith.index_cast %c0_i32_4 : i32 to index
    %c0_5 = arith.constant 0 : index
    %c0_6 = arith.constant 0 : index
    %6 = vector.load %arg1[%5, %c0_5, %c0_6] : memref<8x2x128xf32, #tpu.memory_space<vmem>>, vector<1x2x128xf32>
    %7 = vector.shape_cast %6 : vector<1x2x128xf32> to vector<2x128xf32>
    %c0_7 = arith.constant 0 : index
    %c0_8 = arith.constant 0 : index
    %8 = vector.load %arg7[%c0_7, %c0_8] : memref<2x32xf32, #tpu.memory_space<vmem>>, vector<2x32xf32>
    %c0_9 = arith.constant 0 : index
    %c0_10 = arith.constant 0 : index
    %9 = vector.load %arg8[%c0_9, %c0_10] : memref<2x32xf32, #tpu.memory_space<vmem>>, vector<2x32xf32>
    %cst = arith.constant dense<0.000000e+00> : vector<2x128xf32>
    %10 = tpu.matmul %8, %3, %cst {dimension_numbers = #tpu.dot_dimension_numbers<[1], [0], [0], [1], [0, 0, 1, 1], [], []>} : vector<2x32xf32>, vector<32x128xf32>, vector<2x128xf32> -> vector<2x128xf32>
    %11 = arith.addf %7, %10 : vector<2x128xf32>
    %12 = vector.extract_strided_slice %11 {offsets = [0, 0], sizes = [2, 32], strides = [1, 1]} : vector<2x128xf32> to vector<2x32xf32>
    %13 = arith.negf %12 : vector<2x32xf32>
    %14 = math.exp %13 : vector<2x32xf32>
    %cst_11 = arith.constant 1.000000e+00 : f32
    %15 = vector.broadcast %cst_11 : f32 to vector<2x32xf32>
    %16 = arith.addf %15, %14 : vector<2x32xf32>
    %17 = arith.divf %15, %16 : vector<2x32xf32>
    %18 = vector.extract_strided_slice %11 {offsets = [0, 32], sizes = [2, 32], strides = [1, 1]} : vector<2x128xf32> to vector<2x32xf32>
    %19 = arith.negf %18 : vector<2x32xf32>
    %20 = math.exp %19 : vector<2x32xf32>
    %cst_12 = arith.constant 1.000000e+00 : f32
    %21 = vector.broadcast %cst_12 : f32 to vector<2x32xf32>
    %22 = arith.addf %21, %20 : vector<2x32xf32>
    %23 = arith.divf %21, %22 : vector<2x32xf32>
    %24 = vector.extract_strided_slice %11 {offsets = [0, 64], sizes = [2, 32], strides = [1, 1]} : vector<2x128xf32> to vector<2x32xf32>
    %25 = math.tanh %24 : vector<2x32xf32>
    %26 = vector.extract_strided_slice %11 {offsets = [0, 96], sizes = [2, 32], strides = [1, 1]} : vector<2x128xf32> to vector<2x32xf32>
    %27 = arith.negf %26 : vector<2x32xf32>
    %28 = math.exp %27 : vector<2x32xf32>
    %cst_13 = arith.constant 1.000000e+00 : f32
    %29 = vector.broadcast %cst_13 : f32 to vector<2x32xf32>
    %30 = arith.addf %29, %28 : vector<2x32xf32>
    %31 = arith.divf %29, %30 : vector<2x32xf32>
    %32 = arith.mulf %23, %9 : vector<2x32xf32>
    %33 = arith.mulf %17, %25 : vector<2x32xf32>
    %34 = arith.addf %32, %33 : vector<2x32xf32>
    %35 = math.tanh %34 : vector<2x32xf32>
    %36 = arith.mulf %31, %35 : vector<2x32xf32>
    %c0_14 = arith.constant 0 : index
    %c0_15 = arith.constant 0 : index
    %37 = vector.load %arg7[%c0_14, %c0_15] : memref<2x32xf32, #tpu.memory_space<vmem>>, vector<2x32xf32>
    tpu.vector_store %arg7[%c0_14, %c0_15], %36 {strides = array<i32>} : memref<2x32xf32, #tpu.memory_space<vmem>>, vector<2x32xf32>,
    %c0_16 = arith.constant 0 : index
    %c0_17 = arith.constant 0 : index
    %38 = vector.load %arg8[%c0_16, %c0_17] : memref<2x32xf32, #tpu.memory_space<vmem>>, vector<2x32xf32>
    tpu.vector_store %arg8[%c0_16, %c0_17], %34 {strides = array<i32>} : memref<2x32xf32, #tpu.memory_space<vmem>>, vector<2x32xf32>,
    %39 = arith.index_cast %c0_i32_4 : i32 to index
    %c0_18 = arith.constant 0 : index
    %c0_19 = arith.constant 0 : index
    %40 = vector.load %arg5[%39, %c0_18, %c0_19] : memref<8x2x32xf32, #tpu.memory_space<vmem>>, vector<1x2x32xf32>
    %41 = vector.shape_cast %40 : vector<1x2x32xf32> to vector<2x32xf32>
    %42 = vector.shape_cast %36 : vector<2x32xf32> to vector<1x2x32xf32>
    tpu.vector_store %arg5[%39, %c0_18, %c0_19], %42 {strides = array<i32>} : memref<8x2x32xf32, #tpu.memory_space<vmem>>, vector<1x2x32xf32>,
    %c7_i32 = arith.constant 7 : i32
    %43 = arith.subi %c7_i32, %c0_i32_4 : i32
    %44 = arith.index_cast %43 : i32 to index
    %c0_20 = arith.constant 0 : index
    %c0_21 = arith.constant 0 : index
    %45 = vector.load %arg2[%44, %c0_20, %c0_21] : memref<8x2x128xf32, #tpu.memory_space<vmem>>, vector<1x2x128xf32>
    %46 = vector.shape_cast %45 : vector<1x2x128xf32> to vector<2x128xf32>
    %c0_22 = arith.constant 0 : index
    %c0_23 = arith.constant 0 : index
    %47 = vector.load %arg9[%c0_22, %c0_23] : memref<2x32xf32, #tpu.memory_space<vmem>>, vector<2x32xf32>
    %c0_24 = arith.constant 0 : index
    %c0_25 = arith.constant 0 : index
    %48 = vector.load %arg10[%c0_24, %c0_25] : memref<2x32xf32, #tpu.memory_space<vmem>>, vector<2x32xf32>
    %cst_26 = arith.constant dense<0.000000e+00> : vector<2x128xf32>
    %49 = tpu.matmul %47, %4, %cst_26 {dimension_numbers = #tpu.dot_dimension_numbers<[1], [0], [0], [1], [0, 0, 1, 1], [], []>} : vector<2x32xf32>, vector<32x128xf32>, vector<2x128xf32> -> vector<2x128xf32>
    %50 = arith.addf %46, %49 : vector<2x128xf32>
    %51 = vector.extract_strided_slice %50 {offsets = [0, 0], sizes = [2, 32], strides = [1, 1]} : vector<2x128xf32> to vector<2x32xf32>
    %52 = arith.negf %51 : vector<2x32xf32>
    %53 = math.exp %52 : vector<2x32xf32>
    %cst_27 = arith.constant 1.000000e+00 : f32
    %54 = vector.broadcast %cst_27 : f32 to vector<2x32xf32>
    %55 = arith.addf %54, %53 : vector<2x32xf32>
    %56 = arith.divf %54, %55 : vector<2x32xf32>
    %57 = vector.extract_strided_slice %50 {offsets = [0, 32], sizes = [2, 32], strides = [1, 1]} : vector<2x128xf32> to vector<2x32xf32>
    %58 = arith.negf %57 : vector<2x32xf32>
    %59 = math.exp %58 : vector<2x32xf32>
    %cst_28 = arith.constant 1.000000e+00 : f32
    %60 = vector.broadcast %cst_28 : f32 to vector<2x32xf32>
    %61 = arith.addf %60, %59 : vector<2x32xf32>
    %62 = arith.divf %60, %61 : vector<2x32xf32>
    %63 = vector.extract_strided_slice %50 {offsets = [0, 64], sizes = [2, 32], strides = [1, 1]} : vector<2x128xf32> to vector<2x32xf32>
    %64 = math.tanh %63 : vector<2x32xf32>
    %65 = vector.extract_strided_slice %50 {offsets = [0, 96], sizes = [2, 32], strides = [1, 1]} : vector<2x128xf32> to vector<2x32xf32>
    %66 = arith.negf %65 : vector<2x32xf32>
    %67 = math.exp %66 : vector<2x32xf32>
    %cst_29 = arith.constant 1.000000e+00 : f32
    %68 = vector.broadcast %cst_29 : f32 to vector<2x32xf32>
    %69 = arith.addf %68, %67 : vector<2x32xf32>
    %70 = arith.divf %68, %69 : vector<2x32xf32>
    %71 = arith.mulf %62, %48 : vector<2x32xf32>
    %72 = arith.mulf %56, %64 : vector<2x32xf32>
    %73 = arith.addf %71, %72 : vector<2x32xf32>
    %74 = math.tanh %73 : vector<2x32xf32>
    %75 = arith.mulf %70, %74 : vector<2x32xf32>
    %c0_30 = arith.constant 0 : index
    %c0_31 = arith.constant 0 : index
    %76 = vector.load %arg9[%c0_30, %c0_31] : memref<2x32xf32, #tpu.memory_space<vmem>>, vector<2x32xf32>
    tpu.vector_store %arg9[%c0_30, %c0_31], %75 {strides = array<i32>} : memref<2x32xf32, #tpu.memory_space<vmem>>, vector<2x32xf32>,
    %c0_32 = arith.constant 0 : index
    %c0_33 = arith.constant 0 : index
    %77 = vector.load %arg10[%c0_32, %c0_33] : memref<2x32xf32, #tpu.memory_space<vmem>>, vector<2x32xf32>
    tpu.vector_store %arg10[%c0_32, %c0_33], %73 {strides = array<i32>} : memref<2x32xf32, #tpu.memory_space<vmem>>, vector<2x32xf32>,
    %78 = arith.index_cast %43 : i32 to index
    %c0_34 = arith.constant 0 : index
    %c0_35 = arith.constant 0 : index
    %79 = vector.load %arg6[%78, %c0_34, %c0_35] : memref<8x2x32xf32, #tpu.memory_space<vmem>>, vector<1x2x32xf32>
    %80 = vector.shape_cast %79 : vector<1x2x32xf32> to vector<2x32xf32>
    %81 = vector.shape_cast %75 : vector<2x32xf32> to vector<1x2x32xf32>
    tpu.vector_store %arg6[%78, %c0_34, %c0_35], %81 {strides = array<i32>} : memref<8x2x32xf32, #tpu.memory_space<vmem>>, vector<1x2x32xf32>,
    %c1_i32 = arith.constant 1 : i32
    %82 = arith.index_cast %c1_i32 : i32 to index
    %c0_36 = arith.constant 0 : index
    %c0_37 = arith.constant 0 : index
    %83 = vector.load %arg1[%82, %c0_36, %c0_37] : memref<8x2x128xf32, #tpu.memory_space<vmem>>, vector<1x2x128xf32>
    %84 = vector.shape_cast %83 : vector<1x2x128xf32> to vector<2x128xf32>
    %c0_38 = arith.constant 0 : index
    %c0_39 = arith.constant 0 : index
    %85 = vector.load %arg7[%c0_38, %c0_39] : memref<2x32xf32, #tpu.memory_space<vmem>>, vector<2x32xf32>
    %c0_40 = arith.constant 0 : index
    %c0_41 = arith.constant 0 : index
    %86 = vector.load %arg8[%c0_40, %c0_41] : memref<2x32xf32, #tpu.memory_space<vmem>>, vector<2x32xf32>
    %cst_42 = arith.constant dense<0.000000e+00> : vector<2x128xf32>
    %87 = tpu.matmul %85, %3, %cst_42 {dimension_numbers = #tpu.dot_dimension_numbers<[1], [0], [0], [1], [0, 0, 1, 1], [], []>} : vector<2x32xf32>, vector<32x128xf32>, vector<2x128xf32> -> vector<2x128xf32>
    %88 = arith.addf %84, %87 : vector<2x128xf32>
    %89 = vector.extract_strided_slice %88 {offsets = [0, 0], sizes = [2, 32], strides = [1, 1]} : vector<2x128xf32> to vector<2x32xf32>
    %90 = arith.negf %89 : vector<2x32xf32>
    %91 = math.exp %90 : vector<2x32xf32>
    %cst_43 = arith.constant 1.000000e+00 : f32
    %92 = vector.broadcast %cst_43 : f32 to vector<2x32xf32>
    %93 = arith.addf %92, %91 : vector<2x32xf32>
    %94 = arith.divf %92, %93 : vector<2x32xf32>
    %95 = vector.extract_strided_slice %88 {offsets = [0, 32], sizes = [2, 32], strides = [1, 1]} : vector<2x128xf32> to vector<2x32xf32>
    %96 = arith.negf %95 : vector<2x32xf32>
    %97 = math.exp %96 : vector<2x32xf32>
    %cst_44 = arith.constant 1.000000e+00 : f32
    %98 = vector.broadcast %cst_44 : f32 to vector<2x32xf32>
    %99 = arith.addf %98, %97 : vector<2x32xf32>
    %100 = arith.divf %98, %99 : vector<2x32xf32>
    %101 = vector.extract_strided_slice %88 {offsets = [0, 64], sizes = [2, 32], strides = [1, 1]} : vector<2x128xf32> to vector<2x32xf32>
    %102 = math.tanh %101 : vector<2x32xf32>
    %103 = vector.extract_strided_slice %88 {offsets = [0, 96], sizes = [2, 32], strides = [1, 1]} : vector<2x128xf32> to vector<2x32xf32>
    %104 = arith.negf %103 : vector<2x32xf32>
    %105 = math.exp %104 : vector<2x32xf32>
    %cst_45 = arith.constant 1.000000e+00 : f32
    %106 = vector.broadcast %cst_45 : f32 to vector<2x32xf32>
    %107 = arith.addf %106, %105 : vector<2x32xf32>
    %108 = arith.divf %106, %107 : vector<2x32xf32>
    %109 = arith.mulf %100, %86 : vector<2x32xf32>
    %110 = arith.mulf %94, %102 : vector<2x32xf32>
    %111 = arith.addf %109, %110 : vector<2x32xf32>
    %112 = math.tanh %111 : vector<2x32xf32>
    %113 = arith.mulf %108, %112 : vector<2x32xf32>
    %c0_46 = arith.constant 0 : index
    %c0_47 = arith.constant 0 : index
    %114 = vector.load %arg7[%c0_46, %c0_47] : memref<2x32xf32, #tpu.memory_space<vmem>>, vector<2x32xf32>
    tpu.vector_store %arg7[%c0_46, %c0_47], %113 {strides = array<i32>} : memref<2x32xf32, #tpu.memory_space<vmem>>, vector<2x32xf32>,
    %c0_48 = arith.constant 0 : index
    %c0_49 = arith.constant 0 : index
    %115 = vector.load %arg8[%c0_48, %c0_49] : memref<2x32xf32, #tpu.memory_space<vmem>>, vector<2x32xf32>
    tpu.vector_store %arg8[%c0_48, %c0_49], %111 {strides = array<i32>} : memref<2x32xf32, #tpu.memory_space<vmem>>, vector<2x32xf32>,
    %116 = arith.index_cast %c1_i32 : i32 to index
    %c0_50 = arith.constant 0 : index
    %c0_51 = arith.constant 0 : index
    %117 = vector.load %arg5[%116, %c0_50, %c0_51] : memref<8x2x32xf32, #tpu.memory_space<vmem>>, vector<1x2x32xf32>
    %118 = vector.shape_cast %117 : vector<1x2x32xf32> to vector<2x32xf32>
    %119 = vector.shape_cast %113 : vector<2x32xf32> to vector<1x2x32xf32>
    tpu.vector_store %arg5[%116, %c0_50, %c0_51], %119 {strides = array<i32>} : memref<8x2x32xf32, #tpu.memory_space<vmem>>, vector<1x2x32xf32>,
    %c7_i32_52 = arith.constant 7 : i32
    %120 = arith.subi %c7_i32_52, %c1_i32 : i32
    %121 = arith.index_cast %120 : i32 to index
    %c0_53 = arith.constant 0 : index
    %c0_54 = arith.constant 0 : index
    %122 = vector.load %arg2[%121, %c0_53, %c0_54] : memref<8x2x128xf32, #tpu.memory_space<vmem>>, vector<1x2x128xf32>
    %123 = vector.shape_cast %122 : vector<1x2x128xf32> to vector<2x128xf32>
    %c0_55 = arith.constant 0 : index
    %c0_56 = arith.constant 0 : index
    %124 = vector.load %arg9[%c0_55, %c0_56] : memref<2x32xf32, #tpu.memory_space<vmem>>, vector<2x32xf32>
    %c0_57 = arith.constant 0 : index
    %c0_58 = arith.constant 0 : index
    %125 = vector.load %arg10[%c0_57, %c0_58] : memref<2x32xf32, #tpu.memory_space<vmem>>, vector<2x32xf32>
    %cst_59 = arith.constant dense<0.000000e+00> : vector<2x128xf32>
    %126 = tpu.matmul %124, %4, %cst_59 {dimension_numbers = #tpu.dot_dimension_numbers<[1], [0], [0], [1], [0, 0, 1, 1], [], []>} : vector<2x32xf32>, vector<32x128xf32>, vector<2x128xf32> -> vector<2x128xf32>
    %127 = arith.addf %123, %126 : vector<2x128xf32>
    %128 = vector.extract_strided_slice %127 {offsets = [0, 0], sizes = [2, 32], strides = [1, 1]} : vector<2x128xf32> to vector<2x32xf32>
    %129 = arith.negf %128 : vector<2x32xf32>
    %130 = math.exp %129 : vector<2x32xf32>
    %cst_60 = arith.constant 1.000000e+00 : f32
    %131 = vector.broadcast %cst_60 : f32 to vector<2x32xf32>
    %132 = arith.addf %131, %130 : vector<2x32xf32>
    %133 = arith.divf %131, %132 : vector<2x32xf32>
    %134 = vector.extract_strided_slice %127 {offsets = [0, 32], sizes = [2, 32], strides = [1, 1]} : vector<2x128xf32> to vector<2x32xf32>
    %135 = arith.negf %134 : vector<2x32xf32>
    %136 = math.exp %135 : vector<2x32xf32>
    %cst_61 = arith.constant 1.000000e+00 : f32
    %137 = vector.broadcast %cst_61 : f32 to vector<2x32xf32>
    %138 = arith.addf %137, %136 : vector<2x32xf32>
    %139 = arith.divf %137, %138 : vector<2x32xf32>
    %140 = vector.extract_strided_slice %127 {offsets = [0, 64], sizes = [2, 32], strides = [1, 1]} : vector<2x128xf32> to vector<2x32xf32>
    %141 = math.tanh %140 : vector<2x32xf32>
    %142 = vector.extract_strided_slice %127 {offsets = [0, 96], sizes = [2, 32], strides = [1, 1]} : vector<2x128xf32> to vector<2x32xf32>
    %143 = arith.negf %142 : vector<2x32xf32>
    %144 = math.exp %143 : vector<2x32xf32>
    %cst_62 = arith.constant 1.000000e+00 : f32
    %145 = vector.broadcast %cst_62 : f32 to vector<2x32xf32>
    %146 = arith.addf %145, %144 : vector<2x32xf32>
    %147 = arith.divf %145, %146 : vector<2x32xf32>
    %148 = arith.mulf %139, %125 : vector<2x32xf32>
    %149 = arith.mulf %133, %141 : vector<2x32xf32>
    %150 = arith.addf %148, %149 : vector<2x32xf32>
    %151 = math.tanh %150 : vector<2x32xf32>
    %152 = arith.mulf %147, %151 : vector<2x32xf32>
    %c0_63 = arith.constant 0 : index
    %c0_64 = arith.constant 0 : index
    %153 = vector.load %arg9[%c0_63, %c0_64] : memref<2x32xf32, #tpu.memory_space<vmem>>, vector<2x32xf32>
    tpu.vector_store %arg9[%c0_63, %c0_64], %152 {strides = array<i32>} : memref<2x32xf32, #tpu.memory_space<vmem>>, vector<2x32xf32>,
    %c0_65 = arith.constant 0 : index
    %c0_66 = arith.constant 0 : index
    %154 = vector.load %arg10[%c0_65, %c0_66] : memref<2x32xf32, #tpu.memory_space<vmem>>, vector<2x32xf32>
    tpu.vector_store %arg10[%c0_65, %c0_66], %150 {strides = array<i32>} : memref<2x32xf32, #tpu.memory_space<vmem>>, vector<2x32xf32>,
    %155 = arith.index_cast %120 : i32 to index
    %c0_67 = arith.constant 0 : index
    %c0_68 = arith.constant 0 : index
    %156 = vector.load %arg6[%155, %c0_67, %c0_68] : memref<8x2x32xf32, #tpu.memory_space<vmem>>, vector<1x2x32xf32>
    %157 = vector.shape_cast %156 : vector<1x2x32xf32> to vector<2x32xf32>
    %158 = vector.shape_cast %152 : vector<2x32xf32> to vector<1x2x32xf32>
    tpu.vector_store %arg6[%155, %c0_67, %c0_68], %158 {strides = array<i32>} : memref<8x2x32xf32, #tpu.memory_space<vmem>>, vector<1x2x32xf32>,
    %c2_i32 = arith.constant 2 : i32
    %159 = arith.index_cast %c2_i32 : i32 to index
    %c0_69 = arith.constant 0 : index
    %c0_70 = arith.constant 0 : index
    %160 = vector.load %arg1[%159, %c0_69, %c0_70] : memref<8x2x128xf32, #tpu.memory_space<vmem>>, vector<1x2x128xf32>
    %161 = vector.shape_cast %160 : vector<1x2x128xf32> to vector<2x128xf32>
    %c0_71 = arith.constant 0 : index
    %c0_72 = arith.constant 0 : index
    %162 = vector.load %arg7[%c0_71, %c0_72] : memref<2x32xf32, #tpu.memory_space<vmem>>, vector<2x32xf32>
    %c0_73 = arith.constant 0 : index
    %c0_74 = arith.constant 0 : index
    %163 = vector.load %arg8[%c0_73, %c0_74] : memref<2x32xf32, #tpu.memory_space<vmem>>, vector<2x32xf32>
    %cst_75 = arith.constant dense<0.000000e+00> : vector<2x128xf32>
    %164 = tpu.matmul %162, %3, %cst_75 {dimension_numbers = #tpu.dot_dimension_numbers<[1], [0], [0], [1], [0, 0, 1, 1], [], []>} : vector<2x32xf32>, vector<32x128xf32>, vector<2x128xf32> -> vector<2x128xf32>
    %165 = arith.addf %161, %164 : vector<2x128xf32>
    %166 = vector.extract_strided_slice %165 {offsets = [0, 0], sizes = [2, 32], strides = [1, 1]} : vector<2x128xf32> to vector<2x32xf32>
    %167 = arith.negf %166 : vector<2x32xf32>
    %168 = math.exp %167 : vector<2x32xf32>
    %cst_76 = arith.constant 1.000000e+00 : f32
    %169 = vector.broadcast %cst_76 : f32 to vector<2x32xf32>
    %170 = arith.addf %169, %168 : vector<2x32xf32>
    %171 = arith.divf %169, %170 : vector<2x32xf32>
    %172 = vector.extract_strided_slice %165 {offsets = [0, 32], sizes = [2, 32], strides = [1, 1]} : vector<2x128xf32> to vector<2x32xf32>
    %173 = arith.negf %172 : vector<2x32xf32>
    %174 = math.exp %173 : vector<2x32xf32>
    %cst_77 = arith.constant 1.000000e+00 : f32
    %175 = vector.broadcast %cst_77 : f32 to vector<2x32xf32>
    %176 = arith.addf %175, %174 : vector<2x32xf32>
    %177 = arith.divf %175, %176 : vector<2x32xf32>
    %178 = vector.extract_strided_slice %165 {offsets = [0, 64], sizes = [2, 32], strides = [1, 1]} : vector<2x128xf32> to vector<2x32xf32>
    %179 = math.tanh %178 : vector<2x32xf32>
    %180 = vector.extract_strided_slice %165 {offsets = [0, 96], sizes = [2, 32], strides = [1, 1]} : vector<2x128xf32> to vector<2x32xf32>
    %181 = arith.negf %180 : vector<2x32xf32>
    %182 = math.exp %181 : vector<2x32xf32>
    %cst_78 = arith.constant 1.000000e+00 : f32
    %183 = vector.broadcast %cst_78 : f32 to vector<2x32xf32>
    %184 = arith.addf %183, %182 : vector<2x32xf32>
    %185 = arith.divf %183, %184 : vector<2x32xf32>
    %186 = arith.mulf %177, %163 : vector<2x32xf32>
    %187 = arith.mulf %171, %179 : vector<2x32xf32>
    %188 = arith.addf %186, %187 : vector<2x32xf32>
    %189 = math.tanh %188 : vector<2x32xf32>
    %190 = arith.mulf %185, %189 : vector<2x32xf32>
    %c0_79 = arith.constant 0 : index
    %c0_80 = arith.constant 0 : index
    %191 = vector.load %arg7[%c0_79, %c0_80] : memref<2x32xf32, #tpu.memory_space<vmem>>, vector<2x32xf32>
    tpu.vector_store %arg7[%c0_79, %c0_80], %190 {strides = array<i32>} : memref<2x32xf32, #tpu.memory_space<vmem>>, vector<2x32xf32>,
    %c0_81 = arith.constant 0 : index
    %c0_82 = arith.constant 0 : index
    %192 = vector.load %arg8[%c0_81, %c0_82] : memref<2x32xf32, #tpu.memory_space<vmem>>, vector<2x32xf32>
    tpu.vector_store %arg8[%c0_81, %c0_82], %188 {strides = array<i32>} : memref<2x32xf32, #tpu.memory_space<vmem>>, vector<2x32xf32>,
    %193 = arith.index_cast %c2_i32 : i32 to index
    %c0_83 = arith.constant 0 : index
    %c0_84 = arith.constant 0 : index
    %194 = vector.load %arg5[%193, %c0_83, %c0_84] : memref<8x2x32xf32, #tpu.memory_space<vmem>>, vector<1x2x32xf32>
    %195 = vector.shape_cast %194 : vector<1x2x32xf32> to vector<2x32xf32>
    %196 = vector.shape_cast %190 : vector<2x32xf32> to vector<1x2x32xf32>
    tpu.vector_store %arg5[%193, %c0_83, %c0_84], %196 {strides = array<i32>} : memref<8x2x32xf32, #tpu.memory_space<vmem>>, vector<1x2x32xf32>,
    %c7_i32_85 = arith.constant 7 : i32
    %197 = arith.subi %c7_i32_85, %c2_i32 : i32
    %198 = arith.index_cast %197 : i32 to index
    %c0_86 = arith.constant 0 : index
    %c0_87 = arith.constant 0 : index
    %199 = vector.load %arg2[%198, %c0_86, %c0_87] : memref<8x2x128xf32, #tpu.memory_space<vmem>>, vector<1x2x128xf32>
    %200 = vector.shape_cast %199 : vector<1x2x128xf32> to vector<2x128xf32>
    %c0_88 = arith.constant 0 : index
    %c0_89 = arith.constant 0 : index
    %201 = vector.load %arg9[%c0_88, %c0_89] : memref<2x32xf32, #tpu.memory_space<vmem>>, vector<2x32xf32>
    %c0_90 = arith.constant 0 : index
    %c0_91 = arith.constant 0 : index
    %202 = vector.load %arg10[%c0_90, %c0_91] : memref<2x32xf32, #tpu.memory_space<vmem>>, vector<2x32xf32>
    %cst_92 = arith.constant dense<0.000000e+00> : vector<2x128xf32>
    %203 = tpu.matmul %201, %4, %cst_92 {dimension_numbers = #tpu.dot_dimension_numbers<[1], [0], [0], [1], [0, 0, 1, 1], [], []>} : vector<2x32xf32>, vector<32x128xf32>, vector<2x128xf32> -> vector<2x128xf32>
    %204 = arith.addf %200, %203 : vector<2x128xf32>
    %205 = vector.extract_strided_slice %204 {offsets = [0, 0], sizes = [2, 32], strides = [1, 1]} : vector<2x128xf32> to vector<2x32xf32>
    %206 = arith.negf %205 : vector<2x32xf32>
    %207 = math.exp %206 : vector<2x32xf32>
    %cst_93 = arith.constant 1.000000e+00 : f32
    %208 = vector.broadcast %cst_93 : f32 to vector<2x32xf32>
    %209 = arith.addf %208, %207 : vector<2x32xf32>
    %210 = arith.divf %208, %209 : vector<2x32xf32>
    %211 = vector.extract_strided_slice %204 {offsets = [0, 32], sizes = [2, 32], strides = [1, 1]} : vector<2x128xf32> to vector<2x32xf32>
    %212 = arith.negf %211 : vector<2x32xf32>
    %213 = math.exp %212 : vector<2x32xf32>
    %cst_94 = arith.constant 1.000000e+00 : f32
    %214 = vector.broadcast %cst_94 : f32 to vector<2x32xf32>
    %215 = arith.addf %214, %213 : vector<2x32xf32>
    %216 = arith.divf %214, %215 : vector<2x32xf32>
    %217 = vector.extract_strided_slice %204 {offsets = [0, 64], sizes = [2, 32], strides = [1, 1]} : vector<2x128xf32> to vector<2x32xf32>
    %218 = math.tanh %217 : vector<2x32xf32>
    %219 = vector.extract_strided_slice %204 {offsets = [0, 96], sizes = [2, 32], strides = [1, 1]} : vector<2x128xf32> to vector<2x32xf32>
    %220 = arith.negf %219 : vector<2x32xf32>
    %221 = math.exp %220 : vector<2x32xf32>
    %cst_95 = arith.constant 1.000000e+00 : f32
    %222 = vector.broadcast %cst_95 : f32 to vector<2x32xf32>
    %223 = arith.addf %222, %221 : vector<2x32xf32>
    %224 = arith.divf %222, %223 : vector<2x32xf32>
    %225 = arith.mulf %216, %202 : vector<2x32xf32>
    %226 = arith.mulf %210, %218 : vector<2x32xf32>
    %227 = arith.addf %225, %226 : vector<2x32xf32>
    %228 = math.tanh %227 : vector<2x32xf32>
    %229 = arith.mulf %224, %228 : vector<2x32xf32>
    %c0_96 = arith.constant 0 : index
    %c0_97 = arith.constant 0 : index
    %230 = vector.load %arg9[%c0_96, %c0_97] : memref<2x32xf32, #tpu.memory_space<vmem>>, vector<2x32xf32>
    tpu.vector_store %arg9[%c0_96, %c0_97], %229 {strides = array<i32>} : memref<2x32xf32, #tpu.memory_space<vmem>>, vector<2x32xf32>,
    %c0_98 = arith.constant 0 : index
    %c0_99 = arith.constant 0 : index
    %231 = vector.load %arg10[%c0_98, %c0_99] : memref<2x32xf32, #tpu.memory_space<vmem>>, vector<2x32xf32>
    tpu.vector_store %arg10[%c0_98, %c0_99], %227 {strides = array<i32>} : memref<2x32xf32, #tpu.memory_space<vmem>>, vector<2x32xf32>,
    %232 = arith.index_cast %197 : i32 to index
    %c0_100 = arith.constant 0 : index
    %c0_101 = arith.constant 0 : index
    %233 = vector.load %arg6[%232, %c0_100, %c0_101] : memref<8x2x32xf32, #tpu.memory_space<vmem>>, vector<1x2x32xf32>
    %234 = vector.shape_cast %233 : vector<1x2x32xf32> to vector<2x32xf32>
    %235 = vector.shape_cast %229 : vector<2x32xf32> to vector<1x2x32xf32>
    tpu.vector_store %arg6[%232, %c0_100, %c0_101], %235 {strides = array<i32>} : memref<8x2x32xf32, #tpu.memory_space<vmem>>, vector<1x2x32xf32>,
    %c3_i32 = arith.constant 3 : i32
    %236 = arith.index_cast %c3_i32 : i32 to index
    %c0_102 = arith.constant 0 : index
    %c0_103 = arith.constant 0 : index
    %237 = vector.load %arg1[%236, %c0_102, %c0_103] : memref<8x2x128xf32, #tpu.memory_space<vmem>>, vector<1x2x128xf32>
    %238 = vector.shape_cast %237 : vector<1x2x128xf32> to vector<2x128xf32>
    %c0_104 = arith.constant 0 : index
    %c0_105 = arith.constant 0 : index
    %239 = vector.load %arg7[%c0_104, %c0_105] : memref<2x32xf32, #tpu.memory_space<vmem>>, vector<2x32xf32>
    %c0_106 = arith.constant 0 : index
    %c0_107 = arith.constant 0 : index
    %240 = vector.load %arg8[%c0_106, %c0_107] : memref<2x32xf32, #tpu.memory_space<vmem>>, vector<2x32xf32>
    %cst_108 = arith.constant dense<0.000000e+00> : vector<2x128xf32>
    %241 = tpu.matmul %239, %3, %cst_108 {dimension_numbers = #tpu.dot_dimension_numbers<[1], [0], [0], [1], [0, 0, 1, 1], [], []>} : vector<2x32xf32>, vector<32x128xf32>, vector<2x128xf32> -> vector<2x128xf32>
    %242 = arith.addf %238, %241 : vector<2x128xf32>
    %243 = vector.extract_strided_slice %242 {offsets = [0, 0], sizes = [2, 32], strides = [1, 1]} : vector<2x128xf32> to vector<2x32xf32>
    %244 = arith.negf %243 : vector<2x32xf32>
    %245 = math.exp %244 : vector<2x32xf32>
    %cst_109 = arith.constant 1.000000e+00 : f32
    %246 = vector.broadcast %cst_109 : f32 to vector<2x32xf32>
    %247 = arith.addf %246, %245 : vector<2x32xf32>
    %248 = arith.divf %246, %247 : vector<2x32xf32>
    %249 = vector.extract_strided_slice %242 {offsets = [0, 32], sizes = [2, 32], strides = [1, 1]} : vector<2x128xf32> to vector<2x32xf32>
    %250 = arith.negf %249 : vector<2x32xf32>
    %251 = math.exp %250 : vector<2x32xf32>
    %cst_110 = arith.constant 1.000000e+00 : f32
    %252 = vector.broadcast %cst_110 : f32 to vector<2x32xf32>
    %253 = arith.addf %252, %251 : vector<2x32xf32>
    %254 = arith.divf %252, %253 : vector<2x32xf32>
    %255 = vector.extract_strided_slice %242 {offsets = [0, 64], sizes = [2, 32], strides = [1, 1]} : vector<2x128xf32> to vector<2x32xf32>
    %256 = math.tanh %255 : vector<2x32xf32>
    %257 = vector.extract_strided_slice %242 {offsets = [0, 96], sizes = [2, 32], strides = [1, 1]} : vector<2x128xf32> to vector<2x32xf32>
    %258 = arith.negf %257 : vector<2x32xf32>
    %259 = math.exp %258 : vector<2x32xf32>
    %cst_111 = arith.constant 1.000000e+00 : f32
    %260 = vector.broadcast %cst_111 : f32 to vector<2x32xf32>
    %261 = arith.addf %260, %259 : vector<2x32xf32>
    %262 = arith.divf %260, %261 : vector<2x32xf32>
    %263 = arith.mulf %254, %240 : vector<2x32xf32>
    %264 = arith.mulf %248, %256 : vector<2x32xf32>
    %265 = arith.addf %263, %264 : vector<2x32xf32>
    %266 = math.tanh %265 : vector<2x32xf32>
    %267 = arith.mulf %262, %266 : vector<2x32xf32>
    %c0_112 = arith.constant 0 : index
    %c0_113 = arith.constant 0 : index
    %268 = vector.load %arg7[%c0_112, %c0_113] : memref<2x32xf32, #tpu.memory_space<vmem>>, vector<2x32xf32>
    tpu.vector_store %arg7[%c0_112, %c0_113], %267 {strides = array<i32>} : memref<2x32xf32, #tpu.memory_space<vmem>>, vector<2x32xf32>,
    %c0_114 = arith.constant 0 : index
    %c0_115 = arith.constant 0 : index
    %269 = vector.load %arg8[%c0_114, %c0_115] : memref<2x32xf32, #tpu.memory_space<vmem>>, vector<2x32xf32>
    tpu.vector_store %arg8[%c0_114, %c0_115], %265 {strides = array<i32>} : memref<2x32xf32, #tpu.memory_space<vmem>>, vector<2x32xf32>,
    %270 = arith.index_cast %c3_i32 : i32 to index
    %c0_116 = arith.constant 0 : index
    %c0_117 = arith.constant 0 : index
    %271 = vector.load %arg5[%270, %c0_116, %c0_117] : memref<8x2x32xf32, #tpu.memory_space<vmem>>, vector<1x2x32xf32>
    %272 = vector.shape_cast %271 : vector<1x2x32xf32> to vector<2x32xf32>
    %273 = vector.shape_cast %267 : vector<2x32xf32> to vector<1x2x32xf32>
    tpu.vector_store %arg5[%270, %c0_116, %c0_117], %273 {strides = array<i32>} : memref<8x2x32xf32, #tpu.memory_space<vmem>>, vector<1x2x32xf32>,
    %c7_i32_118 = arith.constant 7 : i32
    %274 = arith.subi %c7_i32_118, %c3_i32 : i32
    %275 = arith.index_cast %274 : i32 to index
    %c0_119 = arith.constant 0 : index
    %c0_120 = arith.constant 0 : index
    %276 = vector.load %arg2[%275, %c0_119, %c0_120] : memref<8x2x128xf32, #tpu.memory_space<vmem>>, vector<1x2x128xf32>
    %277 = vector.shape_cast %276 : vector<1x2x128xf32> to vector<2x128xf32>
    %c0_121 = arith.constant 0 : index
    %c0_122 = arith.constant 0 : index
    %278 = vector.load %arg9[%c0_121, %c0_122] : memref<2x32xf32, #tpu.memory_space<vmem>>, vector<2x32xf32>
    %c0_123 = arith.constant 0 : index
    %c0_124 = arith.constant 0 : index
    %279 = vector.load %arg10[%c0_123, %c0_124] : memref<2x32xf32, #tpu.memory_space<vmem>>, vector<2x32xf32>
    %cst_125 = arith.constant dense<0.000000e+00> : vector<2x128xf32>
    %280 = tpu.matmul %278, %4, %cst_125 {dimension_numbers = #tpu.dot_dimension_numbers<[1], [0], [0], [1], [0, 0, 1, 1], [], []>} : vector<2x32xf32>, vector<32x128xf32>, vector<2x128xf32> -> vector<2x128xf32>
    %281 = arith.addf %277, %280 : vector<2x128xf32>
    %282 = vector.extract_strided_slice %281 {offsets = [0, 0], sizes = [2, 32], strides = [1, 1]} : vector<2x128xf32> to vector<2x32xf32>
    %283 = arith.negf %282 : vector<2x32xf32>
    %284 = math.exp %283 : vector<2x32xf32>
    %cst_126 = arith.constant 1.000000e+00 : f32
    %285 = vector.broadcast %cst_126 : f32 to vector<2x32xf32>
    %286 = arith.addf %285, %284 : vector<2x32xf32>
    %287 = arith.divf %285, %286 : vector<2x32xf32>
    %288 = vector.extract_strided_slice %281 {offsets = [0, 32], sizes = [2, 32], strides = [1, 1]} : vector<2x128xf32> to vector<2x32xf32>
    %289 = arith.negf %288 : vector<2x32xf32>
    %290 = math.exp %289 : vector<2x32xf32>
    %cst_127 = arith.constant 1.000000e+00 : f32
    %291 = vector.broadcast %cst_127 : f32 to vector<2x32xf32>
    %292 = arith.addf %291, %290 : vector<2x32xf32>
    %293 = arith.divf %291, %292 : vector<2x32xf32>
    %294 = vector.extract_strided_slice %281 {offsets = [0, 64], sizes = [2, 32], strides = [1, 1]} : vector<2x128xf32> to vector<2x32xf32>
    %295 = math.tanh %294 : vector<2x32xf32>
    %296 = vector.extract_strided_slice %281 {offsets = [0, 96], sizes = [2, 32], strides = [1, 1]} : vector<2x128xf32> to vector<2x32xf32>
    %297 = arith.negf %296 : vector<2x32xf32>
    %298 = math.exp %297 : vector<2x32xf32>
    %cst_128 = arith.constant 1.000000e+00 : f32
    %299 = vector.broadcast %cst_128 : f32 to vector<2x32xf32>
    %300 = arith.addf %299, %298 : vector<2x32xf32>
    %301 = arith.divf %299, %300 : vector<2x32xf32>
    %302 = arith.mulf %293, %279 : vector<2x32xf32>
    %303 = arith.mulf %287, %295 : vector<2x32xf32>
    %304 = arith.addf %302, %303 : vector<2x32xf32>
    %305 = math.tanh %304 : vector<2x32xf32>
    %306 = arith.mulf %301, %305 : vector<2x32xf32>
    %c0_129 = arith.constant 0 : index
    %c0_130 = arith.constant 0 : index
    %307 = vector.load %arg9[%c0_129, %c0_130] : memref<2x32xf32, #tpu.memory_space<vmem>>, vector<2x32xf32>
    tpu.vector_store %arg9[%c0_129, %c0_130], %306 {strides = array<i32>} : memref<2x32xf32, #tpu.memory_space<vmem>>, vector<2x32xf32>,
    %c0_131 = arith.constant 0 : index
    %c0_132 = arith.constant 0 : index
    %308 = vector.load %arg10[%c0_131, %c0_132] : memref<2x32xf32, #tpu.memory_space<vmem>>, vector<2x32xf32>
    tpu.vector_store %arg10[%c0_131, %c0_132], %304 {strides = array<i32>} : memref<2x32xf32, #tpu.memory_space<vmem>>, vector<2x32xf32>,
    %309 = arith.index_cast %274 : i32 to index
    %c0_133 = arith.constant 0 : index
    %c0_134 = arith.constant 0 : index
    %310 = vector.load %arg6[%309, %c0_133, %c0_134] : memref<8x2x32xf32, #tpu.memory_space<vmem>>, vector<1x2x32xf32>
    %311 = vector.shape_cast %310 : vector<1x2x32xf32> to vector<2x32xf32>
    %312 = vector.shape_cast %306 : vector<2x32xf32> to vector<1x2x32xf32>
    tpu.vector_store %arg6[%309, %c0_133, %c0_134], %312 {strides = array<i32>} : memref<8x2x32xf32, #tpu.memory_space<vmem>>, vector<1x2x32xf32>,
    %c4_i32 = arith.constant 4 : i32
    %313 = arith.index_cast %c4_i32 : i32 to index
    %c0_135 = arith.constant 0 : index
    %c0_136 = arith.constant 0 : index
    %314 = vector.load %arg1[%313, %c0_135, %c0_136] : memref<8x2x128xf32, #tpu.memory_space<vmem>>, vector<1x2x128xf32>
    %315 = vector.shape_cast %314 : vector<1x2x128xf32> to vector<2x128xf32>
    %c0_137 = arith.constant 0 : index
    %c0_138 = arith.constant 0 : index
    %316 = vector.load %arg7[%c0_137, %c0_138] : memref<2x32xf32, #tpu.memory_space<vmem>>, vector<2x32xf32>
    %c0_139 = arith.constant 0 : index
    %c0_140 = arith.constant 0 : index
    %317 = vector.load %arg8[%c0_139, %c0_140] : memref<2x32xf32, #tpu.memory_space<vmem>>, vector<2x32xf32>
    %cst_141 = arith.constant dense<0.000000e+00> : vector<2x128xf32>
    %318 = tpu.matmul %316, %3, %cst_141 {dimension_numbers = #tpu.dot_dimension_numbers<[1], [0], [0], [1], [0, 0, 1, 1], [], []>} : vector<2x32xf32>, vector<32x128xf32>, vector<2x128xf32> -> vector<2x128xf32>
    %319 = arith.addf %315, %318 : vector<2x128xf32>
    %320 = vector.extract_strided_slice %319 {offsets = [0, 0], sizes = [2, 32], strides = [1, 1]} : vector<2x128xf32> to vector<2x32xf32>
    %321 = arith.negf %320 : vector<2x32xf32>
    %322 = math.exp %321 : vector<2x32xf32>
    %cst_142 = arith.constant 1.000000e+00 : f32
    %323 = vector.broadcast %cst_142 : f32 to vector<2x32xf32>
    %324 = arith.addf %323, %322 : vector<2x32xf32>
    %325 = arith.divf %323, %324 : vector<2x32xf32>
    %326 = vector.extract_strided_slice %319 {offsets = [0, 32], sizes = [2, 32], strides = [1, 1]} : vector<2x128xf32> to vector<2x32xf32>
    %327 = arith.negf %326 : vector<2x32xf32>
    %328 = math.exp %327 : vector<2x32xf32>
    %cst_143 = arith.constant 1.000000e+00 : f32
    %329 = vector.broadcast %cst_143 : f32 to vector<2x32xf32>
    %330 = arith.addf %329, %328 : vector<2x32xf32>
    %331 = arith.divf %329, %330 : vector<2x32xf32>
    %332 = vector.extract_strided_slice %319 {offsets = [0, 64], sizes = [2, 32], strides = [1, 1]} : vector<2x128xf32> to vector<2x32xf32>
    %333 = math.tanh %332 : vector<2x32xf32>
    %334 = vector.extract_strided_slice %319 {offsets = [0, 96], sizes = [2, 32], strides = [1, 1]} : vector<2x128xf32> to vector<2x32xf32>
    %335 = arith.negf %334 : vector<2x32xf32>
    %336 = math.exp %335 : vector<2x32xf32>
    %cst_144 = arith.constant 1.000000e+00 : f32
    %337 = vector.broadcast %cst_144 : f32 to vector<2x32xf32>
    %338 = arith.addf %337, %336 : vector<2x32xf32>
    %339 = arith.divf %337, %338 : vector<2x32xf32>
    %340 = arith.mulf %331, %317 : vector<2x32xf32>
    %341 = arith.mulf %325, %333 : vector<2x32xf32>
    %342 = arith.addf %340, %341 : vector<2x32xf32>
    %343 = math.tanh %342 : vector<2x32xf32>
    %344 = arith.mulf %339, %343 : vector<2x32xf32>
    %c0_145 = arith.constant 0 : index
    %c0_146 = arith.constant 0 : index
    %345 = vector.load %arg7[%c0_145, %c0_146] : memref<2x32xf32, #tpu.memory_space<vmem>>, vector<2x32xf32>
    tpu.vector_store %arg7[%c0_145, %c0_146], %344 {strides = array<i32>} : memref<2x32xf32, #tpu.memory_space<vmem>>, vector<2x32xf32>,
    %c0_147 = arith.constant 0 : index
    %c0_148 = arith.constant 0 : index
    %346 = vector.load %arg8[%c0_147, %c0_148] : memref<2x32xf32, #tpu.memory_space<vmem>>, vector<2x32xf32>
    tpu.vector_store %arg8[%c0_147, %c0_148], %342 {strides = array<i32>} : memref<2x32xf32, #tpu.memory_space<vmem>>, vector<2x32xf32>,
    %347 = arith.index_cast %c4_i32 : i32 to index
    %c0_149 = arith.constant 0 : index
    %c0_150 = arith.constant 0 : index
    %348 = vector.load %arg5[%347, %c0_149, %c0_150] : memref<8x2x32xf32, #tpu.memory_space<vmem>>, vector<1x2x32xf32>
    %349 = vector.shape_cast %348 : vector<1x2x32xf32> to vector<2x32xf32>
    %350 = vector.shape_cast %344 : vector<2x32xf32> to vector<1x2x32xf32>
    tpu.vector_store %arg5[%347, %c0_149, %c0_150], %350 {strides = array<i32>} : memref<8x2x32xf32, #tpu.memory_space<vmem>>, vector<1x2x32xf32>,
    %c7_i32_151 = arith.constant 7 : i32
    %351 = arith.subi %c7_i32_151, %c4_i32 : i32
    %352 = arith.index_cast %351 : i32 to index
    %c0_152 = arith.constant 0 : index
    %c0_153 = arith.constant 0 : index
    %353 = vector.load %arg2[%352, %c0_152, %c0_153] : memref<8x2x128xf32, #tpu.memory_space<vmem>>, vector<1x2x128xf32>
    %354 = vector.shape_cast %353 : vector<1x2x128xf32> to vector<2x128xf32>
    %c0_154 = arith.constant 0 : index
    %c0_155 = arith.constant 0 : index
    %355 = vector.load %arg9[%c0_154, %c0_155] : memref<2x32xf32, #tpu.memory_space<vmem>>, vector<2x32xf32>
    %c0_156 = arith.constant 0 : index
    %c0_157 = arith.constant 0 : index
    %356 = vector.load %arg10[%c0_156, %c0_157] : memref<2x32xf32, #tpu.memory_space<vmem>>, vector<2x32xf32>
    %cst_158 = arith.constant dense<0.000000e+00> : vector<2x128xf32>
    %357 = tpu.matmul %355, %4, %cst_158 {dimension_numbers = #tpu.dot_dimension_numbers<[1], [0], [0], [1], [0, 0, 1, 1], [], []>} : vector<2x32xf32>, vector<32x128xf32>, vector<2x128xf32> -> vector<2x128xf32>
    %358 = arith.addf %354, %357 : vector<2x128xf32>
    %359 = vector.extract_strided_slice %358 {offsets = [0, 0], sizes = [2, 32], strides = [1, 1]} : vector<2x128xf32> to vector<2x32xf32>
    %360 = arith.negf %359 : vector<2x32xf32>
    %361 = math.exp %360 : vector<2x32xf32>
    %cst_159 = arith.constant 1.000000e+00 : f32
    %362 = vector.broadcast %cst_159 : f32 to vector<2x32xf32>
    %363 = arith.addf %362, %361 : vector<2x32xf32>
    %364 = arith.divf %362, %363 : vector<2x32xf32>
    %365 = vector.extract_strided_slice %358 {offsets = [0, 32], sizes = [2, 32], strides = [1, 1]} : vector<2x128xf32> to vector<2x32xf32>
    %366 = arith.negf %365 : vector<2x32xf32>
    %367 = math.exp %366 : vector<2x32xf32>
    %cst_160 = arith.constant 1.000000e+00 : f32
    %368 = vector.broadcast %cst_160 : f32 to vector<2x32xf32>
    %369 = arith.addf %368, %367 : vector<2x32xf32>
    %370 = arith.divf %368, %369 : vector<2x32xf32>
    %371 = vector.extract_strided_slice %358 {offsets = [0, 64], sizes = [2, 32], strides = [1, 1]} : vector<2x128xf32> to vector<2x32xf32>
    %372 = math.tanh %371 : vector<2x32xf32>
    %373 = vector.extract_strided_slice %358 {offsets = [0, 96], sizes = [2, 32], strides = [1, 1]} : vector<2x128xf32> to vector<2x32xf32>
    %374 = arith.negf %373 : vector<2x32xf32>
    %375 = math.exp %374 : vector<2x32xf32>
    %cst_161 = arith.constant 1.000000e+00 : f32
    %376 = vector.broadcast %cst_161 : f32 to vector<2x32xf32>
    %377 = arith.addf %376, %375 : vector<2x32xf32>
    %378 = arith.divf %376, %377 : vector<2x32xf32>
    %379 = arith.mulf %370, %356 : vector<2x32xf32>
    %380 = arith.mulf %364, %372 : vector<2x32xf32>
    %381 = arith.addf %379, %380 : vector<2x32xf32>
    %382 = math.tanh %381 : vector<2x32xf32>
    %383 = arith.mulf %378, %382 : vector<2x32xf32>
    %c0_162 = arith.constant 0 : index
    %c0_163 = arith.constant 0 : index
    %384 = vector.load %arg9[%c0_162, %c0_163] : memref<2x32xf32, #tpu.memory_space<vmem>>, vector<2x32xf32>
    tpu.vector_store %arg9[%c0_162, %c0_163], %383 {strides = array<i32>} : memref<2x32xf32, #tpu.memory_space<vmem>>, vector<2x32xf32>,
    %c0_164 = arith.constant 0 : index
    %c0_165 = arith.constant 0 : index
    %385 = vector.load %arg10[%c0_164, %c0_165] : memref<2x32xf32, #tpu.memory_space<vmem>>, vector<2x32xf32>
    tpu.vector_store %arg10[%c0_164, %c0_165], %381 {strides = array<i32>} : memref<2x32xf32, #tpu.memory_space<vmem>>, vector<2x32xf32>,
    %386 = arith.index_cast %351 : i32 to index
    %c0_166 = arith.constant 0 : index
    %c0_167 = arith.constant 0 : index
    %387 = vector.load %arg6[%386, %c0_166, %c0_167] : memref<8x2x32xf32, #tpu.memory_space<vmem>>, vector<1x2x32xf32>
    %388 = vector.shape_cast %387 : vector<1x2x32xf32> to vector<2x32xf32>
    %389 = vector.shape_cast %383 : vector<2x32xf32> to vector<1x2x32xf32>
    tpu.vector_store %arg6[%386, %c0_166, %c0_167], %389 {strides = array<i32>} : memref<8x2x32xf32, #tpu.memory_space<vmem>>, vector<1x2x32xf32>,
    %c5_i32 = arith.constant 5 : i32
    %390 = arith.index_cast %c5_i32 : i32 to index
    %c0_168 = arith.constant 0 : index
    %c0_169 = arith.constant 0 : index
    %391 = vector.load %arg1[%390, %c0_168, %c0_169] : memref<8x2x128xf32, #tpu.memory_space<vmem>>, vector<1x2x128xf32>
    %392 = vector.shape_cast %391 : vector<1x2x128xf32> to vector<2x128xf32>
    %c0_170 = arith.constant 0 : index
    %c0_171 = arith.constant 0 : index
    %393 = vector.load %arg7[%c0_170, %c0_171] : memref<2x32xf32, #tpu.memory_space<vmem>>, vector<2x32xf32>
    %c0_172 = arith.constant 0 : index
    %c0_173 = arith.constant 0 : index
    %394 = vector.load %arg8[%c0_172, %c0_173] : memref<2x32xf32, #tpu.memory_space<vmem>>, vector<2x32xf32>
    %cst_174 = arith.constant dense<0.000000e+00> : vector<2x128xf32>
    %395 = tpu.matmul %393, %3, %cst_174 {dimension_numbers = #tpu.dot_dimension_numbers<[1], [0], [0], [1], [0, 0, 1, 1], [], []>} : vector<2x32xf32>, vector<32x128xf32>, vector<2x128xf32> -> vector<2x128xf32>
    %396 = arith.addf %392, %395 : vector<2x128xf32>
    %397 = vector.extract_strided_slice %396 {offsets = [0, 0], sizes = [2, 32], strides = [1, 1]} : vector<2x128xf32> to vector<2x32xf32>
    %398 = arith.negf %397 : vector<2x32xf32>
    %399 = math.exp %398 : vector<2x32xf32>
    %cst_175 = arith.constant 1.000000e+00 : f32
    %400 = vector.broadcast %cst_175 : f32 to vector<2x32xf32>
    %401 = arith.addf %400, %399 : vector<2x32xf32>
    %402 = arith.divf %400, %401 : vector<2x32xf32>
    %403 = vector.extract_strided_slice %396 {offsets = [0, 32], sizes = [2, 32], strides = [1, 1]} : vector<2x128xf32> to vector<2x32xf32>
    %404 = arith.negf %403 : vector<2x32xf32>
    %405 = math.exp %404 : vector<2x32xf32>
    %cst_176 = arith.constant 1.000000e+00 : f32
    %406 = vector.broadcast %cst_176 : f32 to vector<2x32xf32>
    %407 = arith.addf %406, %405 : vector<2x32xf32>
    %408 = arith.divf %406, %407 : vector<2x32xf32>
    %409 = vector.extract_strided_slice %396 {offsets = [0, 64], sizes = [2, 32], strides = [1, 1]} : vector<2x128xf32> to vector<2x32xf32>
    %410 = math.tanh %409 : vector<2x32xf32>
    %411 = vector.extract_strided_slice %396 {offsets = [0, 96], sizes = [2, 32], strides = [1, 1]} : vector<2x128xf32> to vector<2x32xf32>
    %412 = arith.negf %411 : vector<2x32xf32>
    %413 = math.exp %412 : vector<2x32xf32>
    %cst_177 = arith.constant 1.000000e+00 : f32
    %414 = vector.broadcast %cst_177 : f32 to vector<2x32xf32>
    %415 = arith.addf %414, %413 : vector<2x32xf32>
    %416 = arith.divf %414, %415 : vector<2x32xf32>
    %417 = arith.mulf %408, %394 : vector<2x32xf32>
    %418 = arith.mulf %402, %410 : vector<2x32xf32>
    %419 = arith.addf %417, %418 : vector<2x32xf32>
    %420 = math.tanh %419 : vector<2x32xf32>
    %421 = arith.mulf %416, %420 : vector<2x32xf32>
    %c0_178 = arith.constant 0 : index
    %c0_179 = arith.constant 0 : index
    %422 = vector.load %arg7[%c0_178, %c0_179] : memref<2x32xf32, #tpu.memory_space<vmem>>, vector<2x32xf32>
    tpu.vector_store %arg7[%c0_178, %c0_179], %421 {strides = array<i32>} : memref<2x32xf32, #tpu.memory_space<vmem>>, vector<2x32xf32>,
    %c0_180 = arith.constant 0 : index
    %c0_181 = arith.constant 0 : index
    %423 = vector.load %arg8[%c0_180, %c0_181] : memref<2x32xf32, #tpu.memory_space<vmem>>, vector<2x32xf32>
    tpu.vector_store %arg8[%c0_180, %c0_181], %419 {strides = array<i32>} : memref<2x32xf32, #tpu.memory_space<vmem>>, vector<2x32xf32>,
    %424 = arith.index_cast %c5_i32 : i32 to index
    %c0_182 = arith.constant 0 : index
    %c0_183 = arith.constant 0 : index
    %425 = vector.load %arg5[%424, %c0_182, %c0_183] : memref<8x2x32xf32, #tpu.memory_space<vmem>>, vector<1x2x32xf32>
    %426 = vector.shape_cast %425 : vector<1x2x32xf32> to vector<2x32xf32>
    %427 = vector.shape_cast %421 : vector<2x32xf32> to vector<1x2x32xf32>
    tpu.vector_store %arg5[%424, %c0_182, %c0_183], %427 {strides = array<i32>} : memref<8x2x32xf32, #tpu.memory_space<vmem>>, vector<1x2x32xf32>,
    %c7_i32_184 = arith.constant 7 : i32
    %428 = arith.subi %c7_i32_184, %c5_i32 : i32
    %429 = arith.index_cast %428 : i32 to index
    %c0_185 = arith.constant 0 : index
    %c0_186 = arith.constant 0 : index
    %430 = vector.load %arg2[%429, %c0_185, %c0_186] : memref<8x2x128xf32, #tpu.memory_space<vmem>>, vector<1x2x128xf32>
    %431 = vector.shape_cast %430 : vector<1x2x128xf32> to vector<2x128xf32>
    %c0_187 = arith.constant 0 : index
    %c0_188 = arith.constant 0 : index
    %432 = vector.load %arg9[%c0_187, %c0_188] : memref<2x32xf32, #tpu.memory_space<vmem>>, vector<2x32xf32>
    %c0_189 = arith.constant 0 : index
    %c0_190 = arith.constant 0 : index
    %433 = vector.load %arg10[%c0_189, %c0_190] : memref<2x32xf32, #tpu.memory_space<vmem>>, vector<2x32xf32>
    %cst_191 = arith.constant dense<0.000000e+00> : vector<2x128xf32>
    %434 = tpu.matmul %432, %4, %cst_191 {dimension_numbers = #tpu.dot_dimension_numbers<[1], [0], [0], [1], [0, 0, 1, 1], [], []>} : vector<2x32xf32>, vector<32x128xf32>, vector<2x128xf32> -> vector<2x128xf32>
    %435 = arith.addf %431, %434 : vector<2x128xf32>
    %436 = vector.extract_strided_slice %435 {offsets = [0, 0], sizes = [2, 32], strides = [1, 1]} : vector<2x128xf32> to vector<2x32xf32>
    %437 = arith.negf %436 : vector<2x32xf32>
    %438 = math.exp %437 : vector<2x32xf32>
    %cst_192 = arith.constant 1.000000e+00 : f32
    %439 = vector.broadcast %cst_192 : f32 to vector<2x32xf32>
    %440 = arith.addf %439, %438 : vector<2x32xf32>
    %441 = arith.divf %439, %440 : vector<2x32xf32>
    %442 = vector.extract_strided_slice %435 {offsets = [0, 32], sizes = [2, 32], strides = [1, 1]} : vector<2x128xf32> to vector<2x32xf32>
    %443 = arith.negf %442 : vector<2x32xf32>
    %444 = math.exp %443 : vector<2x32xf32>
    %cst_193 = arith.constant 1.000000e+00 : f32
    %445 = vector.broadcast %cst_193 : f32 to vector<2x32xf32>
    %446 = arith.addf %445, %444 : vector<2x32xf32>
    %447 = arith.divf %445, %446 : vector<2x32xf32>
    %448 = vector.extract_strided_slice %435 {offsets = [0, 64], sizes = [2, 32], strides = [1, 1]} : vector<2x128xf32> to vector<2x32xf32>
    %449 = math.tanh %448 : vector<2x32xf32>
    %450 = vector.extract_strided_slice %435 {offsets = [0, 96], sizes = [2, 32], strides = [1, 1]} : vector<2x128xf32> to vector<2x32xf32>
    %451 = arith.negf %450 : vector<2x32xf32>
    %452 = math.exp %451 : vector<2x32xf32>
    %cst_194 = arith.constant 1.000000e+00 : f32
    %453 = vector.broadcast %cst_194 : f32 to vector<2x32xf32>
    %454 = arith.addf %453, %452 : vector<2x32xf32>
    %455 = arith.divf %453, %454 : vector<2x32xf32>
    %456 = arith.mulf %447, %433 : vector<2x32xf32>
    %457 = arith.mulf %441, %449 : vector<2x32xf32>
    %458 = arith.addf %456, %457 : vector<2x32xf32>
    %459 = math.tanh %458 : vector<2x32xf32>
    %460 = arith.mulf %455, %459 : vector<2x32xf32>
    %c0_195 = arith.constant 0 : index
    %c0_196 = arith.constant 0 : index
    %461 = vector.load %arg9[%c0_195, %c0_196] : memref<2x32xf32, #tpu.memory_space<vmem>>, vector<2x32xf32>
    tpu.vector_store %arg9[%c0_195, %c0_196], %460 {strides = array<i32>} : memref<2x32xf32, #tpu.memory_space<vmem>>, vector<2x32xf32>,
    %c0_197 = arith.constant 0 : index
    %c0_198 = arith.constant 0 : index
    %462 = vector.load %arg10[%c0_197, %c0_198] : memref<2x32xf32, #tpu.memory_space<vmem>>, vector<2x32xf32>
    tpu.vector_store %arg10[%c0_197, %c0_198], %458 {strides = array<i32>} : memref<2x32xf32, #tpu.memory_space<vmem>>, vector<2x32xf32>,
    %463 = arith.index_cast %428 : i32 to index
    %c0_199 = arith.constant 0 : index
    %c0_200 = arith.constant 0 : index
    %464 = vector.load %arg6[%463, %c0_199, %c0_200] : memref<8x2x32xf32, #tpu.memory_space<vmem>>, vector<1x2x32xf32>
    %465 = vector.shape_cast %464 : vector<1x2x32xf32> to vector<2x32xf32>
    %466 = vector.shape_cast %460 : vector<2x32xf32> to vector<1x2x32xf32>
    tpu.vector_store %arg6[%463, %c0_199, %c0_200], %466 {strides = array<i32>} : memref<8x2x32xf32, #tpu.memory_space<vmem>>, vector<1x2x32xf32>,
    %c6_i32 = arith.constant 6 : i32
    %467 = arith.index_cast %c6_i32 : i32 to index
    %c0_201 = arith.constant 0 : index
    %c0_202 = arith.constant 0 : index
    %468 = vector.load %arg1[%467, %c0_201, %c0_202] : memref<8x2x128xf32, #tpu.memory_space<vmem>>, vector<1x2x128xf32>
    %469 = vector.shape_cast %468 : vector<1x2x128xf32> to vector<2x128xf32>
    %c0_203 = arith.constant 0 : index
    %c0_204 = arith.constant 0 : index
    %470 = vector.load %arg7[%c0_203, %c0_204] : memref<2x32xf32, #tpu.memory_space<vmem>>, vector<2x32xf32>
    %c0_205 = arith.constant 0 : index
    %c0_206 = arith.constant 0 : index
    %471 = vector.load %arg8[%c0_205, %c0_206] : memref<2x32xf32, #tpu.memory_space<vmem>>, vector<2x32xf32>
    %cst_207 = arith.constant dense<0.000000e+00> : vector<2x128xf32>
    %472 = tpu.matmul %470, %3, %cst_207 {dimension_numbers = #tpu.dot_dimension_numbers<[1], [0], [0], [1], [0, 0, 1, 1], [], []>} : vector<2x32xf32>, vector<32x128xf32>, vector<2x128xf32> -> vector<2x128xf32>
    %473 = arith.addf %469, %472 : vector<2x128xf32>
    %474 = vector.extract_strided_slice %473 {offsets = [0, 0], sizes = [2, 32], strides = [1, 1]} : vector<2x128xf32> to vector<2x32xf32>
    %475 = arith.negf %474 : vector<2x32xf32>
    %476 = math.exp %475 : vector<2x32xf32>
    %cst_208 = arith.constant 1.000000e+00 : f32
    %477 = vector.broadcast %cst_208 : f32 to vector<2x32xf32>
    %478 = arith.addf %477, %476 : vector<2x32xf32>
    %479 = arith.divf %477, %478 : vector<2x32xf32>
    %480 = vector.extract_strided_slice %473 {offsets = [0, 32], sizes = [2, 32], strides = [1, 1]} : vector<2x128xf32> to vector<2x32xf32>
    %481 = arith.negf %480 : vector<2x32xf32>
    %482 = math.exp %481 : vector<2x32xf32>
    %cst_209 = arith.constant 1.000000e+00 : f32
    %483 = vector.broadcast %cst_209 : f32 to vector<2x32xf32>
    %484 = arith.addf %483, %482 : vector<2x32xf32>
    %485 = arith.divf %483, %484 : vector<2x32xf32>
    %486 = vector.extract_strided_slice %473 {offsets = [0, 64], sizes = [2, 32], strides = [1, 1]} : vector<2x128xf32> to vector<2x32xf32>
    %487 = math.tanh %486 : vector<2x32xf32>
    %488 = vector.extract_strided_slice %473 {offsets = [0, 96], sizes = [2, 32], strides = [1, 1]} : vector<2x128xf32> to vector<2x32xf32>
    %489 = arith.negf %488 : vector<2x32xf32>
    %490 = math.exp %489 : vector<2x32xf32>
    %cst_210 = arith.constant 1.000000e+00 : f32
    %491 = vector.broadcast %cst_210 : f32 to vector<2x32xf32>
    %492 = arith.addf %491, %490 : vector<2x32xf32>
    %493 = arith.divf %491, %492 : vector<2x32xf32>
    %494 = arith.mulf %485, %471 : vector<2x32xf32>
    %495 = arith.mulf %479, %487 : vector<2x32xf32>
    %496 = arith.addf %494, %495 : vector<2x32xf32>
    %497 = math.tanh %496 : vector<2x32xf32>
    %498 = arith.mulf %493, %497 : vector<2x32xf32>
    %c0_211 = arith.constant 0 : index
    %c0_212 = arith.constant 0 : index
    %499 = vector.load %arg7[%c0_211, %c0_212] : memref<2x32xf32, #tpu.memory_space<vmem>>, vector<2x32xf32>
    tpu.vector_store %arg7[%c0_211, %c0_212], %498 {strides = array<i32>} : memref<2x32xf32, #tpu.memory_space<vmem>>, vector<2x32xf32>,
    %c0_213 = arith.constant 0 : index
    %c0_214 = arith.constant 0 : index
    %500 = vector.load %arg8[%c0_213, %c0_214] : memref<2x32xf32, #tpu.memory_space<vmem>>, vector<2x32xf32>
    tpu.vector_store %arg8[%c0_213, %c0_214], %496 {strides = array<i32>} : memref<2x32xf32, #tpu.memory_space<vmem>>, vector<2x32xf32>,
    %501 = arith.index_cast %c6_i32 : i32 to index
    %c0_215 = arith.constant 0 : index
    %c0_216 = arith.constant 0 : index
    %502 = vector.load %arg5[%501, %c0_215, %c0_216] : memref<8x2x32xf32, #tpu.memory_space<vmem>>, vector<1x2x32xf32>
    %503 = vector.shape_cast %502 : vector<1x2x32xf32> to vector<2x32xf32>
    %504 = vector.shape_cast %498 : vector<2x32xf32> to vector<1x2x32xf32>
    tpu.vector_store %arg5[%501, %c0_215, %c0_216], %504 {strides = array<i32>} : memref<8x2x32xf32, #tpu.memory_space<vmem>>, vector<1x2x32xf32>,
    %c7_i32_217 = arith.constant 7 : i32
    %505 = arith.subi %c7_i32_217, %c6_i32 : i32
    %506 = arith.index_cast %505 : i32 to index
    %c0_218 = arith.constant 0 : index
    %c0_219 = arith.constant 0 : index
    %507 = vector.load %arg2[%506, %c0_218, %c0_219] : memref<8x2x128xf32, #tpu.memory_space<vmem>>, vector<1x2x128xf32>
    %508 = vector.shape_cast %507 : vector<1x2x128xf32> to vector<2x128xf32>
    %c0_220 = arith.constant 0 : index
    %c0_221 = arith.constant 0 : index
    %509 = vector.load %arg9[%c0_220, %c0_221] : memref<2x32xf32, #tpu.memory_space<vmem>>, vector<2x32xf32>
    %c0_222 = arith.constant 0 : index
    %c0_223 = arith.constant 0 : index
    %510 = vector.load %arg10[%c0_222, %c0_223] : memref<2x32xf32, #tpu.memory_space<vmem>>, vector<2x32xf32>
    %cst_224 = arith.constant dense<0.000000e+00> : vector<2x128xf32>
    %511 = tpu.matmul %509, %4, %cst_224 {dimension_numbers = #tpu.dot_dimension_numbers<[1], [0], [0], [1], [0, 0, 1, 1], [], []>} : vector<2x32xf32>, vector<32x128xf32>, vector<2x128xf32> -> vector<2x128xf32>
    %512 = arith.addf %508, %511 : vector<2x128xf32>
    %513 = vector.extract_strided_slice %512 {offsets = [0, 0], sizes = [2, 32], strides = [1, 1]} : vector<2x128xf32> to vector<2x32xf32>
    %514 = arith.negf %513 : vector<2x32xf32>
    %515 = math.exp %514 : vector<2x32xf32>
    %cst_225 = arith.constant 1.000000e+00 : f32
    %516 = vector.broadcast %cst_225 : f32 to vector<2x32xf32>
    %517 = arith.addf %516, %515 : vector<2x32xf32>
    %518 = arith.divf %516, %517 : vector<2x32xf32>
    %519 = vector.extract_strided_slice %512 {offsets = [0, 32], sizes = [2, 32], strides = [1, 1]} : vector<2x128xf32> to vector<2x32xf32>
    %520 = arith.negf %519 : vector<2x32xf32>
    %521 = math.exp %520 : vector<2x32xf32>
    %cst_226 = arith.constant 1.000000e+00 : f32
    %522 = vector.broadcast %cst_226 : f32 to vector<2x32xf32>
    %523 = arith.addf %522, %521 : vector<2x32xf32>
    %524 = arith.divf %522, %523 : vector<2x32xf32>
    %525 = vector.extract_strided_slice %512 {offsets = [0, 64], sizes = [2, 32], strides = [1, 1]} : vector<2x128xf32> to vector<2x32xf32>
    %526 = math.tanh %525 : vector<2x32xf32>
    %527 = vector.extract_strided_slice %512 {offsets = [0, 96], sizes = [2, 32], strides = [1, 1]} : vector<2x128xf32> to vector<2x32xf32>
    %528 = arith.negf %527 : vector<2x32xf32>
    %529 = math.exp %528 : vector<2x32xf32>
    %cst_227 = arith.constant 1.000000e+00 : f32
    %530 = vector.broadcast %cst_227 : f32 to vector<2x32xf32>
    %531 = arith.addf %530, %529 : vector<2x32xf32>
    %532 = arith.divf %530, %531 : vector<2x32xf32>
    %533 = arith.mulf %524, %510 : vector<2x32xf32>
    %534 = arith.mulf %518, %526 : vector<2x32xf32>
    %535 = arith.addf %533, %534 : vector<2x32xf32>
    %536 = math.tanh %535 : vector<2x32xf32>
    %537 = arith.mulf %532, %536 : vector<2x32xf32>
    %c0_228 = arith.constant 0 : index
    %c0_229 = arith.constant 0 : index
    %538 = vector.load %arg9[%c0_228, %c0_229] : memref<2x32xf32, #tpu.memory_space<vmem>>, vector<2x32xf32>
    tpu.vector_store %arg9[%c0_228, %c0_229], %537 {strides = array<i32>} : memref<2x32xf32, #tpu.memory_space<vmem>>, vector<2x32xf32>,
    %c0_230 = arith.constant 0 : index
    %c0_231 = arith.constant 0 : index
    %539 = vector.load %arg10[%c0_230, %c0_231] : memref<2x32xf32, #tpu.memory_space<vmem>>, vector<2x32xf32>
    tpu.vector_store %arg10[%c0_230, %c0_231], %535 {strides = array<i32>} : memref<2x32xf32, #tpu.memory_space<vmem>>, vector<2x32xf32>,
    %540 = arith.index_cast %505 : i32 to index
    %c0_232 = arith.constant 0 : index
    %c0_233 = arith.constant 0 : index
    %541 = vector.load %arg6[%540, %c0_232, %c0_233] : memref<8x2x32xf32, #tpu.memory_space<vmem>>, vector<1x2x32xf32>
    %542 = vector.shape_cast %541 : vector<1x2x32xf32> to vector<2x32xf32>
    %543 = vector.shape_cast %537 : vector<2x32xf32> to vector<1x2x32xf32>
    tpu.vector_store %arg6[%540, %c0_232, %c0_233], %543 {strides = array<i32>} : memref<8x2x32xf32, #tpu.memory_space<vmem>>, vector<1x2x32xf32>,
    %c7_i32_234 = arith.constant 7 : i32
    %544 = arith.index_cast %c7_i32_234 : i32 to index
    %c0_235 = arith.constant 0 : index
    %c0_236 = arith.constant 0 : index
    %545 = vector.load %arg1[%544, %c0_235, %c0_236] : memref<8x2x128xf32, #tpu.memory_space<vmem>>, vector<1x2x128xf32>
    %546 = vector.shape_cast %545 : vector<1x2x128xf32> to vector<2x128xf32>
    %c0_237 = arith.constant 0 : index
    %c0_238 = arith.constant 0 : index
    %547 = vector.load %arg7[%c0_237, %c0_238] : memref<2x32xf32, #tpu.memory_space<vmem>>, vector<2x32xf32>
    %c0_239 = arith.constant 0 : index
    %c0_240 = arith.constant 0 : index
    %548 = vector.load %arg8[%c0_239, %c0_240] : memref<2x32xf32, #tpu.memory_space<vmem>>, vector<2x32xf32>
    %cst_241 = arith.constant dense<0.000000e+00> : vector<2x128xf32>
    %549 = tpu.matmul %547, %3, %cst_241 {dimension_numbers = #tpu.dot_dimension_numbers<[1], [0], [0], [1], [0, 0, 1, 1], [], []>} : vector<2x32xf32>, vector<32x128xf32>, vector<2x128xf32> -> vector<2x128xf32>
    %550 = arith.addf %546, %549 : vector<2x128xf32>
    %551 = vector.extract_strided_slice %550 {offsets = [0, 0], sizes = [2, 32], strides = [1, 1]} : vector<2x128xf32> to vector<2x32xf32>
    %552 = arith.negf %551 : vector<2x32xf32>
    %553 = math.exp %552 : vector<2x32xf32>
    %cst_242 = arith.constant 1.000000e+00 : f32
    %554 = vector.broadcast %cst_242 : f32 to vector<2x32xf32>
    %555 = arith.addf %554, %553 : vector<2x32xf32>
    %556 = arith.divf %554, %555 : vector<2x32xf32>
    %557 = vector.extract_strided_slice %550 {offsets = [0, 32], sizes = [2, 32], strides = [1, 1]} : vector<2x128xf32> to vector<2x32xf32>
    %558 = arith.negf %557 : vector<2x32xf32>
    %559 = math.exp %558 : vector<2x32xf32>
    %cst_243 = arith.constant 1.000000e+00 : f32
    %560 = vector.broadcast %cst_243 : f32 to vector<2x32xf32>
    %561 = arith.addf %560, %559 : vector<2x32xf32>
    %562 = arith.divf %560, %561 : vector<2x32xf32>
    %563 = vector.extract_strided_slice %550 {offsets = [0, 64], sizes = [2, 32], strides = [1, 1]} : vector<2x128xf32> to vector<2x32xf32>
    %564 = math.tanh %563 : vector<2x32xf32>
    %565 = vector.extract_strided_slice %550 {offsets = [0, 96], sizes = [2, 32], strides = [1, 1]} : vector<2x128xf32> to vector<2x32xf32>
    %566 = arith.negf %565 : vector<2x32xf32>
    %567 = math.exp %566 : vector<2x32xf32>
    %cst_244 = arith.constant 1.000000e+00 : f32
    %568 = vector.broadcast %cst_244 : f32 to vector<2x32xf32>
    %569 = arith.addf %568, %567 : vector<2x32xf32>
    %570 = arith.divf %568, %569 : vector<2x32xf32>
    %571 = arith.mulf %562, %548 : vector<2x32xf32>
    %572 = arith.mulf %556, %564 : vector<2x32xf32>
    %573 = arith.addf %571, %572 : vector<2x32xf32>
    %574 = math.tanh %573 : vector<2x32xf32>
    %575 = arith.mulf %570, %574 : vector<2x32xf32>
    %c0_245 = arith.constant 0 : index
    %c0_246 = arith.constant 0 : index
    %576 = vector.load %arg7[%c0_245, %c0_246] : memref<2x32xf32, #tpu.memory_space<vmem>>, vector<2x32xf32>
    tpu.vector_store %arg7[%c0_245, %c0_246], %575 {strides = array<i32>} : memref<2x32xf32, #tpu.memory_space<vmem>>, vector<2x32xf32>,
    %c0_247 = arith.constant 0 : index
    %c0_248 = arith.constant 0 : index
    %577 = vector.load %arg8[%c0_247, %c0_248] : memref<2x32xf32, #tpu.memory_space<vmem>>, vector<2x32xf32>
    tpu.vector_store %arg8[%c0_247, %c0_248], %573 {strides = array<i32>} : memref<2x32xf32, #tpu.memory_space<vmem>>, vector<2x32xf32>,
    %578 = arith.index_cast %c7_i32_234 : i32 to index
    %c0_249 = arith.constant 0 : index
    %c0_250 = arith.constant 0 : index
    %579 = vector.load %arg5[%578, %c0_249, %c0_250] : memref<8x2x32xf32, #tpu.memory_space<vmem>>, vector<1x2x32xf32>
    %580 = vector.shape_cast %579 : vector<1x2x32xf32> to vector<2x32xf32>
    %581 = vector.shape_cast %575 : vector<2x32xf32> to vector<1x2x32xf32>
    tpu.vector_store %arg5[%578, %c0_249, %c0_250], %581 {strides = array<i32>} : memref<8x2x32xf32, #tpu.memory_space<vmem>>, vector<1x2x32xf32>,
    %c7_i32_251 = arith.constant 7 : i32
    %582 = arith.subi %c7_i32_251, %c7_i32_234 : i32
    %583 = arith.index_cast %582 : i32 to index
    %c0_252 = arith.constant 0 : index
    %c0_253 = arith.constant 0 : index
    %584 = vector.load %arg2[%583, %c0_252, %c0_253] : memref<8x2x128xf32, #tpu.memory_space<vmem>>, vector<1x2x128xf32>
    %585 = vector.shape_cast %584 : vector<1x2x128xf32> to vector<2x128xf32>
    %c0_254 = arith.constant 0 : index
    %c0_255 = arith.constant 0 : index
    %586 = vector.load %arg9[%c0_254, %c0_255] : memref<2x32xf32, #tpu.memory_space<vmem>>, vector<2x32xf32>
    %c0_256 = arith.constant 0 : index
    %c0_257 = arith.constant 0 : index
    %587 = vector.load %arg10[%c0_256, %c0_257] : memref<2x32xf32, #tpu.memory_space<vmem>>, vector<2x32xf32>
    %cst_258 = arith.constant dense<0.000000e+00> : vector<2x128xf32>
    %588 = tpu.matmul %586, %4, %cst_258 {dimension_numbers = #tpu.dot_dimension_numbers<[1], [0], [0], [1], [0, 0, 1, 1], [], []>} : vector<2x32xf32>, vector<32x128xf32>, vector<2x128xf32> -> vector<2x128xf32>
    %589 = arith.addf %585, %588 : vector<2x128xf32>
    %590 = vector.extract_strided_slice %589 {offsets = [0, 0], sizes = [2, 32], strides = [1, 1]} : vector<2x128xf32> to vector<2x32xf32>
    %591 = arith.negf %590 : vector<2x32xf32>
    %592 = math.exp %591 : vector<2x32xf32>
    %cst_259 = arith.constant 1.000000e+00 : f32
    %593 = vector.broadcast %cst_259 : f32 to vector<2x32xf32>
    %594 = arith.addf %593, %592 : vector<2x32xf32>
    %595 = arith.divf %593, %594 : vector<2x32xf32>
    %596 = vector.extract_strided_slice %589 {offsets = [0, 32], sizes = [2, 32], strides = [1, 1]} : vector<2x128xf32> to vector<2x32xf32>
    %597 = arith.negf %596 : vector<2x32xf32>
    %598 = math.exp %597 : vector<2x32xf32>
    %cst_260 = arith.constant 1.000000e+00 : f32
    %599 = vector.broadcast %cst_260 : f32 to vector<2x32xf32>
    %600 = arith.addf %599, %598 : vector<2x32xf32>
    %601 = arith.divf %599, %600 : vector<2x32xf32>
    %602 = vector.extract_strided_slice %589 {offsets = [0, 64], sizes = [2, 32], strides = [1, 1]} : vector<2x128xf32> to vector<2x32xf32>
    %603 = math.tanh %602 : vector<2x32xf32>
    %604 = vector.extract_strided_slice %589 {offsets = [0, 96], sizes = [2, 32], strides = [1, 1]} : vector<2x128xf32> to vector<2x32xf32>
    %605 = arith.negf %604 : vector<2x32xf32>
    %606 = math.exp %605 : vector<2x32xf32>
    %cst_261 = arith.constant 1.000000e+00 : f32
    %607 = vector.broadcast %cst_261 : f32 to vector<2x32xf32>
    %608 = arith.addf %607, %606 : vector<2x32xf32>
    %609 = arith.divf %607, %608 : vector<2x32xf32>
    %610 = arith.mulf %601, %587 : vector<2x32xf32>
    %611 = arith.mulf %595, %603 : vector<2x32xf32>
    %612 = arith.addf %610, %611 : vector<2x32xf32>
    %613 = math.tanh %612 : vector<2x32xf32>
    %614 = arith.mulf %609, %613 : vector<2x32xf32>
    %c0_262 = arith.constant 0 : index
    %c0_263 = arith.constant 0 : index
    %615 = vector.load %arg9[%c0_262, %c0_263] : memref<2x32xf32, #tpu.memory_space<vmem>>, vector<2x32xf32>
    tpu.vector_store %arg9[%c0_262, %c0_263], %614 {strides = array<i32>} : memref<2x32xf32, #tpu.memory_space<vmem>>, vector<2x32xf32>,
    %c0_264 = arith.constant 0 : index
    %c0_265 = arith.constant 0 : index
    %616 = vector.load %arg10[%c0_264, %c0_265] : memref<2x32xf32, #tpu.memory_space<vmem>>, vector<2x32xf32>
    tpu.vector_store %arg10[%c0_264, %c0_265], %612 {strides = array<i32>} : memref<2x32xf32, #tpu.memory_space<vmem>>, vector<2x32xf32>,
    %617 = arith.index_cast %582 : i32 to index
    %c0_266 = arith.constant 0 : index
    %c0_267 = arith.constant 0 : index
    %618 = vector.load %arg6[%617, %c0_266, %c0_267] : memref<8x2x32xf32, #tpu.memory_space<vmem>>, vector<1x2x32xf32>
    %619 = vector.shape_cast %618 : vector<1x2x32xf32> to vector<2x32xf32>
    %620 = vector.shape_cast %614 : vector<2x32xf32> to vector<1x2x32xf32>
    tpu.vector_store %arg6[%617, %c0_266, %c0_267], %620 {strides = array<i32>} : memref<8x2x32xf32, #tpu.memory_space<vmem>>, vector<1x2x32xf32>,
    %c8_i32 = arith.constant 8 : i32
    return
  }
  func.func @transform_0(%arg0: i32) -> (i32, i32, i32) {
    %c0_i32 = arith.constant 0 : i32
    %c0_i32_0 = arith.constant 0 : i32
    %c0_i32_1 = arith.constant 0 : i32
    return %arg0, %c0_i32, %c0_i32_0 : i32, i32, i32
  }
  func.func @transform_1(%arg0: i32) -> (i32, i32, i32) {
    %c0_i32 = arith.constant 0 : i32
    %0 = arith.subi %c0_i32, %arg0 : i32
    %c0_i32_0 = arith.constant 0 : i32
    %c0_i32_1 = arith.constant 0 : i32
    %c0_i32_2 = arith.constant 0 : i32
    return %0, %c0_i32_0, %c0_i32_1 : i32, i32, i32
  }
  func.func @transform_2(%arg0: i32) -> (i32, i32) {
    %c0_i32 = arith.constant 0 : i32
    %c0_i32_0 = arith.constant 0 : i32
    %c0_i32_1 = arith.constant 0 : i32
    return %c0_i32, %c0_i32_0 : i32, i32
  }
  func.func @transform_3(%arg0: i32) -> (i32, i32) {
    %c0_i32 = arith.constant 0 : i32
    %c0_i32_0 = arith.constant 0 : i32
    %c0_i32_1 = arith.constant 0 : i32
    return %c0_i32, %c0_i32_0 : i32, i32
  }
  func.func @transform_4(%arg0: i32) -> (i32, i32, i32) {
    %c0_i32 = arith.constant 0 : i32
    %c0_i32_0 = arith.constant 0 : i32
    %c0_i32_1 = arith.constant 0 : i32
    return %arg0, %c0_i32, %c0_i32_0 : i32, i32, i32
  }
  func.func @transform_5(%arg0: i32) -> (i32, i32, i32) {
    %c0_i32 = arith.constant 0 : i32
    %0 = arith.subi %c0_i32, %arg0 : i32
    %c0_i32_0 = arith.constant 0 : i32
    %c0_i32_1 = arith.constant 0 : i32
    %c0_i32_2 = arith.constant 0 : i32
    return %0, %c0_i32_0, %c0_i32_1 : i32, i32, i32
  }
}

module attributes {stable_mosaic.version = 11 : i64} {
  func.func @_fused_linear_kernel(%arg0: i32, %arg1: memref<16x32xf32, #tpu.memory_space<vmem>>, %arg2: memref<16x32xf32, #tpu.memory_space<vmem>>, %arg3: memref<32x128xf32, #tpu.memory_space<vmem>>, %arg4: memref<32x128xf32, #tpu.memory_space<vmem>>, %arg5: memref<1x128xf32, #tpu.memory_space<vmem>>, %arg6: memref<16x128xf32, #tpu.memory_space<vmem>>) attributes {dimension_semantics = [#tpu.dimension_semantics<parallel>], iteration_bounds = array<i64: 1>, scalar_prefetch = 0 : i64, scratch_operands = 0 : i64, tpu.core_type = #tpu.core_type<tc>, window_params = [{transform_indices = @transform_0, window_bounds = array<i64: 16, 32>}, {transform_indices = @transform_1, window_bounds = array<i64: 16, 32>}, {pipeline_mode = #tpu.pipeline_mode<synchronous>, transform_indices = @transform_2, window_bounds = array<i64: 32, 128>}, {pipeline_mode = #tpu.pipeline_mode<synchronous>, transform_indices = @transform_3, window_bounds = array<i64: 32, 128>}, {pipeline_mode = #tpu.pipeline_mode<synchronous>, transform_indices = @transform_4, window_bounds = array<i64: 1, 128>}, {transform_indices = @transform_5, window_bounds = array<i64: 16, 128>}]} {
    %c0 = arith.constant 0 : index
    %c0_0 = arith.constant 0 : index
    %0 = vector.load %arg1[%c0, %c0_0] : memref<16x32xf32, #tpu.memory_space<vmem>>, vector<16x32xf32>
    %c0_1 = arith.constant 0 : index
    %c0_2 = arith.constant 0 : index
    %1 = vector.load %arg3[%c0_1, %c0_2] : memref<32x128xf32, #tpu.memory_space<vmem>>, vector<32x128xf32>
    %cst = arith.constant dense<0.000000e+00> : vector<16x128xf32>
    %2 = tpu.matmul %0, %1, %cst {dimension_numbers = #tpu.dot_dimension_numbers<[1], [0], [0], [1], [0, 0, 1, 1], [], []>} : vector<16x32xf32>, vector<32x128xf32>, vector<16x128xf32> -> vector<16x128xf32>
    %c0_3 = arith.constant 0 : index
    %c0_4 = arith.constant 0 : index
    %3 = vector.load %arg2[%c0_3, %c0_4] : memref<16x32xf32, #tpu.memory_space<vmem>>, vector<16x32xf32>
    %c0_5 = arith.constant 0 : index
    %c0_6 = arith.constant 0 : index
    %4 = vector.load %arg4[%c0_5, %c0_6] : memref<32x128xf32, #tpu.memory_space<vmem>>, vector<32x128xf32>
    %cst_7 = arith.constant dense<0.000000e+00> : vector<16x128xf32>
    %5 = tpu.matmul %3, %4, %cst_7 {dimension_numbers = #tpu.dot_dimension_numbers<[1], [0], [0], [1], [0, 0, 1, 1], [], []>} : vector<16x32xf32>, vector<32x128xf32>, vector<16x128xf32> -> vector<16x128xf32>
    %6 = arith.addf %2, %5 : vector<16x128xf32>
    %c0_8 = arith.constant 0 : index
    %c0_9 = arith.constant 0 : index
    %7 = vector.load %arg5[%c0_8, %c0_9] : memref<1x128xf32, #tpu.memory_space<vmem>>, vector<1x128xf32>
    %8 = vector.broadcast %7 : vector<1x128xf32> to vector<16x128xf32>
    %9 = arith.addf %6, %8 : vector<16x128xf32>
    %10 = math.tanh %9 : vector<16x128xf32>
    %c0_10 = arith.constant 0 : index
    %c0_11 = arith.constant 0 : index
    %11 = vector.load %arg6[%c0_10, %c0_11] : memref<16x128xf32, #tpu.memory_space<vmem>>, vector<16x128xf32>
    tpu.vector_store %arg6[%c0_10, %c0_11], %10 {strides = array<i32>} : memref<16x128xf32, #tpu.memory_space<vmem>>, vector<16x128xf32>,
    return
  }
  func.func @transform_0(%arg0: i32) -> (i32, i32) {
    %c0_i32 = arith.constant 0 : i32
    %c0_i32_0 = arith.constant 0 : i32
    return %arg0, %c0_i32 : i32, i32
  }
  func.func @transform_1(%arg0: i32) -> (i32, i32) {
    %c0_i32 = arith.constant 0 : i32
    %c0_i32_0 = arith.constant 0 : i32
    return %arg0, %c0_i32 : i32, i32
  }
  func.func @transform_2(%arg0: i32) -> (i32, i32) {
    %c0_i32 = arith.constant 0 : i32
    %c0_i32_0 = arith.constant 0 : i32
    %c0_i32_1 = arith.constant 0 : i32
    return %c0_i32, %c0_i32_0 : i32, i32
  }
  func.func @transform_3(%arg0: i32) -> (i32, i32) {
    %c0_i32 = arith.constant 0 : i32
    %c0_i32_0 = arith.constant 0 : i32
    %c0_i32_1 = arith.constant 0 : i32
    return %c0_i32, %c0_i32_0 : i32, i32
  }
  func.func @transform_4(%arg0: i32) -> (i32, i32) {
    %c0_i32 = arith.constant 0 : i32
    %c0_i32_0 = arith.constant 0 : i32
    %c0_i32_1 = arith.constant 0 : i32
    return %c0_i32, %c0_i32_0 : i32, i32
  }
  func.func @transform_5(%arg0: i32) -> (i32, i32) {
    %c0_i32 = arith.constant 0 : i32
    %c0_i32_0 = arith.constant 0 : i32
    return %arg0, %c0_i32 : i32, i32
  }
}

</mosaic_0001>

<bundles_post_ra>
// kernel: cg_forward_model.16
= control target key start
LH: loop header
LB: loop body
LE: loop exit
PB: predicated region body
PF: predicated region fallthrough
CT: control target
= control target key end

     0   :  { %vm32_vm0 = vcmask 261120   ;;  %s346_s3 = inlined_call_operand.vmem [shape: f32[32,128], index: 3, kind: input, shape index: {}]   ;;  %s347_s2 = inlined_call_operand.vmem [shape: f32[32,128], index: 2, kind: input, shape index: {}]   ;;  %s348_s1 = inlined_call_operand.vmem [shape: f32[16,32], index: 1, kind: input, shape index: {}]   ;;  %s349_s0 = inlined_call_operand.vmem [shape: f32[16,32], index: 0, kind: input, shape index: {}]   ;;  %s350_s4 = inlined_call_operand.vmem [shape: f32[1,128], index: 4, kind: input, shape index: {}]   ;;  %s351_s5 = inlined_call_operand.vmem [shape: f32[16,128], index: 5, kind: output, shape index: {}]  }
   0x1   :  { %v28_v0 = vld [vmem:[%s346_s3] sm:$0xff]  ;;  %v29_v1 = vld [vmem:[%s346_s3 + $0x8] sm:$0xff]  ;;  %v30_v5 = vld [vmem:[%s346_s3 + $0x10] sm:$0xff] }
   0x2   :  { %v22_v2 = vld [vmem:[%s347_s2] sm:$0xff]  ;;  %v249_v3 = vpack.c.bf16 %v29_v1, %v28_v0  ;;  %v23_v4 = vld [vmem:[%s347_s2 + $0x8] sm:$0xff]  ;;  %v31_v6 = vld [vmem:[%s346_s3 + $0x18] sm:$0xff] }
   0x3   :  { %v257_v7 = vpack.c.bf16 %v23_v4, %v22_v2  ;;  %v253_v8 = vpack.c.bf16 %v31_v6, %v30_v5  ;;  %v24_v9 = vld [vmem:[%s347_s2 + $0x10] sm:$0xff]  ;;  %v25_v10 = vld [vmem:[%s347_s2 + $0x18] sm:$0xff]  ;;  %v26_v11 = vld [vmem:[%s348_s1] sm:$0xff] }
   0x4   :  { %250 = vmatprep.subr.bf16.mxu1 %v249_v3  ;;  %v261_v12 = vpack.c.bf16 %v25_v10, %v24_v9  ;;  %235 = vmatprep.mubr.msk.f32.mxu1 %vm32_vm0, %v26_v11  ;;  %v20_v13 = vld [vmem:[%s349_s0] sm:$0xff]  ;;  %v27_v14 = vld [vmem:[%s348_s1 + $0x8] sm:$0xff] }
   0x5   :  { %258 = vmatprep.subr.bf16.mxu0 %v257_v7  ;;  %252 = vmatpush3.bf16.msra.mxu1 %v249_v3  ;;  %v21_v15 = vld [vmem:[%s349_s0 + $0x8] sm:$0xff]  ;;  %v214_v18 = vld [vmem:[%s350_s4] ss:$0 sm:$0xff] }
   0x6   :  { %260 = vmatpush3.bf16.msra.mxu0 %v257_v7  ;;  %254 = vmatprep.subr.bf16.mxu1 %v253_v8 }
   0x7   :  { %262 = vmatprep.subr.bf16.mxu0 %v261_v12  ;;  %246 = vmatprep.mubr.msk.f32.mxu0 %vm32_vm0, %v20_v13 }
   0x9   :  { %256 = vmatpush3.bf16.msra.mxu1 %v253_v8 }
   0xa   :  { %264 = vmatpush3.bf16.msra.mxu0 %v261_v12 }
   0xc   :  { %236 = vmatmul.mubr.msk.f32.vlgmr.msra.gmra.mrb[0].mxu1 %vm32_vm0, %v27_v14 }
   0xd   :  { %247 = vmatmul.mubr.msk.f32.vlgmr.msra.gmra.mrb[0].mxu0 %vm32_vm0, %v21_v15 }
  0xdf   :  { %v237_v16 = vpop.f32.mrb[0].mxu1 }
  0xe0   :  { %v248_v17 = vpop.f32.mrb[0].mxu0  ;;  %v105_v19 = vpop.f32.mrb[1].mxu1 }
  0xe1   :  { %v192_v20 = vadd.f32 %v248_v17, %v237_v16  ;;  %v186_v21 = vpop.f32.mrb[1].mxu0 }
  0xe2   :  { %v187_v22 = vadd.f32 %v186_v21, %v105_v19 }
  0xe3   :  { %v203_v23 = vadd.f32 %v214_v18, %v192_v20 }
  0xe4   :  { %v202_v24 = vadd.f32 %v214_v18, %v187_v22 }
  0xe5   :  { %205 = vst [vmem:[%s351_s5 + $0x8] sm:$0xff] %v203_v23 }
  0xe6   :  { %204 = vst [vmem:[%s351_s5] sm:$0xff] %v202_v24 }

// kernel: cg_forward_model.13
= control target key start
LH: loop header
LB: loop body
LE: loop exit
PB: predicated region body
PF: predicated region fallthrough
CT: control target
= control target key end

     0   :  { %vm27_vm0 = vcmask 64512   ;;  %vm109_vm1 = vcmask 130048   ;;  %s296_s2 = inlined_call_operand.vmem [shape: f32[16,128], index: 2, kind: input, shape index: {}]   ;;  %s297_s3 = inlined_call_operand.vmem [shape: f32[8,128], index: 3, kind: input, shape index: {}]   ;;  %s298_s1 = inlined_call_operand.vmem [shape: f32[16,8], index: 1, kind: input, shape index: {}]   ;;  %s299_s0 = inlined_call_operand.vmem [shape: f32[16,16], index: 0, kind: input, shape index: {}]   ;;  %s300_s4 = inlined_call_operand.vmem [shape: f32[1,128], index: 4, kind: input, shape index: {}]   ;;  %s301_s5 = inlined_call_operand.vmem [shape: f32[16,128], index: 5, kind: output, shape index: {}]  }
   0x1   :  { %v22_v0 = vld [vmem:[%s296_s2] sm:$0xff]  ;;  %v23_v1 = vld [vmem:[%s296_s2 + $0x8] sm:$0xff] }
   0x2   :  { %v26_v2 = vld [vmem:[%s297_s3] sm:$0xff]  ;;  %v230_v3 = vpack.c.bf16 %v23_v1, %v22_v0  ;;  %v25_v5 = vld [vmem:[%s298_s1 + $0x8] sm:$0xff] }
   0x3   :  { %218 = vmatprep.subr.mxu1 %v26_v2  ;;  %v24_v4 = vld [vmem:[%s298_s1] sm:$0xff]  ;;  %v21_v7 = vld [vmem:[%s299_s0 + $0x8] sm:$0xff] }
   0x4   :  { %v20_v6 = vld [vmem:[%s299_s0] sm:$0xff]  ;;  %219 = vmatpush3.msra.mxu1 %v26_v2  ;;  %220 = vmatprep.mubr.msk.f32.mxu1 %vm27_vm0, %v24_v4 }
   0x5   :  { %231 = vmatprep.subr.bf16.mxu0 %v230_v3  ;;  %221 = vmatmul.mubr.msk.f32.vlgmr.msra.gmra.mrb[0].mxu1 %vm27_vm0, %v25_v5  ;;  %v210_v11 = vld [vmem:[%s300_s4] ss:$0 sm:$0xff] }
   0x6   :  { %233 = vmatpush3.bf16.msra.mxu0 %v230_v3  ;;  %227 = vmatprep.mubr.msk.f32.mxu0 %vm109_vm1, %v20_v6 }
   0x9   :  { %228 = vmatmul.mubr.msk.f32.vlgmr.msra.gmra.mrb[0].mxu0 %vm109_vm1, %v21_v7 }
  0xd8   :  { %v222_v8 = vpop.f32.mrb[0].mxu1 }
  0xd9   :  { %v100_v9 = vpop.f32.mrb[1].mxu1 }
  0xdc   :  { %v229_v10 = vpop.f32.mrb[0].mxu0 }
  0xdd   :  { %v188_v12 = vadd.f32 %v229_v10, %v222_v8  ;;  %v182_v13 = vpop.f32.mrb[1].mxu0 }
  0xde   :  { %v183_v14 = vadd.f32 %v182_v13, %v100_v9 }
  0xdf   :  { %v199_v15 = vadd.f32 %v210_v11, %v188_v12 }
  0xe0   :  { %v198_v16 = vadd.f32 %v210_v11, %v183_v14 }
  0xe1   :  { %201 = vst [vmem:[%s301_s5 + $0x8] sm:$0xff] %v199_v15 }
  0xe2   :  { %200 = vst [vmem:[%s301_s5] sm:$0xff] %v198_v16 }

// kernel: cg_forward_model.11
= control target key start
LH: loop header
LB: loop body
LE: loop exit
PB: predicated region body
PF: predicated region fallthrough
CT: control target
= control target key end

     0   :  { %v210_v0 = vmov 0.0   ;;  %vm211_vm0 = vmmov 0   ;;  %s268_s1 = inlined_call_operand.vmem [shape: bf16[128,128], index: 1, kind: input, shape index: {}]   ;;  %s269_s0 = inlined_call_operand.vmem [shape: bf16[16,128], index: 0, kind: input, shape index: {}]   ;;  %s270_s2 = inlined_call_operand.vmem [shape: f32[1,128], index: 2, kind: input, shape index: {}]   ;;  %s271_s3 = inlined_call_operand.vmem [shape: f32[16,128], index: 3, kind: output, shape index: {}]  }
   0x1   :  { %179 = vmatprep.subr.bf16.mxu0 %v210_v0  ;;  %v201_v1 = vld [vmem:[%s268_s1] sm:$0xff]   ;;  %195 = vmatprep.mubr.msk.bf16.mxu0 %vm211_vm0, %v210_v0  ;;  %v202_v2 = vld [vmem:[%s268_s1 + $0x8] sm:$0xff]   ;;  %v203_v3 = vld [vmem:[%s268_s1 + $0x10] sm:$0xff]  }
   0x2   :  { %180 = vmatpush3.bf16.msra.mxu0 %v201_v1  ;;  %v204_v4 = vld [vmem:[%s268_s1 + $0x18] sm:$0xff]   ;;  %v205_v5 = vld [vmem:[%s268_s1 + $0x20] sm:$0xff]   ;;  %v206_v6 = vld [vmem:[%s268_s1 + $0x28] sm:$0xff]  }
   0x3   :  { %181 = vmatprep.subr.bf16.mxu0 %v210_v0  ;;  %v207_v7 = vld [vmem:[%s268_s1 + $0x30] sm:$0xff]   ;;  %v208_v8 = vld [vmem:[%s268_s1 + $0x38] sm:$0xff]   ;;  %v209_v9 = vld [vmem:[%s269_s0] sm:$0xff]  }
   0x4   :  { %v169_v10 = vld [vmem:[%s270_s2] ss:$0 sm:$0xff] }
   0x6   :  { %182 = vmatpush3.bf16.msra.mxu0 %v202_v2 }
   0x7   :  { %183 = vmatprep.subr.bf16.mxu0 %v210_v0 }
   0xa   :  { %184 = vmatpush3.bf16.msra.mxu0 %v203_v3 }
   0xb   :  { %185 = vmatprep.subr.bf16.mxu0 %v210_v0 }
   0xe   :  { %186 = vmatpush3.bf16.msra.mxu0 %v204_v4 }
   0xf   :  { %187 = vmatprep.subr.bf16.mxu0 %v210_v0 }
  0x12   :  { %188 = vmatpush3.bf16.msra.mxu0 %v205_v5 }
  0x13   :  { %189 = vmatprep.subr.bf16.mxu0 %v210_v0 }
  0x16   :  { %190 = vmatpush3.bf16.msra.mxu0 %v206_v6 }
  0x17   :  { %191 = vmatprep.subr.bf16.mxu0 %v210_v0 }
  0x1a   :  { %192 = vmatpush3.bf16.msra.mxu0 %v207_v7 }
  0x1b   :  { %193 = vmatprep.subr.bf16.mxu0 %v210_v0 }
  0x1e   :  { %194 = vmatpush3.bf16.msra.mxu0 %v208_v8 }
  0x21   :  { %196 = vmatmul.mubr.bf16.vlgmr.msra.gmra.mrb[0].mxu0 %v209_v9 }
  0xf4   :  { %v129_v11 = vpop.f32.mrb[0].mxu0 }
  0xf5   :  { %v152_v12 = vadd.f32 %v169_v10, %v129_v11  ;;  %v197_v13 = vpop.f32.mrb[1].mxu0 }
  0xf6   :  { %v132_v14 = vpop.f32.mrb[2].mxu0 }
  0xf7   :  { %154 = vst [vmem:[%s271_s3] sm:$0xff] %v152_v12  ;;  %v153_v15 = vadd.f32 %v169_v10, %v132_v14  ;;  %v198_v16 = vpop.f32.mrb[3].mxu0 }
  0xf9   :  { %155 = vst [vmem:[%s271_s3 + $0x8] sm:$0xff] %v153_v15 }

// kernel: cg_forward_model.21
= control target key start
LH: loop header
LB: loop body
LE: loop exit
PB: predicated region body
PF: predicated region fallthrough
CT: control target
= control target key end

     0   :  { %vm32_vm0 = vcmask 261120   ;;  %s352_s3 = inlined_call_operand.vmem [shape: f32[32,128], index: 3, kind: input, shape index: {}]   ;;  %s353_s2 = inlined_call_operand.vmem [shape: f32[32,128], index: 2, kind: input, shape index: {}]   ;;  %s354_s1 = inlined_call_operand.vmem [shape: f32[16,32], index: 1, kind: input, shape index: {}]   ;;  %s355_s0 = inlined_call_operand.vmem [shape: f32[16,32], index: 0, kind: input, shape index: {}]   ;;  %s356_s4 = inlined_call_operand.vmem [shape: f32[1,128], index: 4, kind: input, shape index: {}]   ;;  %s357_s5 = inlined_call_operand.vmem [shape: f32[16,128], index: 5, kind: output, shape index: {}]  }
   0x1   :  { %v28_v0 = vld [vmem:[%s352_s3] sm:$0xff]  ;;  %v29_v1 = vld [vmem:[%s352_s3 + $0x8] sm:$0xff]  ;;  %v30_v5 = vld [vmem:[%s352_s3 + $0x10] sm:$0xff] }
   0x2   :  { %v22_v2 = vld [vmem:[%s353_s2] sm:$0xff]  ;;  %v251_v3 = vpack.c.bf16 %v29_v1, %v28_v0  ;;  %v23_v4 = vld [vmem:[%s353_s2 + $0x8] sm:$0xff]  ;;  %v31_v6 = vld [vmem:[%s352_s3 + $0x18] sm:$0xff] }
   0x3   :  { %v259_v7 = vpack.c.bf16 %v23_v4, %v22_v2  ;;  %v255_v8 = vpack.c.bf16 %v31_v6, %v30_v5  ;;  %v24_v9 = vld [vmem:[%s353_s2 + $0x10] sm:$0xff]  ;;  %v25_v10 = vld [vmem:[%s353_s2 + $0x18] sm:$0xff]  ;;  %v26_v11 = vld [vmem:[%s354_s1] sm:$0xff] }
   0x4   :  { %252 = vmatprep.subr.bf16.mxu1 %v251_v3  ;;  %v263_v12 = vpack.c.bf16 %v25_v10, %v24_v9  ;;  %237 = vmatprep.mubr.msk.f32.mxu1 %vm32_vm0, %v26_v11  ;;  %v20_v13 = vld [vmem:[%s355_s0] sm:$0xff]  ;;  %v27_v14 = vld [vmem:[%s354_s1 + $0x8] sm:$0xff] }
   0x5   :  { %260 = vmatprep.subr.bf16.mxu0 %v259_v7  ;;  %254 = vmatpush3.bf16.msra.mxu1 %v251_v3  ;;  %v21_v15 = vld [vmem:[%s355_s0 + $0x8] sm:$0xff]  ;;  %v216_v18 = vld [vmem:[%s356_s4] ss:$0 sm:$0xff] }
   0x6   :  { %262 = vmatpush3.bf16.msra.mxu0 %v259_v7  ;;  %256 = vmatprep.subr.bf16.mxu1 %v255_v8 }
   0x7   :  { %264 = vmatprep.subr.bf16.mxu0 %v263_v12  ;;  %248 = vmatprep.mubr.msk.f32.mxu0 %vm32_vm0, %v20_v13 }
   0x9   :  { %258 = vmatpush3.bf16.msra.mxu1 %v255_v8 }
   0xa   :  { %266 = vmatpush3.bf16.msra.mxu0 %v263_v12 }
   0xc   :  { %238 = vmatmul.mubr.msk.f32.vlgmr.msra.gmra.mrb[0].mxu1 %vm32_vm0, %v27_v14 }
   0xd   :  { %249 = vmatmul.mubr.msk.f32.vlgmr.msra.gmra.mrb[0].mxu0 %vm32_vm0, %v21_v15 }
  0xdf   :  { %v239_v16 = vpop.f32.mrb[0].mxu1 }
  0xe0   :  { %v250_v17 = vpop.f32.mrb[0].mxu0  ;;  %v105_v19 = vpop.f32.mrb[1].mxu1 }
  0xe1   :  { %v192_v20 = vadd.f32 %v250_v17, %v239_v16  ;;  %v186_v21 = vpop.f32.mrb[1].mxu0 }
  0xe2   :  { %v187_v22 = vadd.f32 %v186_v21, %v105_v19 }
  0xe3   :  { %v203_v23 = vadd.f32 %v216_v18, %v192_v20 }
  0xe4   :  { %v202_v24 = vadd.f32 %v216_v18, %v187_v22 }
  0xe5   :  { %269 = vtanh.f32 %v203_v23 }
  0xe6   :  { %271 = vtanh.f32 %v202_v24 }
  0xef   :  { %v270_v25 = vpop.eup %269 }
  0xf0   :  { %v272_v26 = vpop.eup %271  ;;  %207 = vst [vmem:[%s357_s5 + $0x8] sm:$0xff] %v270_v25 }
  0xf1   :  { %206 = vst [vmem:[%s357_s5] sm:$0xff] %v272_v26 }

// kernel: cg_forward_model.14
= control target key start
LH: loop header
LB: loop body
LE: loop exit
PB: predicated region body
PF: predicated region fallthrough
CT: control target
= control target key end

     0   :  { %vm59_vm0 = vcmask 254976   ;;  %v2540_v0 = vmov 0.0|0.0   ;;  %v2541_v4 = vmov 0.0   ;;  %vm2542_vm1 = vmmov 0   ;;  %s2544_s12 = smov 64   ;;  %s2545_s13 = smov 96   ;;  %s2968_s2 = inlined_call_operand.vmem [shape: f32[32,128], index: 2, kind: input, shape index: {}]   ;;  %s2969_s3 = inlined_call_operand.vmem [shape: f32[32,128], index: 3, kind: input, shape index: {}]   ;;  %s2970_s0 = inlined_call_operand.vmem [shape: f32[8,2,128], index: 0, kind: input, shape index: {}]   ;;  %s2971_s1 = inlined_call_operand.vmem [shape: f32[8,2,128], index: 1, kind: input, shape index: {}]   ;;  %s2972_s4 = inlined_call_operand.vmem [shape: f32[8,2,32], index: 4, kind: output, shape index: {0}]   ;;  %s2973_s5 = inlined_call_operand.vmem [shape: f32[8,2,32], index: 5, kind: output, shape index: {1}]  }
   0x1   :  { %2310 = vmatprep.subr.bf16.mxu0 %v2540_v0  ;;  %v64_v1 = vld [vmem:[%s2968_s2] sm:$0xff]  ;;  %v65_v2 = vld [vmem:[%s2968_s2 + $0x8] sm:$0xff]  ;;  %2316 = vmatprep.subr.bf16.mxu1 %v2540_v0  ;;  %60 = vst.msk [vmem:[#allocation2] sm:$0x3] %vm59_vm0, %v2541_v4  ;;  %61 = vst.msk [vmem:[#allocation3] sm:$0x3] %vm59_vm0, %v2541_v4 }
   0x2   :  { %v68_v3 = vld [vmem:[%s2969_s3] sm:$0xff]  ;;  %62 = vst.msk [vmem:[#allocation4] sm:$0x3] %vm59_vm0, %v2541_v4  ;;  %63 = vst.msk [vmem:[#allocation5] sm:$0x3] %vm59_vm0, %v2541_v4  ;;  %v2595_v5 = vpack.c.bf16 %v65_v2, %v64_v1  ;;  %v69_v6 = vld [vmem:[%s2969_s3 + $0x8] sm:$0xff]  ;;  %2142 = vmatprep.mubr.msk.f32.mxu0 %vm2542_vm1, %v2541_v4  ;;  %2153 = vmatprep.mubr.msk.f32.mxu1 %vm2542_vm1, %v2541_v4 }
   0x3   :  { %v66_v7 = vld [vmem:[%s2968_s2 + $0x10] sm:$0xff]  ;;  %v67_v8 = vld [vmem:[%s2968_s2 + $0x18] sm:$0xff]  ;;  %v2610_v9 = vpack.c.bf16 %v69_v6, %v68_v3  ;;  %vm75_vm2 = vcmask 261120   ;;  %s2543_s2 = smov 32   ;;  %v72_v18 = vld [vmem:[%s2970_s0] sm:$0x3] }
   0x4   :  { %v70_v10 = vld [vmem:[%s2969_s3 + $0x10] sm:$0xff]  ;;  %v71_v11 = vld [vmem:[%s2969_s3 + $0x18] sm:$0xff]  ;;  %2312 = vmatpush3.bf16.msra.mxu0 %v2595_v5  ;;  %v2619_v12 = vpack.c.bf16 %v67_v8, %v66_v7  ;;  %v1996_v19 = vld [vmem:[%s2971_s1 + $0xe] sm:$0x3] }
   0x5   :  { %2313 = vmatprep.subr.bf16.mxu0 %v2540_v0  ;;  %2318 = vmatpush3.bf16.msra.mxu1 %v2610_v9  ;;  %v2623_v13 = vpack.c.bf16 %v71_v11, %v70_v10  ;;  %v2000_v60 = vld [vmem:[%s2970_s0 + $0x2] sm:$0x3]  ;;  %v2004_v1 = vld [vmem:[%s2971_s1 + $0xc] sm:$0x3] }
   0x6   :  { %2319 = vmatprep.subr.bf16.mxu1 %v2540_v0 }
   0x8   :  { %2315 = vmatpush3.bf16.msra.mxu0 %v2619_v12  ;;  %v73_v14 = vld [vmem:[#allocation2] sm:$0x3]  ;;  %v74_v15 = vld [vmem:[#allocation3] sm:$0x3] }
   0x9   :  { %2321 = vmatpush3.bf16.msra.mxu1 %v2623_v13  ;;  %v192_v16 = vld [vmem:[#allocation4] sm:$0x3]  ;;  %158 = vrot.lane.b32.xlu1 %v74_v15, %s2543_s2  ;;  %v193_v17 = vld [vmem:[#allocation5] sm:$0x3] }
   0xa   :  { %2322 = vmatprep.subr.bf16.mxu0 %v2540_v0  ;;  %2328 = vmatprep.subr.bf16.mxu1 %v2540_v0 }
   0xb   :  { %2143 = vmatmul.mubr.msk.f32.vlgmr.msra.gmra.mrb[0].mxu0 %vm75_vm2, %v73_v14 }
   0xc   :  { %2154 = vmatmul.mubr.msk.f32.vlgmr.msra.gmra.mrb[0].mxu1 %vm75_vm2, %v192_v16  ;;  %2324 = vmatpush3.bf16.msra.mxu0 %v2595_v5 }
   0xd   :  { %276 = vrot.lane.b32.xlu1 %v193_v17, %s2543_s2  ;;  %2325 = vmatprep.subr.bf16.mxu0 %v2540_v0 }
   0xe   :  { %2330 = vmatpush3.bf16.msra.mxu1 %v2610_v9  ;;  %2164 = vmatprep.mubr.msk.f32.mxu0 %vm2542_vm1, %v2541_v4 }
   0xf   :  { %2331 = vmatprep.subr.bf16.mxu1 %v2540_v0  ;;  %2175 = vmatprep.mubr.msk.f32.mxu1 %vm2542_vm1, %v2541_v4 }
  0x10   :  { %2327 = vmatpush3.bf16.msra.mxu0 %v2619_v12 }
  0x11   :  { %2334 = vmatprep.subr.bf16.mxu0 %v2540_v0 }
  0x12   :  { %2333 = vmatpush3.bf16.msra.mxu1 %v2623_v13 }
  0x13   :  { %2340 = vmatprep.subr.bf16.mxu1 %v2540_v0 }
  0x7b   :  { %v159_v40 = vpop.permute.xlu1 %158 }
  0x7f   :  { %v277_v42 = vpop.permute.xlu1 %276 }
  0xde   :  { %v145_v20 = vpop.f32.mrb[0].mxu0 }
  0xdf   :  { %v149_v21 = vadd.f32 %v145_v20, %v72_v18  ;;  %v2144_v22 = vpop.f32.mrb[1].mxu0  ;;  %v263_v23 = vpop.f32.mrb[0].mxu1 }
  0xe0   :  { %v267_v24 = vadd.f32 %v1996_v19, %v263_v23  ;;  %v2155_v25 = vpop.f32.mrb[1].mxu1 }
  0xe1   :  { %2412 = vtanh.f32 %v149_v21  ;;  %v1995_v28 = vmul.f32 -1.442695, %v149_v21 }
  0xe2   :  { %2414 = vtanh.f32 %v267_v24  ;;  %v1998_v29 = vmul.f32 -1.442695, %v267_v24 }
  0xe3   :  { %2416 = vpow2.f32 %v1995_v28 }
  0xe4   :  { %2418 = vpow2.f32 %v1998_v29 }
  0xeb   :  { %v2413_v26 = vpop.eup %2412 }
  0xec   :  { %163 = vrot.lane.b32.xlu0 %v2413_v26, %s2544_s12  ;;  %v2415_v27 = vpop.eup %2414 }
  0xed   :  { %v2417_v30 = vpop.eup %2416 }
  0xee   :  { %v153_v31 = vadd.f32 1.0, %v2417_v30  ;;  %v2419_v32 = vpop.eup %2418 }
  0xef   :  { %v271_v33 = vadd.f32 1.0, %v2419_v32 }
  0xf0   :  { %281 = vrot.lane.b32.xlu0 %v2415_v27, %s2544_s12  ;;  %2420 = vrcp.f32 %v153_v31 }
  0xf1   :  { %2422 = vrcp.f32 %v271_v33 }
  0xfa   :  { %v2421_v34 = vpop.eup %2420 }
  0xfb   :  { %v2423_v37 = vpop.eup %2422  ;;  %v161_v41 = vmul.f32 %v2421_v34, %v159_v40 }
  0xfc   :  { %v279_v45 = vmul.f32 %v2423_v37, %v277_v42 }
 0x15e   :  { %v164_v35 = vpop.permute.xlu0 %163 }
 0x15f   :  { %v166_v36 = vmul.f32 %v2421_v34, %v164_v35 }
 0x161   :  { %168 = vrot.lane.b32.xlu0 %v166_v36, %s2543_s2 }
 0x162   :  { %v282_v38 = vpop.permute.xlu0 %281 }
 0x163   :  { %v284_v39 = vmul.f32 %v2423_v37, %v282_v38 }
 0x165   :  { %286 = vrot.lane.b32.xlu1 %v284_v39, %s2543_s2 }
 0x1d3   :  { %v169_v43 = vpop.permute.xlu0 %168 }
 0x1d4   :  { %v171_v44 = vadd.f32 %v169_v43, %v161_v41 }
 0x1d6   :  { %2424 = vtanh.f32 %v171_v44 }
 0x1d7   :  { %v287_v46 = vpop.permute.xlu1 %286 }
 0x1d8   :  { %v289_v47 = vadd.f32 %v287_v46, %v279_v45  ;;  %v2008_v46 = vld [vmem:[%s2970_s0 + $0x4] sm:$0x3] }
 0x1da   :  { %2426 = vtanh.f32 %v289_v47 }
 0x1e0   :  { %v2425_v48 = vpop.eup %2424 }
 0x1e1   :  { %174 = vrot.lane.b32.xlu0 %v2425_v48, %s2544_s12 }
 0x1e4   :  { %v2427_v49 = vpop.eup %2426 }
 0x1e5   :  { %292 = vrot.lane.b32.xlu1 %v2427_v49, %s2544_s12 }
 0x253   :  { %v175_v50 = vpop.permute.xlu0 %174 }
 0x254   :  { %v177_v51 = vmul.f32 %v2421_v34, %v175_v50  ;;  %v2012_v50 = vld [vmem:[%s2971_s1 + $0xa] sm:$0x3] }
 0x256   :  { %179 = vrot.lane.b32.xlu0 %v177_v51, %s2543_s2 }
 0x257   :  { %v293_v52 = vpop.permute.xlu1 %292 }
 0x258   :  { %v295_v53 = vmul.f32 %v2423_v37, %v293_v52 }
 0x25a   :  { %297 = vrot.lane.b32.xlu1 %v295_v53, %s2543_s2  ;;  %185 = vrot.lane.b32.xlu0 %v171_v44, %s2545_s13 }
 0x25e   :  { %302 = vrot.lane.b32.xlu1 %v289_v47, %s2545_s13 }
 0x2c8   :  { %v180_v54 = vpop.permute.xlu0 %179 }
 0x2c9   :  { %183 = vst.msk [vmem:[#allocation2] sm:$0x3] %vm59_vm0, %v180_v54  ;;  %189 = vst.msk [vmem:[%s2972_s4] sm:$0x3] %vm59_vm0, %v180_v54 }
 0x2cc   :  { %v298_v55 = vpop.permute.xlu1 %297  ;;  %v186_v56 = vpop.permute.xlu0 %185 }
 0x2cd   :  { %300 = vst.msk [vmem:[#allocation4] sm:$0x3] %vm59_vm0, %v298_v55  ;;  %1999 = vst.msk [vmem:[%s2973_s5 + $0xe] sm:$0x3] %vm59_vm0, %v298_v55 }
 0x2ce   :  { %188 = vst.msk [vmem:[#allocation3] sm:$0x3] %vm59_vm0, %v186_v56 }
 0x2d0   :  { %v303_v57 = vpop.permute.xlu1 %302  ;;  %v310_v58 = vld [vmem:[#allocation2] sm:$0x3] }
 0x2d1   :  { %305 = vst.msk [vmem:[#allocation5] sm:$0x3] %vm59_vm0, %v303_v57  ;;  %2165 = vmatmul.mubr.msk.f32.vlgmr.msra.gmra.mrb[2].mxu0 %vm75_vm2, %v310_v58 }
 0x2d2   :  { %2336 = vmatpush3.bf16.msra.mxu0 %v2595_v5  ;;  %2186 = vmatprep.mubr.msk.f32.mxu0 %vm2542_vm1, %v2541_v4 }
 0x2d3   :  { %2337 = vmatprep.subr.bf16.mxu0 %v2540_v0 }
 0x2d4   :  { %v428_v59 = vld [vmem:[#allocation4] sm:$0x3] }
 0x2d5   :  { %2176 = vmatmul.mubr.msk.f32.vlgmr.msra.gmra.mrb[2].mxu1 %vm75_vm2, %v428_v59  ;;  %v311_v10 = vld [vmem:[#allocation3] sm:$0x3] }
 0x2d6   :  { %2339 = vmatpush3.bf16.msra.mxu0 %v2619_v12  ;;  %2342 = vmatpush3.bf16.msra.mxu1 %v2610_v9 }
 0x2d7   :  { %2343 = vmatprep.subr.bf16.mxu1 %v2540_v0  ;;  %2197 = vmatprep.mubr.msk.f32.mxu1 %vm2542_vm1, %v2541_v4 }
 0x2d8   :  { %2346 = vmatprep.subr.bf16.mxu0 %v2540_v0  ;;  %v429_v11 = vld [vmem:[#allocation5] sm:$0x3] }
 0x2da   :  { %2345 = vmatpush3.bf16.msra.mxu1 %v2623_v13 }
 0x2db   :  { %2352 = vmatprep.subr.bf16.mxu1 %v2540_v0 }
 0x3a4   :  { %v381_v61 = vpop.f32.mrb[2].mxu0 }
 0x3a5   :  { %v385_v62 = vadd.f32 %v2000_v60, %v381_v61  ;;  %v2166_v63 = vpop.f32.mrb[3].mxu0 }
 0x3a7   :  { %2428 = vtanh.f32 %v385_v62  ;;  %v2002_v14 = vmul.f32 -1.442695, %v385_v62 }
 0x3a8   :  { %v499_v2 = vpop.f32.mrb[2].mxu1 }
 0x3a9   :  { %v503_v3 = vadd.f32 %v2004_v1, %v499_v2  ;;  %v2177_v6 = vpop.f32.mrb[3].mxu1 }
 0x3ab   :  { %2430 = vtanh.f32 %v503_v3  ;;  %v2006_v15 = vmul.f32 -1.442695, %v503_v3 }
 0x3ac   :  { %2432 = vpow2.f32 %v2002_v14 }
 0x3ad   :  { %2434 = vpow2.f32 %v2006_v15 }
 0x3b1   :  { %v2429_v7 = vpop.eup %2428 }
 0x3b2   :  { %399 = vrot.lane.b32.xlu0 %v2429_v7, %s2544_s12 }
 0x3b5   :  { %v2431_v8 = vpop.eup %2430 }
 0x3b6   :  { %517 = vrot.lane.b32.xlu1 %v2431_v8, %s2544_s12  ;;  %394 = vrot.lane.b32.xlu0 %v311_v10, %s2543_s2  ;;  %v2433_v16 = vpop.eup %2432 }
 0x3b7   :  { %v389_v17 = vadd.f32 1.0, %v2433_v16  ;;  %v2435_v18 = vpop.eup %2434 }
 0x3b8   :  { %v507_v19 = vadd.f32 1.0, %v2435_v18 }
 0x3b9   :  { %2436 = vrcp.f32 %v389_v17 }
 0x3ba   :  { %512 = vrot.lane.b32.xlu1 %v429_v11, %s2543_s2  ;;  %2438 = vrcp.f32 %v507_v19 }
 0x3c3   :  { %v2437_v20 = vpop.eup %2436 }
 0x3c4   :  { %v2439_v23 = vpop.eup %2438 }
 0x424   :  { %v400_v21 = vpop.permute.xlu0 %399 }
 0x425   :  { %v402_v22 = vmul.f32 %v2437_v20, %v400_v21 }
 0x427   :  { %404 = vrot.lane.b32.xlu0 %v402_v22, %s2543_s2 }
 0x428   :  { %v518_v24 = vpop.permute.xlu1 %517  ;;  %v395_v26 = vpop.permute.xlu0 %394 }
 0x429   :  { %v520_v25 = vmul.f32 %v2439_v23, %v518_v24  ;;  %v397_v27 = vmul.f32 %v2437_v20, %v395_v26 }
 0x42b   :  { %522 = vrot.lane.b32.xlu1 %v520_v25, %s2543_s2 }
 0x42c   :  { %v513_v28 = vpop.permute.xlu1 %512 }
 0x42d   :  { %v515_v31 = vmul.f32 %v2439_v23, %v513_v28 }
 0x499   :  { %v405_v29 = vpop.permute.xlu0 %404 }
 0x49a   :  { %v407_v30 = vadd.f32 %v405_v29, %v397_v27 }
 0x49c   :  { %2440 = vtanh.f32 %v407_v30 }
 0x49d   :  { %v523_v32 = vpop.permute.xlu1 %522 }
 0x49e   :  { %v525_v33 = vadd.f32 %v523_v32, %v515_v31  ;;  %v2016_v32 = vld [vmem:[%s2970_s0 + $0x6] sm:$0x3] }
 0x4a0   :  { %2442 = vtanh.f32 %v525_v33 }
 0x4a6   :  { %v2441_v34 = vpop.eup %2440 }
 0x4a7   :  { %410 = vrot.lane.b32.xlu0 %v2441_v34, %s2544_s12 }
 0x4aa   :  { %v2443_v35 = vpop.eup %2442 }
 0x4ab   :  { %528 = vrot.lane.b32.xlu1 %v2443_v35, %s2544_s12 }
 0x519   :  { %v411_v36 = vpop.permute.xlu0 %410 }
 0x51a   :  { %v413_v37 = vmul.f32 %v2437_v20, %v411_v36  ;;  %v2020_v36 = vld [vmem:[%s2971_s1 + $0x8] sm:$0x3] }
 0x51c   :  { %415 = vrot.lane.b32.xlu0 %v413_v37, %s2543_s2 }
 0x51d   :  { %v529_v38 = vpop.permute.xlu1 %528 }
 0x51e   :  { %v531_v39 = vmul.f32 %v2439_v23, %v529_v38 }
 0x520   :  { %533 = vrot.lane.b32.xlu1 %v531_v39, %s2543_s2  ;;  %420 = vrot.lane.b32.xlu0 %v407_v30, %s2545_s13 }
 0x524   :  { %538 = vrot.lane.b32.xlu1 %v525_v33, %s2545_s13 }
 0x58e   :  { %v416_v40 = vpop.permute.xlu0 %415 }
 0x58f   :  { %418 = vst.msk [vmem:[#allocation2] sm:$0x3] %vm59_vm0, %v416_v40  ;;  %2003 = vst.msk [vmem:[%s2972_s4 + $0x2] sm:$0x3] %vm59_vm0, %v416_v40 }
 0x592   :  { %v534_v41 = vpop.permute.xlu1 %533  ;;  %v421_v42 = vpop.permute.xlu0 %420 }
 0x593   :  { %536 = vst.msk [vmem:[#allocation4] sm:$0x3] %vm59_vm0, %v534_v41  ;;  %2007 = vst.msk [vmem:[%s2973_s5 + $0xc] sm:$0x3] %vm59_vm0, %v534_v41 }
 0x594   :  { %423 = vst.msk [vmem:[#allocation3] sm:$0x3] %vm59_vm0, %v421_v42 }
 0x596   :  { %v539_v43 = vpop.permute.xlu1 %538  ;;  %v546_v44 = vld [vmem:[#allocation2] sm:$0x3] }
 0x597   :  { %541 = vst.msk [vmem:[#allocation5] sm:$0x3] %vm59_vm0, %v539_v43  ;;  %2187 = vmatmul.mubr.msk.f32.vlgmr.msra.gmra.mrb[4].mxu0 %vm75_vm2, %v546_v44 }
 0x598   :  { %2348 = vmatpush3.bf16.msra.mxu0 %v2595_v5  ;;  %2208 = vmatprep.mubr.msk.f32.mxu0 %vm2542_vm1, %v2541_v4 }
 0x599   :  { %2349 = vmatprep.subr.bf16.mxu0 %v2540_v0 }
 0x59a   :  { %v664_v45 = vld [vmem:[#allocation4] sm:$0x3] }
 0x59b   :  { %2198 = vmatmul.mubr.msk.f32.vlgmr.msra.gmra.mrb[4].mxu1 %vm75_vm2, %v664_v45  ;;  %v547_v56 = vld [vmem:[#allocation3] sm:$0x3] }
 0x59c   :  { %2351 = vmatpush3.bf16.msra.mxu0 %v2619_v12  ;;  %2354 = vmatpush3.bf16.msra.mxu1 %v2610_v9 }
 0x59d   :  { %2355 = vmatprep.subr.bf16.mxu1 %v2540_v0  ;;  %2219 = vmatprep.mubr.msk.f32.mxu1 %vm2542_vm1, %v2541_v4 }
 0x59e   :  { %2358 = vmatprep.subr.bf16.mxu0 %v2540_v0  ;;  %v665_v57 = vld [vmem:[#allocation5] sm:$0x3] }
 0x5a0   :  { %2357 = vmatpush3.bf16.msra.mxu1 %v2623_v13 }
 0x5a1   :  { %2364 = vmatprep.subr.bf16.mxu1 %v2540_v0 }
 0x66a   :  { %v617_v47 = vpop.f32.mrb[4].mxu0 }
 0x66b   :  { %v621_v48 = vadd.f32 %v2008_v46, %v617_v47  ;;  %v2188_v49 = vpop.f32.mrb[5].mxu0 }
 0x66d   :  { %2444 = vtanh.f32 %v621_v48  ;;  %v2010_v58 = vmul.f32 -1.442695, %v621_v48 }
 0x66e   :  { %v735_v51 = vpop.f32.mrb[4].mxu1 }
 0x66f   :  { %v739_v52 = vadd.f32 %v2012_v50, %v735_v51  ;;  %v2199_v53 = vpop.f32.mrb[5].mxu1 }
 0x671   :  { %2446 = vtanh.f32 %v739_v52  ;;  %v2014_v59 = vmul.f32 -1.442695, %v739_v52 }
 0x672   :  { %2448 = vpow2.f32 %v2010_v58 }
 0x673   :  { %2450 = vpow2.f32 %v2014_v59 }
 0x677   :  { %v2445_v54 = vpop.eup %2444 }
 0x678   :  { %635 = vrot.lane.b32.xlu0 %v2445_v54, %s2544_s12 }
 0x67b   :  { %v2447_v55 = vpop.eup %2446 }
 0x67c   :  { %753 = vrot.lane.b32.xlu1 %v2447_v55, %s2544_s12  ;;  %630 = vrot.lane.b32.xlu0 %v547_v56, %s2543_s2  ;;  %v2449_v60 = vpop.eup %2448 }
 0x67d   :  { %v625_v61 = vadd.f32 1.0, %v2449_v60  ;;  %v2451_v62 = vpop.eup %2450 }
 0x67e   :  { %v743_v63 = vadd.f32 1.0, %v2451_v62 }
 0x67f   :  { %2452 = vrcp.f32 %v625_v61 }
 0x680   :  { %748 = vrot.lane.b32.xlu1 %v665_v57, %s2543_s2  ;;  %2454 = vrcp.f32 %v743_v63 }
 0x689   :  { %v2453_v1 = vpop.eup %2452 }
 0x68a   :  { %v2455_v6 = vpop.eup %2454 }
 0x6ea   :  { %v636_v2 = vpop.permute.xlu0 %635 }
 0x6eb   :  { %v638_v3 = vmul.f32 %v2453_v1, %v636_v2 }
 0x6ed   :  { %640 = vrot.lane.b32.xlu0 %v638_v3, %s2543_s2 }
 0x6ee   :  { %v754_v7 = vpop.permute.xlu1 %753  ;;  %v631_v10 = vpop.permute.xlu0 %630 }
 0x6ef   :  { %v756_v8 = vmul.f32 %v2455_v6, %v754_v7  ;;  %v633_v11 = vmul.f32 %v2453_v1, %v631_v10 }
 0x6f1   :  { %758 = vrot.lane.b32.xlu1 %v756_v8, %s2543_s2 }
 0x6f2   :  { %v749_v14 = vpop.permute.xlu1 %748 }
 0x6f3   :  { %v751_v17 = vmul.f32 %v2455_v6, %v749_v14 }
 0x75f   :  { %v641_v15 = vpop.permute.xlu0 %640 }
 0x760   :  { %v643_v16 = vadd.f32 %v641_v15, %v633_v11 }
 0x762   :  { %2456 = vtanh.f32 %v643_v16 }
 0x763   :  { %v759_v18 = vpop.permute.xlu1 %758 }
 0x764   :  { %v761_v19 = vadd.f32 %v759_v18, %v751_v17  ;;  %v2024_v18 = vld [vmem:[%s2970_s0 + $0x8] sm:$0x3] }
 0x766   :  { %2458 = vtanh.f32 %v761_v19 }
 0x76c   :  { %v2457_v20 = vpop.eup %2456 }
 0x76d   :  { %646 = vrot.lane.b32.xlu0 %v2457_v20, %s2544_s12 }
 0x770   :  { %v2459_v21 = vpop.eup %2458 }
 0x771   :  { %764 = vrot.lane.b32.xlu1 %v2459_v21, %s2544_s12 }
 0x7df   :  { %v647_v22 = vpop.permute.xlu0 %646 }
 0x7e0   :  { %v649_v23 = vmul.f32 %v2453_v1, %v647_v22  ;;  %v2028_v22 = vld [vmem:[%s2971_s1 + $0x6] sm:$0x3] }
 0x7e2   :  { %651 = vrot.lane.b32.xlu0 %v649_v23, %s2543_s2 }
 0x7e3   :  { %v765_v24 = vpop.permute.xlu1 %764 }
 0x7e4   :  { %v767_v25 = vmul.f32 %v2455_v6, %v765_v24 }
 0x7e6   :  { %769 = vrot.lane.b32.xlu1 %v767_v25, %s2543_s2  ;;  %656 = vrot.lane.b32.xlu0 %v643_v16, %s2545_s13 }
 0x7ea   :  { %774 = vrot.lane.b32.xlu1 %v761_v19, %s2545_s13 }
 0x854   :  { %v652_v26 = vpop.permute.xlu0 %651 }
 0x855   :  { %654 = vst.msk [vmem:[#allocation2] sm:$0x3] %vm59_vm0, %v652_v26  ;;  %2011 = vst.msk [vmem:[%s2972_s4 + $0x4] sm:$0x3] %vm59_vm0, %v652_v26 }
 0x858   :  { %v770_v27 = vpop.permute.xlu1 %769  ;;  %v657_v28 = vpop.permute.xlu0 %656 }
 0x859   :  { %772 = vst.msk [vmem:[#allocation4] sm:$0x3] %vm59_vm0, %v770_v27  ;;  %2015 = vst.msk [vmem:[%s2973_s5 + $0xa] sm:$0x3] %vm59_vm0, %v770_v27 }
 0x85a   :  { %659 = vst.msk [vmem:[#allocation3] sm:$0x3] %vm59_vm0, %v657_v28 }
 0x85c   :  { %v775_v29 = vpop.permute.xlu1 %774  ;;  %v782_v30 = vld [vmem:[#allocation2] sm:$0x3] }
 0x85d   :  { %777 = vst.msk [vmem:[#allocation5] sm:$0x3] %vm59_vm0, %v775_v29  ;;  %2209 = vmatmul.mubr.msk.f32.vlgmr.msra.gmra.mrb[6].mxu0 %vm75_vm2, %v782_v30 }
 0x85e   :  { %2360 = vmatpush3.bf16.msra.mxu0 %v2595_v5  ;;  %2230 = vmatprep.mubr.msk.f32.mxu0 %vm2542_vm1, %v2541_v4 }
 0x85f   :  { %2361 = vmatprep.subr.bf16.mxu0 %v2540_v0 }
 0x860   :  { %v900_v31 = vld [vmem:[#allocation4] sm:$0x3] }
 0x861   :  { %2220 = vmatmul.mubr.msk.f32.vlgmr.msra.gmra.mrb[6].mxu1 %vm75_vm2, %v900_v31  ;;  %v783_v42 = vld [vmem:[#allocation3] sm:$0x3] }
 0x862   :  { %2363 = vmatpush3.bf16.msra.mxu0 %v2619_v12  ;;  %2366 = vmatpush3.bf16.msra.mxu1 %v2610_v9 }
 0x863   :  { %2367 = vmatprep.subr.bf16.mxu1 %v2540_v0  ;;  %2241 = vmatprep.mubr.msk.f32.mxu1 %vm2542_vm1, %v2541_v4 }
 0x864   :  { %2370 = vmatprep.subr.bf16.mxu0 %v2540_v0  ;;  %v901_v43 = vld [vmem:[#allocation5] sm:$0x3] }
 0x866   :  { %2369 = vmatpush3.bf16.msra.mxu1 %v2623_v13 }
 0x867   :  { %2376 = vmatprep.subr.bf16.mxu1 %v2540_v0 }
 0x930   :  { %v853_v33 = vpop.f32.mrb[6].mxu0 }
 0x931   :  { %v857_v34 = vadd.f32 %v2016_v32, %v853_v33  ;;  %v2210_v35 = vpop.f32.mrb[7].mxu0 }
 0x933   :  { %2460 = vtanh.f32 %v857_v34  ;;  %v2018_v44 = vmul.f32 -1.442695, %v857_v34 }
 0x934   :  { %v971_v37 = vpop.f32.mrb[6].mxu1 }
 0x935   :  { %v975_v38 = vadd.f32 %v2020_v36, %v971_v37  ;;  %v2221_v39 = vpop.f32.mrb[7].mxu1 }
 0x937   :  { %2462 = vtanh.f32 %v975_v38  ;;  %v2022_v45 = vmul.f32 -1.442695, %v975_v38 }
 0x938   :  { %2464 = vpow2.f32 %v2018_v44 }
 0x939   :  { %2466 = vpow2.f32 %v2022_v45 }
 0x93d   :  { %v2461_v40 = vpop.eup %2460 }
 0x93e   :  { %871 = vrot.lane.b32.xlu0 %v2461_v40, %s2544_s12 }
 0x941   :  { %v2463_v41 = vpop.eup %2462 }
 0x942   :  { %989 = vrot.lane.b32.xlu1 %v2463_v41, %s2544_s12  ;;  %866 = vrot.lane.b32.xlu0 %v783_v42, %s2543_s2  ;;  %v2465_v46 = vpop.eup %2464 }
 0x943   :  { %v861_v47 = vadd.f32 1.0, %v2465_v46  ;;  %v2467_v48 = vpop.eup %2466 }
 0x944   :  { %v979_v49 = vadd.f32 1.0, %v2467_v48 }
 0x945   :  { %2468 = vrcp.f32 %v861_v47 }
 0x946   :  { %984 = vrot.lane.b32.xlu1 %v901_v43, %s2543_s2  ;;  %2470 = vrcp.f32 %v979_v49 }
 0x94f   :  { %v2469_v50 = vpop.eup %2468 }
 0x950   :  { %v2471_v53 = vpop.eup %2470 }
 0x9b0   :  { %v872_v51 = vpop.permute.xlu0 %871 }
 0x9b1   :  { %v874_v52 = vmul.f32 %v2469_v50, %v872_v51 }
 0x9b3   :  { %876 = vrot.lane.b32.xlu0 %v874_v52, %s2543_s2 }
 0x9b4   :  { %v990_v54 = vpop.permute.xlu1 %989  ;;  %v867_v56 = vpop.permute.xlu0 %866 }
 0x9b5   :  { %v992_v55 = vmul.f32 %v2471_v53, %v990_v54  ;;  %v869_v57 = vmul.f32 %v2469_v50, %v867_v56 }
 0x9b7   :  { %994 = vrot.lane.b32.xlu1 %v992_v55, %s2543_s2 }
 0x9b8   :  { %v985_v58 = vpop.permute.xlu1 %984 }
 0x9b9   :  { %v987_v61 = vmul.f32 %v2471_v53, %v985_v58 }
 0xa25   :  { %v877_v59 = vpop.permute.xlu0 %876 }
 0xa26   :  { %v879_v60 = vadd.f32 %v877_v59, %v869_v57 }
 0xa28   :  { %2472 = vtanh.f32 %v879_v60 }
 0xa29   :  { %v995_v62 = vpop.permute.xlu1 %994 }
 0xa2a   :  { %v997_v63 = vadd.f32 %v995_v62, %v987_v61  ;;  %v2032_v62 = vld [vmem:[%s2970_s0 + $0xa] sm:$0x3] }
 0xa2c   :  { %2474 = vtanh.f32 %v997_v63 }
 0xa32   :  { %v2473_v1 = vpop.eup %2472 }
 0xa33   :  { %882 = vrot.lane.b32.xlu0 %v2473_v1, %s2544_s12 }
 0xa36   :  { %v2475_v2 = vpop.eup %2474 }
 0xa37   :  { %1000 = vrot.lane.b32.xlu1 %v2475_v2, %s2544_s12 }
 0xaa5   :  { %v883_v3 = vpop.permute.xlu0 %882 }
 0xaa6   :  { %v885_v6 = vmul.f32 %v2469_v50, %v883_v3  ;;  %v2036_v3 = vld [vmem:[%s2971_s1 + $0x4] sm:$0x3] }
 0xaa8   :  { %887 = vrot.lane.b32.xlu0 %v885_v6, %s2543_s2 }
 0xaa9   :  { %v1001_v7 = vpop.permute.xlu1 %1000 }
 0xaaa   :  { %v1003_v8 = vmul.f32 %v2471_v53, %v1001_v7 }
 0xaac   :  { %1005 = vrot.lane.b32.xlu1 %v1003_v8, %s2543_s2  ;;  %892 = vrot.lane.b32.xlu0 %v879_v60, %s2545_s13 }
 0xab0   :  { %1010 = vrot.lane.b32.xlu1 %v997_v63, %s2545_s13 }
 0xb1a   :  { %v888_v10 = vpop.permute.xlu0 %887 }
 0xb1b   :  { %890 = vst.msk [vmem:[#allocation2] sm:$0x3] %vm59_vm0, %v888_v10  ;;  %2019 = vst.msk [vmem:[%s2972_s4 + $0x6] sm:$0x3] %vm59_vm0, %v888_v10 }
 0xb1e   :  { %v1006_v11 = vpop.permute.xlu1 %1005  ;;  %v893_v14 = vpop.permute.xlu0 %892 }
 0xb1f   :  { %1008 = vst.msk [vmem:[#allocation4] sm:$0x3] %vm59_vm0, %v1006_v11  ;;  %2023 = vst.msk [vmem:[%s2973_s5 + $0x8] sm:$0x3] %vm59_vm0, %v1006_v11 }
 0xb20   :  { %895 = vst.msk [vmem:[#allocation3] sm:$0x3] %vm59_vm0, %v893_v14 }
 0xb22   :  { %v1011_v15 = vpop.permute.xlu1 %1010  ;;  %v1018_v16 = vld [vmem:[#allocation2] sm:$0x3] }
 0xb23   :  { %1013 = vst.msk [vmem:[#allocation5] sm:$0x3] %vm59_vm0, %v1011_v15  ;;  %2231 = vmatmul.mubr.msk.f32.vlgmr.msra.gmra.mrb[8].mxu0 %vm75_vm2, %v1018_v16 }
 0xb24   :  { %2372 = vmatpush3.bf16.msra.mxu0 %v2595_v5  ;;  %2252 = vmatprep.mubr.msk.f32.mxu0 %vm2542_vm1, %v2541_v4 }
 0xb25   :  { %2373 = vmatprep.subr.bf16.mxu0 %v2540_v0 }
 0xb26   :  { %v1136_v17 = vld [vmem:[#allocation4] sm:$0x3] }
 0xb27   :  { %2242 = vmatmul.mubr.msk.f32.vlgmr.msra.gmra.mrb[8].mxu1 %vm75_vm2, %v1136_v17  ;;  %v1019_v28 = vld [vmem:[#allocation3] sm:$0x3] }
 0xb28   :  { %2375 = vmatpush3.bf16.msra.mxu0 %v2619_v12  ;;  %2378 = vmatpush3.bf16.msra.mxu1 %v2610_v9 }
 0xb29   :  { %2379 = vmatprep.subr.bf16.mxu1 %v2540_v0  ;;  %2263 = vmatprep.mubr.msk.f32.mxu1 %vm2542_vm1, %v2541_v4 }
 0xb2a   :  { %2382 = vmatprep.subr.bf16.mxu0 %v2540_v0  ;;  %v1137_v29 = vld [vmem:[#allocation5] sm:$0x3] }
 0xb2c   :  { %2381 = vmatpush3.bf16.msra.mxu1 %v2623_v13 }
 0xb2d   :  { %2388 = vmatprep.subr.bf16.mxu1 %v2540_v0 }
 0xbf6   :  { %v1089_v19 = vpop.f32.mrb[8].mxu0 }
 0xbf7   :  { %v1093_v20 = vadd.f32 %v2024_v18, %v1089_v19  ;;  %v2232_v21 = vpop.f32.mrb[9].mxu0 }
 0xbf9   :  { %2476 = vtanh.f32 %v1093_v20  ;;  %v2026_v30 = vmul.f32 -1.442695, %v1093_v20 }
 0xbfa   :  { %v1207_v23 = vpop.f32.mrb[8].mxu1 }
 0xbfb   :  { %v1211_v24 = vadd.f32 %v2028_v22, %v1207_v23  ;;  %v2243_v25 = vpop.f32.mrb[9].mxu1 }
 0xbfd   :  { %2478 = vtanh.f32 %v1211_v24  ;;  %v2030_v31 = vmul.f32 -1.442695, %v1211_v24 }
 0xbfe   :  { %2480 = vpow2.f32 %v2026_v30 }
 0xbff   :  { %2482 = vpow2.f32 %v2030_v31 }
 0xc03   :  { %v2477_v26 = vpop.eup %2476 }
 0xc04   :  { %1107 = vrot.lane.b32.xlu0 %v2477_v26, %s2544_s12 }
 0xc07   :  { %v2479_v27 = vpop.eup %2478 }
 0xc08   :  { %1225 = vrot.lane.b32.xlu1 %v2479_v27, %s2544_s12  ;;  %1102 = vrot.lane.b32.xlu0 %v1019_v28, %s2543_s2  ;;  %v2481_v32 = vpop.eup %2480 }
 0xc09   :  { %v1097_v33 = vadd.f32 1.0, %v2481_v32  ;;  %v2483_v34 = vpop.eup %2482 }
 0xc0a   :  { %v1215_v35 = vadd.f32 1.0, %v2483_v34 }
 0xc0b   :  { %2484 = vrcp.f32 %v1097_v33 }
 0xc0c   :  { %1220 = vrot.lane.b32.xlu1 %v1137_v29, %s2543_s2  ;;  %2486 = vrcp.f32 %v1215_v35 }
 0xc15   :  { %v2485_v36 = vpop.eup %2484 }
 0xc16   :  { %v2487_v39 = vpop.eup %2486 }
 0xc76   :  { %v1108_v37 = vpop.permute.xlu0 %1107 }
 0xc77   :  { %v1110_v38 = vmul.f32 %v2485_v36, %v1108_v37 }
 0xc79   :  { %1112 = vrot.lane.b32.xlu0 %v1110_v38, %s2543_s2 }
 0xc7a   :  { %v1226_v40 = vpop.permute.xlu1 %1225  ;;  %v1103_v42 = vpop.permute.xlu0 %1102 }
 0xc7b   :  { %v1228_v41 = vmul.f32 %v2487_v39, %v1226_v40  ;;  %v1105_v43 = vmul.f32 %v2485_v36, %v1103_v42 }
 0xc7d   :  { %1230 = vrot.lane.b32.xlu1 %v1228_v41, %s2543_s2 }
 0xc7e   :  { %v1221_v44 = vpop.permute.xlu1 %1220 }
 0xc7f   :  { %v1223_v47 = vmul.f32 %v2487_v39, %v1221_v44 }
 0xceb   :  { %v1113_v45 = vpop.permute.xlu0 %1112 }
 0xcec   :  { %v1115_v46 = vadd.f32 %v1113_v45, %v1105_v43 }
 0xcee   :  { %2488 = vtanh.f32 %v1115_v46 }
 0xcef   :  { %v1231_v48 = vpop.permute.xlu1 %1230 }
 0xcf0   :  { %v1233_v49 = vadd.f32 %v1231_v48, %v1223_v47 }
 0xcf2   :  { %2490 = vtanh.f32 %v1233_v49 }
 0xcf8   :  { %v2489_v50 = vpop.eup %2488 }
 0xcf9   :  { %1118 = vrot.lane.b32.xlu0 %v2489_v50, %s2544_s12 }
 0xcfc   :  { %v2491_v51 = vpop.eup %2490 }
 0xcfd   :  { %1236 = vrot.lane.b32.xlu1 %v2491_v51, %s2544_s12 }
 0xd6b   :  { %v1119_v52 = vpop.permute.xlu0 %1118 }
 0xd6c   :  { %v1121_v53 = vmul.f32 %v2485_v36, %v1119_v52 }
 0xd6e   :  { %1123 = vrot.lane.b32.xlu0 %v1121_v53, %s2543_s2 }
 0xd6f   :  { %v1237_v54 = vpop.permute.xlu1 %1236 }
 0xd70   :  { %v1239_v55 = vmul.f32 %v2487_v39, %v1237_v54 }
 0xd72   :  { %1241 = vrot.lane.b32.xlu1 %v1239_v55, %s2543_s2  ;;  %1128 = vrot.lane.b32.xlu0 %v1115_v46, %s2545_s13 }
 0xd76   :  { %1246 = vrot.lane.b32.xlu1 %v1233_v49, %s2545_s13 }
 0xde0   :  { %v1124_v56 = vpop.permute.xlu0 %1123 }
 0xde1   :  { %1126 = vst.msk [vmem:[#allocation2] sm:$0x3] %vm59_vm0, %v1124_v56  ;;  %2027 = vst.msk [vmem:[%s2972_s4 + $0x8] sm:$0x3] %vm59_vm0, %v1124_v56 }
 0xde4   :  { %v1242_v57 = vpop.permute.xlu1 %1241  ;;  %v1129_v58 = vpop.permute.xlu0 %1128 }
 0xde5   :  { %1244 = vst.msk [vmem:[#allocation4] sm:$0x3] %vm59_vm0, %v1242_v57  ;;  %2031 = vst.msk [vmem:[%s2973_s5 + $0x6] sm:$0x3] %vm59_vm0, %v1242_v57 }
 0xde6   :  { %1131 = vst.msk [vmem:[#allocation3] sm:$0x3] %vm59_vm0, %v1129_v58 }
 0xde8   :  { %v1247_v59 = vpop.permute.xlu1 %1246  ;;  %v1254_v60 = vld [vmem:[#allocation2] sm:$0x3] }
 0xde9   :  { %1249 = vst.msk [vmem:[#allocation5] sm:$0x3] %vm59_vm0, %v1247_v59  ;;  %2253 = vmatmul.mubr.msk.f32.vlgmr.msra.gmra.mrb[10].mxu0 %vm75_vm2, %v1254_v60 }
 0xdea   :  { %2384 = vmatpush3.bf16.msra.mxu0 %v2595_v5  ;;  %2274 = vmatprep.mubr.msk.f32.mxu0 %vm2542_vm1, %v2541_v4 }
 0xdeb   :  { %2385 = vmatprep.subr.bf16.mxu0 %v2540_v0 }
 0xdec   :  { %v1372_v61 = vld [vmem:[#allocation4] sm:$0x3] }
 0xded   :  { %2264 = vmatmul.mubr.msk.f32.vlgmr.msra.gmra.mrb[10].mxu1 %vm75_vm2, %v1372_v61  ;;  %v1255_v14 = vld [vmem:[#allocation3] sm:$0x3] }
 0xdee   :  { %2387 = vmatpush3.bf16.msra.mxu0 %v2619_v12  ;;  %2390 = vmatpush3.bf16.msra.mxu1 %v2610_v9 }
 0xdef   :  { %2391 = vmatprep.subr.bf16.mxu1 %v2540_v0  ;;  %2285 = vmatprep.mubr.msk.f32.mxu1 %vm2542_vm1, %v2541_v4 }
 0xdf0   :  { %2394 = vmatprep.subr.bf16.mxu0 %v2540_v0  ;;  %v1373_v15 = vld [vmem:[#allocation5] sm:$0x3] }
 0xdf2   :  { %2393 = vmatpush3.bf16.msra.mxu1 %v2623_v13 }
 0xdf3   :  { %2400 = vmatprep.subr.bf16.mxu1 %v2540_v0 }
 0xebc   :  { %v1325_v63 = vpop.f32.mrb[10].mxu0 }
 0xebd   :  { %v1329_v1 = vadd.f32 %v2032_v62, %v1325_v63  ;;  %v2254_v2 = vpop.f32.mrb[11].mxu0 }
 0xebf   :  { %2492 = vtanh.f32 %v1329_v1  ;;  %v2034_v16 = vmul.f32 -1.442695, %v1329_v1 }
 0xec0   :  { %v1443_v6 = vpop.f32.mrb[10].mxu1 }
 0xec1   :  { %v1447_v7 = vadd.f32 %v2036_v3, %v1443_v6  ;;  %v2265_v8 = vpop.f32.mrb[11].mxu1 }
 0xec3   :  { %2494 = vtanh.f32 %v1447_v7  ;;  %v2038_v17 = vmul.f32 -1.442695, %v1447_v7 }
 0xec4   :  { %2496 = vpow2.f32 %v2034_v16 }
 0xec5   :  { %2498 = vpow2.f32 %v2038_v17 }
 0xec9   :  { %v2493_v10 = vpop.eup %2492 }
 0xeca   :  { %1343 = vrot.lane.b32.xlu0 %v2493_v10, %s2544_s12 }
 0xecd   :  { %v2495_v11 = vpop.eup %2494 }
 0xece   :  { %1461 = vrot.lane.b32.xlu1 %v2495_v11, %s2544_s12  ;;  %1338 = vrot.lane.b32.xlu0 %v1255_v14, %s2543_s2  ;;  %v2497_v18 = vpop.eup %2496 }
 0xecf   :  { %v1333_v19 = vadd.f32 1.0, %v2497_v18  ;;  %v2499_v20 = vpop.eup %2498 }
 0xed0   :  { %v1451_v21 = vadd.f32 1.0, %v2499_v20 }
 0xed1   :  { %2500 = vrcp.f32 %v1333_v19 }
 0xed2   :  { %1456 = vrot.lane.b32.xlu1 %v1373_v15, %s2543_s2  ;;  %2502 = vrcp.f32 %v1451_v21 }
 0xedb   :  { %v2501_v22 = vpop.eup %2500 }
 0xedc   :  { %v2503_v25 = vpop.eup %2502 }
 0xf3c   :  { %v1344_v23 = vpop.permute.xlu0 %1343 }
 0xf3d   :  { %v1346_v24 = vmul.f32 %v2501_v22, %v1344_v23 }
 0xf3f   :  { %1348 = vrot.lane.b32.xlu0 %v1346_v24, %s2543_s2 }
 0xf40   :  { %v1462_v26 = vpop.permute.xlu1 %1461  ;;  %v1339_v28 = vpop.permute.xlu0 %1338 }
 0xf41   :  { %v1464_v27 = vmul.f32 %v2503_v25, %v1462_v26  ;;  %v1341_v29 = vmul.f32 %v2501_v22, %v1339_v28  ;;  %v2048_v28 = vld [vmem:[%s2970_s0 + $0xe] sm:$0x3] }
 0xf43   :  { %1466 = vrot.lane.b32.xlu1 %v1464_v27, %s2543_s2 }
 0xf44   :  { %v1457_v30 = vpop.permute.xlu1 %1456 }
 0xf45   :  { %v1459_v33 = vmul.f32 %v2503_v25, %v1457_v30 }
 0xfb1   :  { %v1349_v31 = vpop.permute.xlu0 %1348 }
 0xfb2   :  { %v1351_v32 = vadd.f32 %v1349_v31, %v1341_v29 }
 0xfb4   :  { %2504 = vtanh.f32 %v1351_v32 }
 0xfb5   :  { %v1467_v34 = vpop.permute.xlu1 %1466 }
 0xfb6   :  { %v1469_v35 = vadd.f32 %v1467_v34, %v1459_v33 }
 0xfb8   :  { %2506 = vtanh.f32 %v1469_v35 }
 0xfbe   :  { %v2505_v36 = vpop.eup %2504 }
 0xfbf   :  { %1354 = vrot.lane.b32.xlu0 %v2505_v36, %s2544_s12 }
 0xfc2   :  { %v2507_v37 = vpop.eup %2506 }
 0xfc3   :  { %1472 = vrot.lane.b32.xlu1 %v2507_v37, %s2544_s12 }
0x1031   :  { %v1355_v38 = vpop.permute.xlu0 %1354 }
0x1032   :  { %v1357_v39 = vmul.f32 %v2501_v22, %v1355_v38 }
0x1034   :  { %1359 = vrot.lane.b32.xlu0 %v1357_v39, %s2543_s2 }
0x1035   :  { %v1473_v40 = vpop.permute.xlu1 %1472 }
0x1036   :  { %v1475_v41 = vmul.f32 %v2503_v25, %v1473_v40 }
0x1038   :  { %1477 = vrot.lane.b32.xlu1 %v1475_v41, %s2543_s2  ;;  %1364 = vrot.lane.b32.xlu0 %v1351_v32, %s2545_s13  ;;  %v1842_v32 = vld [vmem:[%s2971_s1] sm:$0x3] }
0x103c   :  { %1482 = vrot.lane.b32.xlu1 %v1469_v35, %s2545_s13 }
0x10a6   :  { %v1360_v42 = vpop.permute.xlu0 %1359 }
0x10a7   :  { %1362 = vst.msk [vmem:[#allocation2] sm:$0x3] %vm59_vm0, %v1360_v42  ;;  %2035 = vst.msk [vmem:[%s2972_s4 + $0xa] sm:$0x3] %vm59_vm0, %v1360_v42 }
0x10aa   :  { %v1478_v43 = vpop.permute.xlu1 %1477  ;;  %v1365_v44 = vpop.permute.xlu0 %1364 }
0x10ab   :  { %1480 = vst.msk [vmem:[#allocation4] sm:$0x3] %vm59_vm0, %v1478_v43  ;;  %2039 = vst.msk [vmem:[%s2973_s5 + $0x4] sm:$0x3] %vm59_vm0, %v1478_v43 }
0x10ac   :  { %1367 = vst.msk [vmem:[#allocation3] sm:$0x3] %vm59_vm0, %v1365_v44 }
0x10ae   :  { %v1483_v45 = vpop.permute.xlu1 %1482  ;;  %v1490_v46 = vld [vmem:[#allocation2] sm:$0x3] }
0x10af   :  { %1485 = vst.msk [vmem:[#allocation5] sm:$0x3] %vm59_vm0, %v1483_v45  ;;  %2275 = vmatmul.mubr.msk.f32.vlgmr.msra.gmra.mrb[12].mxu0 %vm75_vm2, %v1490_v46 }
0x10b0   :  { %2396 = vmatpush3.bf16.msra.mxu0 %v2595_v5  ;;  %2296 = vmatprep.mubr.msk.f32.mxu0 %vm2542_vm1, %v2541_v4  ;;  %v2040_v5 = vld [vmem:[%s2970_s0 + $0xc] sm:$0x3] }
0x10b1   :  { %2397 = vmatprep.subr.bf16.mxu0 %v2540_v0 }
0x10b2   :  { %v1608_v47 = vld [vmem:[#allocation4] sm:$0x3] }
0x10b3   :  { %2286 = vmatmul.mubr.msk.f32.vlgmr.msra.gmra.mrb[12].mxu1 %vm75_vm2, %v1608_v47 }
0x10b4   :  { %2399 = vmatpush3.bf16.msra.mxu0 %v2619_v12  ;;  %2402 = vmatpush3.bf16.msra.mxu1 %v2610_v9  ;;  %v2044_v12 = vld [vmem:[%s2971_s1 + $0x2] sm:$0x3] }
0x10b5   :  { %2403 = vmatprep.subr.bf16.mxu1 %v2540_v0  ;;  %2307 = vmatprep.mubr.msk.f32.mxu1 %vm2542_vm1, %v2541_v4 }
0x10b6   :  { %v1609_v53 = vld [vmem:[#allocation5] sm:$0x3] }
0x10b8   :  { %2405 = vmatpush3.bf16.msra.mxu1 %v2623_v13  ;;  %v1491_v13 = vld [vmem:[#allocation3] sm:$0x3] }
0x1182   :  { %v1561_v48 = vpop.f32.mrb[12].mxu0 }
0x1183   :  { %v1565_v49 = vadd.f32 %v2040_v5, %v1561_v48  ;;  %v2276_v50 = vpop.f32.mrb[13].mxu0 }
0x1185   :  { %2508 = vtanh.f32 %v1565_v49  ;;  %v2042_v54 = vmul.f32 -1.442695, %v1565_v49 }
0x1186   :  { %v1679_v9 = vpop.f32.mrb[12].mxu1 }
0x1187   :  { %v1683_v51 = vadd.f32 %v2044_v12, %v1679_v9  ;;  %v2287_v0 = vpop.f32.mrb[13].mxu1 }
0x1189   :  { %2510 = vtanh.f32 %v1683_v51  ;;  %v2046_v55 = vmul.f32 -1.442695, %v1683_v51 }
0x118a   :  { %2512 = vpow2.f32 %v2042_v54 }
0x118b   :  { %2514 = vpow2.f32 %v2046_v55 }
0x118f   :  { %v2509_v52 = vpop.eup %2508 }
0x1190   :  { %1579 = vrot.lane.b32.xlu0 %v2509_v52, %s2544_s12 }
0x1193   :  { %v2511_v4 = vpop.eup %2510 }
0x1194   :  { %1697 = vrot.lane.b32.xlu1 %v2511_v4, %s2544_s12  ;;  %1574 = vrot.lane.b32.xlu0 %v1491_v13, %s2543_s2  ;;  %v2513_v56 = vpop.eup %2512 }
0x1195   :  { %v1569_v57 = vadd.f32 1.0, %v2513_v56  ;;  %v2515_v58 = vpop.eup %2514 }
0x1196   :  { %v1687_v59 = vadd.f32 1.0, %v2515_v58 }
0x1197   :  { %2516 = vrcp.f32 %v1569_v57 }
0x1198   :  { %1692 = vrot.lane.b32.xlu1 %v1609_v53, %s2543_s2  ;;  %2518 = vrcp.f32 %v1687_v59 }
0x11a1   :  { %v2517_v60 = vpop.eup %2516 }
0x11a2   :  { %v2519_v63 = vpop.eup %2518 }
0x1202   :  { %v1580_v61 = vpop.permute.xlu0 %1579 }
0x1203   :  { %v1582_v62 = vmul.f32 %v2517_v60, %v1580_v61 }
0x1205   :  { %1584 = vrot.lane.b32.xlu0 %v1582_v62, %s2543_s2 }
0x1206   :  { %v1698_v1 = vpop.permute.xlu1 %1697  ;;  %v1575_v3 = vpop.permute.xlu0 %1574 }
0x1207   :  { %v1700_v2 = vmul.f32 %v2519_v63, %v1698_v1  ;;  %v1577_v6 = vmul.f32 %v2517_v60, %v1575_v3 }
0x1209   :  { %1702 = vrot.lane.b32.xlu1 %v1700_v2, %s2543_s2 }
0x120a   :  { %v1693_v7 = vpop.permute.xlu1 %1692 }
0x120b   :  { %v1695_v11 = vmul.f32 %v2519_v63, %v1693_v7 }
0x1277   :  { %v1585_v8 = vpop.permute.xlu0 %1584 }
0x1278   :  { %v1587_v10 = vadd.f32 %v1585_v8, %v1577_v6 }
0x127a   :  { %2520 = vtanh.f32 %v1587_v10 }
0x127b   :  { %v1703_v14 = vpop.permute.xlu1 %1702 }
0x127c   :  { %v1705_v15 = vadd.f32 %v1703_v14, %v1695_v11 }
0x127e   :  { %2522 = vtanh.f32 %v1705_v15 }
0x1284   :  { %v2521_v16 = vpop.eup %2520 }
0x1285   :  { %1590 = vrot.lane.b32.xlu0 %v2521_v16, %s2544_s12 }
0x1288   :  { %v2523_v17 = vpop.eup %2522 }
0x1289   :  { %1708 = vrot.lane.b32.xlu1 %v2523_v17, %s2544_s12 }
0x12f7   :  { %v1591_v18 = vpop.permute.xlu0 %1590 }
0x12f8   :  { %v1593_v19 = vmul.f32 %v2517_v60, %v1591_v18 }
0x12fa   :  { %1595 = vrot.lane.b32.xlu0 %v1593_v19, %s2543_s2 }
0x12fb   :  { %v1709_v20 = vpop.permute.xlu1 %1708 }
0x12fc   :  { %v1711_v21 = vmul.f32 %v2519_v63, %v1709_v20 }
0x12fe   :  { %1713 = vrot.lane.b32.xlu1 %v1711_v21, %s2543_s2  ;;  %1600 = vrot.lane.b32.xlu0 %v1587_v10, %s2545_s13 }
0x1302   :  { %1718 = vrot.lane.b32.xlu1 %v1705_v15, %s2545_s13 }
0x136c   :  { %v1596_v22 = vpop.permute.xlu0 %1595 }
0x136d   :  { %1598 = vst.msk [vmem:[#allocation2] sm:$0x3] %vm59_vm0, %v1596_v22  ;;  %2043 = vst.msk [vmem:[%s2972_s4 + $0xc] sm:$0x3] %vm59_vm0, %v1596_v22 }
0x1370   :  { %v1714_v23 = vpop.permute.xlu1 %1713  ;;  %v1601_v24 = vpop.permute.xlu0 %1600 }
0x1371   :  { %1716 = vst.msk [vmem:[#allocation4] sm:$0x3] %vm59_vm0, %v1714_v23  ;;  %2047 = vst.msk [vmem:[%s2973_s5 + $0x2] sm:$0x3] %vm59_vm0, %v1714_v23 }
0x1372   :  { %1603 = vst.msk [vmem:[#allocation3] sm:$0x3] %vm59_vm0, %v1601_v24 }
0x1374   :  { %v1719_v25 = vpop.permute.xlu1 %1718  ;;  %v1726_v26 = vld [vmem:[#allocation2] sm:$0x3] }
0x1375   :  { %1721 = vst.msk [vmem:[#allocation5] sm:$0x3] %vm59_vm0, %v1719_v25  ;;  %2297 = vmatmul.mubr.msk.f32.vlgmr.msra.gmra.mrb[14].mxu0 %vm75_vm2, %v1726_v26 }
0x1378   :  { %v1843_v27 = vld [vmem:[#allocation4] sm:$0x3] }
0x1379   :  { %2308 = vmatmul.mubr.msk.f32.vlgmr.msra.gmra.mrb[14].mxu1 %vm75_vm2, %v1843_v27  ;;  %v1727_v38 = vld [vmem:[#allocation3] sm:$0x3] }
0x137c   :  { %v1844_v39 = vld [vmem:[#allocation5] sm:$0x3] }
0x1448   :  { %v1797_v29 = vpop.f32.mrb[14].mxu0 }
0x1449   :  { %v1801_v30 = vadd.f32 %v2048_v28, %v1797_v29  ;;  %v2298_v31 = vpop.f32.mrb[15].mxu0 }
0x144b   :  { %2524 = vtanh.f32 %v1801_v30  ;;  %v2050_v40 = vmul.f32 -1.442695, %v1801_v30 }
0x144c   :  { %v1914_v33 = vpop.f32.mrb[14].mxu1 }
0x144d   :  { %v1918_v34 = vadd.f32 %v1914_v33, %v1842_v32  ;;  %v2309_v35 = vpop.f32.mrb[15].mxu1 }
0x144f   :  { %2526 = vtanh.f32 %v1918_v34  ;;  %v2053_v41 = vmul.f32 -1.442695, %v1918_v34 }
0x1450   :  { %2528 = vpow2.f32 %v2050_v40 }
0x1451   :  { %2530 = vpow2.f32 %v2053_v41 }
0x1455   :  { %v2525_v36 = vpop.eup %2524 }
0x1456   :  { %1815 = vrot.lane.b32.xlu0 %v2525_v36, %s2544_s12 }
0x1459   :  { %v2527_v37 = vpop.eup %2526 }
0x145a   :  { %1932 = vrot.lane.b32.xlu1 %v2527_v37, %s2544_s12  ;;  %1810 = vrot.lane.b32.xlu0 %v1727_v38, %s2543_s2  ;;  %v2529_v42 = vpop.eup %2528 }
0x145b   :  { %v1805_v43 = vadd.f32 1.0, %v2529_v42  ;;  %v2531_v44 = vpop.eup %2530 }
0x145c   :  { %v1922_v45 = vadd.f32 1.0, %v2531_v44 }
0x145d   :  { %2532 = vrcp.f32 %v1805_v43 }
0x145e   :  { %1927 = vrot.lane.b32.xlu1 %v1844_v39, %s2543_s2  ;;  %2534 = vrcp.f32 %v1922_v45 }
0x1467   :  { %v2533_v46 = vpop.eup %2532 }
0x1468   :  { %v2535_v48 = vpop.eup %2534 }
0x14c8   :  { %v1816_v47 = vpop.permute.xlu0 %1815 }
0x14c9   :  { %v1818_v5 = vmul.f32 %v2533_v46, %v1816_v47 }
0x14cb   :  { %1820 = vrot.lane.b32.xlu0 %v1818_v5, %s2543_s2 }
0x14cc   :  { %v1933_v49 = vpop.permute.xlu1 %1932  ;;  %v1811_v12 = vpop.permute.xlu0 %1810 }
0x14cd   :  { %v1935_v50 = vmul.f32 %v2535_v48, %v1933_v49  ;;  %v1813_v9 = vmul.f32 %v2533_v46, %v1811_v12 }
0x14cf   :  { %1937 = vrot.lane.b32.xlu1 %v1935_v50, %s2543_s2 }
0x14d0   :  { %v1928_v51 = vpop.permute.xlu1 %1927 }
0x14d1   :  { %v1930_v4 = vmul.f32 %v2535_v48, %v1928_v51 }
0x153d   :  { %v1821_v0 = vpop.permute.xlu0 %1820 }
0x153e   :  { %v1823_v52 = vadd.f32 %v1821_v0, %v1813_v9 }
0x1540   :  { %2536 = vtanh.f32 %v1823_v52 }
0x1541   :  { %v1938_v13 = vpop.permute.xlu1 %1937 }
0x1542   :  { %v1940_v53 = vadd.f32 %v1938_v13, %v1930_v4 }
0x1544   :  { %2538 = vtanh.f32 %v1940_v53 }
0x154a   :  { %v2537_v54 = vpop.eup %2536 }
0x154b   :  { %1826 = vrot.lane.b32.xlu0 %v2537_v54, %s2544_s12 }
0x154e   :  { %v2539_v55 = vpop.eup %2538 }
0x154f   :  { %1943 = vrot.lane.b32.xlu1 %v2539_v55, %s2544_s12 }
0x1553   :  { %1836 = vrot.lane.b32.xlu1 %v1823_v52, %s2545_s13 }
0x1557   :  { %1953 = vrot.lane.b32.xlu1 %v1940_v53, %s2545_s13 }
0x15bd   :  { %v1827_v56 = vpop.permute.xlu0 %1826 }
0x15be   :  { %v1829_v57 = vmul.f32 %v2533_v46, %v1827_v56 }
0x15c0   :  { %1831 = vrot.lane.b32.xlu0 %v1829_v57, %s2543_s2 }
0x15c1   :  { %v1944_v58 = vpop.permute.xlu1 %1943 }
0x15c2   :  { %v1946_v59 = vmul.f32 %v2535_v48, %v1944_v58 }
0x15c4   :  { %1948 = vrot.lane.b32.xlu0 %v1946_v59, %s2543_s2 }
0x15c5   :  { %v1837_v60 = vpop.permute.xlu1 %1836 }
0x15c6   :  { %1839 = vst.msk [vmem:[#allocation3] sm:$0x3] %vm59_vm0, %v1837_v60 }
0x15c9   :  { %v1954_v61 = vpop.permute.xlu1 %1953 }
0x15ca   :  { %1956 = vst.msk [vmem:[#allocation5] sm:$0x3] %vm59_vm0, %v1954_v61 }
0x1632   :  { %v1832_v62 = vpop.permute.xlu0 %1831 }
0x1633   :  { %1834 = vst.msk [vmem:[#allocation2] sm:$0x3] %vm59_vm0, %v1832_v62  ;;  %2051 = vst.msk [vmem:[%s2972_s4 + $0xe] sm:$0x3] %vm59_vm0, %v1832_v62 }
0x1636   :  { %v1949_v63 = vpop.permute.xlu0 %1948 }
0x1637   :  { %1951 = vst.msk [vmem:[#allocation4] sm:$0x3] %vm59_vm0, %v1949_v63  ;;  %1957 = vst.msk [vmem:[%s2973_s5] sm:$0x3] %vm59_vm0, %v1949_v63 }

</bundles_post_ra>
